<compile_context>
chip_gen: v7x
topology: tpu7x:2x2x1
jax: 0.10.0
libtpu: 0.0.40
codegen_flags: <defaults>
</compile_context>

<pallas_src>
import math

import jax
import jax.numpy as jnp
from jax.experimental import pallas as pl
from jax.experimental.pallas import tpu as pltpu

NUM_GROUPS = 16
EPS = 1e-5
SKIP_SCALE = 0.5 ** 0.5


def _silu(v):
    return v * jax.nn.sigmoid(v)


def _round_up(n, m):
    return -(-n // m) * m


# ---------------------------------------------------------------------------
# Host-side constants
# ---------------------------------------------------------------------------
def _group_avg_matrix(C, G=NUM_GROUPS):
    """[C, C] block-averaging matrix: P[i, j] = 1/(C/G) if i, j share a group."""
    assert C % G == 0, f"GroupNorm channel count {C} not divisible by {G}"
    n = C // G
    idx = jnp.arange(C)
    same = (idx[:, None] // n) == (idx[None, :] // n)
    return same.astype(jnp.float32) / float(n)


# ---------------------------------------------------------------------------
# Kernel
# ---------------------------------------------------------------------------
def _make_kernel(d, n_p, c_to_pidx, layer_dims, affine_offsets):
    """layer_dims = [(cin, cout), ...]; affine_offsets = lane offsets into prm_all."""

    def kernel(*refs):
        out_ref = refs[-1]
        it = iter(refs[:-1])
        nxt = lambda: next(it)

        theta_ref, x_ref, t_ref, div_ref, phase_ref = (nxt() for _ in range(5))
        p_refs = [nxt() for _ in range(n_p)]

        def mm(a, w_ref):
            w = w_ref[...]
            return jnp.dot(a.astype(w.dtype), w, preferred_element_type=jnp.float32)

        def group_norm(v, g_ref, b_ref):
            C = v.shape[-1]
            P = p_refs[c_to_pidx[C]][...]          # [C, C] averaging matrix (f32)
            # Two independent MXU pushes; var = E[x^2] - mean^2 (clamped >= 0).
            mean_c = jnp.dot(v, P, preferred_element_type=jnp.float32)
            sq_c = jnp.dot(v * v, P, preferred_element_type=jnp.float32)
            var_c = jnp.maximum(sq_c - mean_c * mean_c, 0.0)
            return (v - mean_c) * jax.lax.rsqrt(var_c + EPS) * g_ref[...] + b_ref[...]

        # input_layer / cond_layer
        W, b = nxt(), nxt()
        theta_emb = mm(theta_ref[...], W) + b[...]
        W, b = nxt(), nxt()
        x_emb = mm(x_ref[...], W) + b[...]

        # time embedding: cat(sin(t*div), cos(t*div)) == sin(t*div + phase),
        # phase = 0 for the first d/2 lanes and pi/2 for the second half.
        t_emb = jnp.sin(t_ref[...] * div_ref[...] + phase_ref[...])

        # embedding_map: Linear -> GroupNorm -> SiLU -> Linear
        e = t_emb + x_emb
        W1, b1, g_e, be_e, W2, b2 = (nxt() for _ in range(6))
        h = mm(e, W1) + b1[...]
        emb = mm(_silu(group_norm(h, g_e, be_e)), W2) + b2[...]

        # All per-layer affine projections in one lane-dense, tile-aligned matmul.
        Wa_all, ba_all = nxt(), nxt()
        prm_all = mm(emb, Wa_all) + ba_all[...]

        # residual _FBlock stack
        h = theta_emb
        for li, (cin, cout) in enumerate(layer_dims):
            g0, be0, Wc0, bc0, g1, be1, Wc1, Wsk, bcs = (nxt() for _ in range(9))
            orig = h
            y = _silu(group_norm(h, g0, be0))
            y = mm(y, Wc0) + bc0[...]
            off = affine_offsets[li]               # 128-lane-aligned static slice
            y = _silu(group_norm(y + prm_all[:, off:off + cout], g1, be1))
            # TODO(synk): nn.functional.dropout(p=0.1) acts only in training mode;
            # the kernel implements eval-mode (identity) dropout.
            # conv1 + skip as two accumulated dots; SKIP_SCALE pre-folded on host.
            h = mm(y, Wc1) + mm(orig, Wsk) + bcs[...]

        # final_layer: GroupNorm -> SiLU -> Linear (no bias, lane-padded to 128)
        gf, bf, Wf = nxt(), nxt(), nxt()
        y = _silu(group_norm(h, gf, bf))
        out_ref[...] = mm(y, Wf)

    return kernel


# ---------------------------------------------------------------------------
# Wrapper
# ---------------------------------------------------------------------------
def fnet_forward(theta, x, t, div_full, params, n_layers, *,
                 block_b=512, matmul_dtype=jnp.float32):
    """Pallas-fused FNet forward. Returns [B, dim_input] (== theta.shape)."""
    B, dim_input = theta.shape
    dim_cond = x.shape[-1]
    d = div_full.shape[-1]
    dlast = d // 2 ** n_layers
    out_cols = _round_up(max(dim_input, 128), 128)   # lane-dense output slab

    cast = lambda W: W.astype(matmul_dtype)

    # ----- host-side constants / fused weights ------------------------------
    gn_channels = sorted({2 * d} | {d // 2 ** i for i in range(n_layers + 1)})
    c_to_pidx = {c: i for i, c in enumerate(gn_channels)}
    P_list = [_group_avg_matrix(c) for c in gn_channels]

    Wi, bi = params["input"]
    Wc, bc = params["cond"]
    W1, b1, g_e, be_e, W2, b2 = params["emb_map"]
    layer_dims = [(d // 2 ** i, d // 2 ** (i + 1)) for i in range(n_layers)]

    # Hoisted affine slab: each layer's chunk zero-padded to a 128-lane boundary.
    Wa_parts, ba_parts, affine_offsets = [], [], []
    off = 0
    for blk, (cin, cout) in zip(params["blocks"], layer_dims):
        pc = _round_up(cout, 128)
        Wa, ba = blk["Wa"], blk["ba"]
        if pc != cout:
            Wa = jnp.pad(Wa, ((0, 0), (0, pc - cout)))
            ba = jnp.pad(ba, ((0, 0), (0, pc - cout)))
        Wa_parts.append(Wa)
        ba_parts.append(ba)
        affine_offsets.append(off)
        off += pc
    Wa_all = cast(jnp.concatenate(Wa_parts, axis=1))
    ba_all = jnp.concatenate(ba_parts, axis=1)

    # Lane-dense final projection (zero output columns beyond dim_input).
    gf, bf, Wf = params["final"]
    Wf_pad = jnp.zeros((dlast, out_cols), jnp.float32).at[:, :dim_input].set(Wf)

    weights = [cast(Wi), bi, cast(Wc), bc, cast(W1), b1, g_e, be_e, cast(W2), b2,
               Wa_all, ba_all]
    for blk in params["blocks"]:
        # SKIP_SCALE folded into the conv1/skip weights and bias (exact transform).
        Wc1s = cast(blk["Wc1"] * SKIP_SCALE)
        Wsks = cast(blk["Wsk"] * SKIP_SCALE)
        bcs = (blk["bc1"] + blk["bsk"]) * SKIP_SCALE
        weights += [blk["g0"], blk["be0"], cast(blk["Wc0"]), blk["bc0"],
                    blk["g1"], blk["be1"], Wc1s, Wsks, bcs]
    weights += [gf, bf, cast(Wf_pad)]

    # Time-embedding phase vector: sin(x + pi/2) == cos(x).
    phase = jnp.concatenate(
        [jnp.zeros((1, d // 2), jnp.float32),
         jnp.full((1, d // 2), jnp.pi / 2, jnp.float32)], axis=1)

    # ----- batch padding / grid ---------------------------------------------
    Bp0 = _round_up(B, 8)                      # f32 sublane tile
    if Bp0 <= 2 * block_b:
        # Aim for >= 2 grid steps so both v7x TensorCores get work.
        TB = max(8, _round_up(-(-Bp0 // 2), 8))
    else:
        TB = block_b
    Bp = _round_up(B, TB)

    def pad_b(a):
        return a if a.shape[0] == Bp else jnp.pad(a, ((0, Bp - a.shape[0]), (0, 0)))

    theta_p, x_p, t_p = pad_b(theta), pad_b(x), pad_b(t)

    const_inputs = [div_full, phase] + P_list + weights
    inputs = [theta_p, x_p, t_p] + const_inputs

    def const_spec(a):
        # Grid-invariant: single-buffer so weights / P matrices don't pay 2x VMEM.
        return pl.BlockSpec(a.shape, lambda i: (0, 0),
                            pipeline_mode=pl.Buffered(1))

    in_specs = [
        pl.BlockSpec((TB, dim_input), lambda i: (i, 0)),
        pl.BlockSpec((TB, dim_cond), lambda i: (i, 0)),
        pl.BlockSpec((TB, 1), lambda i: (i, 0)),
    ] + [const_spec(a) for a in const_inputs]

    # ----- advisory cost estimate -------------------------------------------
    flops = 0
    for Wm in (Wi, Wc, W1, W2):
        flops += 2 * Bp * Wm.shape[0] * Wm.shape[1]
    flops += 2 * Bp * d * Wa_all.shape[1]
    for cin, cout in layer_dims:
        flops += 2 * Bp * cin * cout                  # conv0
        flops += 2 * Bp * cout * cout                 # conv1
        flops += 2 * Bp * cin * cout                  # skip
    flops += 2 * Bp * dlast * out_cols                # final (lane-padded)
    gn_calls = [2 * d] + [c for (ci, co) in layer_dims for c in (ci, co)] + [dlast]
    flops += sum(2 * 2 * Bp * c * c for c in gn_calls)    # 2 matmuls per GroupNorm
    transcendentals = Bp * (d + 2 * d
                            + sum(ci + co for ci, co in layer_dims) + dlast)
    bytes_accessed = (sum(int(a.size) * a.dtype.itemsize for a in inputs)
                      + Bp * out_cols * 4)

    # ----- VMEM limit (constants single-buffered + activation headroom) -----
    const_bytes = sum(int(a.size) * a.dtype.itemsize for a in const_inputs)
    act_bytes = 24 * TB * max(2 * d, out_cols) * 4
    vmem_limit = int(min(60 * 2 ** 20,
                         max(32 * 2 ** 20, 2 * const_bytes + act_bytes + (2 << 20))))

    kernel = _make_kernel(d, len(P_list), c_to_pidx, layer_dims, affine_offsets)
    out = pl.pallas_call(
        kernel,
        grid=(Bp // TB,),
        out_shape=jax.ShapeDtypeStruct((Bp, out_cols), jnp.float32),
        in_specs=in_specs,
        out_specs=pl.BlockSpec((TB, out_cols), lambda i: (i, 0)),
        compiler_params=pltpu.CompilerParams(
            dimension_semantics=("parallel",),
            vmem_limit_bytes=vmem_limit),
        cost_estimate=pl.CostEstimate(
            flops=int(flops),
            transcendentals=int(transcendentals),
            bytes_accessed=int(bytes_accessed)),
    )(*inputs)
    return out[:B, :dim_input]


# ---------------------------------------------------------------------------
# Pure-JAX reference (reshape-based GroupNorm, unfused weights)
# ---------------------------------------------------------------------------
def _group_norm_ref(v, g, b, G=NUM_GROUPS, eps=EPS):
    B, C = v.shape
    xg = v.reshape(B, G, C // G)
    m = xg.mean(-1, keepdims=True)
    var = ((xg - m) ** 2).mean(-1, keepdims=True)
    return ((xg - m) / jnp.sqrt(var + eps)).reshape(B, C) * g + b


def fnet_reference(theta, x, t, div_full, params, n_layers):
    d = div_full.shape[-1]
    Wi, bi = params["input"]
    Wc, bc = params["cond"]
    theta_emb = theta @ Wi + bi
    x_emb = x @ Wc + bc
    arg = t * div_full
    lane = jnp.arange(d)
    t_emb = jnp.where(lane < d // 2, jnp.sin(arg), jnp.cos(arg))
    W1, b1, g_e, be_e, W2, b2 = params["emb_map"]
    e = t_emb + x_emb
    emb = _silu(_group_norm_ref(e @ W1 + b1, g_e, be_e)) @ W2 + b2
    h = theta_emb
    for blk in params["blocks"]:
        orig = h
        y = _silu(_group_norm_ref(h, blk["g0"], blk["be0"]))
        y = y @ blk["Wc0"] + blk["bc0"]
        prm = emb @ blk["Wa"] + blk["ba"]
        y = _silu(_group_norm_ref(y + prm, blk["g1"], blk["be1"]))
        y = y @ blk["Wc1"] + blk["bc1"]
        y = y + orig @ blk["Wsk"] + blk["bsk"]
        h = y * SKIP_SCALE
    gf, bf, Wf = params["final"]
    return _silu(_group_norm_ref(h, gf, bf)) @ Wf


# ---------------------------------------------------------------------------
# Deterministic synthetic parameters matching the torch module's shapes
# ---------------------------------------------------------------------------
def init_params(key, dim_input, dim_cond, dim_embedding, n_layers):
    keys = iter(jax.random.split(key, 256))

    def lin(cin, cout, bias=True):
        bound = 1.0 / math.sqrt(cin)
        W = jax.random.uniform(next(keys), (cin, cout), jnp.float32, -bound, bound)
        if not bias:
            return (W,)
        b = jax.random.uniform(next(keys), (1, cout), jnp.float32, -bound, bound)
        return (W, b)

    def gn(c):
        g = 1.0 + 0.05 * jax.random.normal(next(keys), (1, c), jnp.float32)
        b = 0.05 * jax.random.normal(next(keys), (1, c), jnp.float32)
        return (g, b)

    d = dim_embedding
    params = {}
    params["input"] = lin(dim_input, d)
    params["cond"] = lin(dim_cond, d)
    W1, b1 = lin(d, 2 * d)
    g_e, be_e = gn(2 * d)
    W2, b2 = lin(2 * d, d)
    params["emb_map"] = (W1, b1, g_e, be_e, W2, b2)

    blocks = []
    for i in range(n_layers):
        cin, cout = d // 2 ** i, d // 2 ** (i + 1)
        g0, be0 = gn(cin)
        Wc0, bc0 = lin(cin, cout)
        Wa, ba = lin(d, cout)
        g1, be1 = gn(cout)
        Wc1, bc1 = lin(cout, cout)
        Wsk, bsk = lin(cin, cout)   # in != out for every layer, skip always present
        blocks.append(dict(g0=g0, be0=be0, Wc0=Wc0, bc0=bc0, Wa=Wa, ba=ba,
                           g1=g1, be1=be1, Wc1=Wc1, bc1=bc1, Wsk=Wsk, bsk=bsk))
    params["blocks"] = blocks

    dlast = d // 2 ** n_layers
    gf, bf = gn(dlast)
    (Wf,) = lin(dlast, dim_input, bias=False)
    params["final"] = (gf, bf, Wf)

    # PositionalEncodingVector div_term duplicated so sin/cos halves share lanes.
    idx = jnp.arange(0, d, 2, dtype=jnp.float32)
    div = 1.0 / (1000.0 ** (2.0 * idx / d))
    div_full = jnp.concatenate([div, div]).reshape(1, d)
    return params, div_full


if __name__ == "__main__":
    B = 12                              # forces a 2-step batch grid
    dim_input, dim_cond = 8, 6
    dim_embedding, n_layers = 128, 2    # channels: 128 -> 64 -> 32 (all %16==0)

    key = jax.random.PRNGKey(0)
    k_theta, k_x, k_t, k_p = jax.random.split(key, 4)
    theta = jax.random.normal(k_theta, (B, dim_input), jnp.float32)
    x = jax.random.normal(k_x, (B, dim_cond), jnp.float32)
    t = jax.random.uniform(k_t, (B, 1), jnp.float32) * 100.0

    params, div_full = init_params(k_p, dim_input, dim_cond,
                                   dim_embedding, n_layers)

    ref = fnet_reference(theta, x, t, div_full, params, n_layers)

    # f32 matmul path (matches the torch module's numerics).
    out = fnet_forward(theta, x, t, div_full, params, n_layers)
    out = jax.block_until_ready(out)
    assert out.shape == theta.shape
    max_err = float(jnp.max(jnp.abs(out - ref)))
    assert max_err < 1e-3, f"f32 mismatch vs JAX reference: {max_err}"

    # bf16 matmul-operand path (v6e/v7x MXU-native); GroupNorm stats stay f32.
    out_bf = fnet_forward(theta, x, t, div_full, params, n_layers,
                          matmul_dtype=jnp.bfloat16)
    out_bf = jax.block_until_ready(out_bf)
    assert bool(jnp.all(jnp.isfinite(out_bf))), "bf16 path produced non-finite values"
    max_err_bf = float(jnp.max(jnp.abs(out_bf - ref)))
    assert max_err_bf < 1e-1, f"bf16 mismatch vs JAX reference: {max_err_bf}"

    print("KERNEL_OK")
</pallas_src>

<mosaic_0001>
module attributes {stable_mosaic.version = 11 : i64} {
  func.func @kernel(%arg0: i32, %arg1: memref<8x8xf32, #tpu.memory_space<vmem>>, %arg2: memref<8x6xf32, #tpu.memory_space<vmem>>, %arg3: memref<8x1xf32, #tpu.memory_space<vmem>>, %arg4: memref<1x128xf32, #tpu.memory_space<vmem>>, %arg5: memref<1x128xf32, #tpu.memory_space<vmem>>, %arg6: memref<32x32xf32, #tpu.memory_space<vmem>>, %arg7: memref<64x64xf32, #tpu.memory_space<vmem>>, %arg8: memref<128x128xf32, #tpu.memory_space<vmem>>, %arg9: memref<256x256xf32, #tpu.memory_space<vmem>>, %arg10: memref<8x128xf32, #tpu.memory_space<vmem>>, %arg11: memref<1x128xf32, #tpu.memory_space<vmem>>, %arg12: memref<6x128xf32, #tpu.memory_space<vmem>>, %arg13: memref<1x128xf32, #tpu.memory_space<vmem>>, %arg14: memref<128x256xf32, #tpu.memory_space<vmem>>, %arg15: memref<1x256xf32, #tpu.memory_space<vmem>>, %arg16: memref<1x256xf32, #tpu.memory_space<vmem>>, %arg17: memref<1x256xf32, #tpu.memory_space<vmem>>, %arg18: memref<256x128xf32, #tpu.memory_space<vmem>>, %arg19: memref<1x128xf32, #tpu.memory_space<vmem>>, %arg20: memref<128x256xf32, #tpu.memory_space<vmem>>, %arg21: memref<1x256xf32, #tpu.memory_space<vmem>>, %arg22: memref<1x128xf32, #tpu.memory_space<vmem>>, %arg23: memref<1x128xf32, #tpu.memory_space<vmem>>, %arg24: memref<128x64xf32, #tpu.memory_space<vmem>>, %arg25: memref<1x64xf32, #tpu.memory_space<vmem>>, %arg26: memref<1x64xf32, #tpu.memory_space<vmem>>, %arg27: memref<1x64xf32, #tpu.memory_space<vmem>>, %arg28: memref<64x64xf32, #tpu.memory_space<vmem>>, %arg29: memref<128x64xf32, #tpu.memory_space<vmem>>, %arg30: memref<1x64xf32, #tpu.memory_space<vmem>>, %arg31: memref<1x64xf32, #tpu.memory_space<vmem>>, %arg32: memref<1x64xf32, #tpu.memory_space<vmem>>, %arg33: memref<64x32xf32, #tpu.memory_space<vmem>>, %arg34: memref<1x32xf32, #tpu.memory_space<vmem>>, %arg35: memref<1x32xf32, #tpu.memory_space<vmem>>, %arg36: memref<1x32xf32, #tpu.memory_space<vmem>>, %arg37: memref<32x32xf32, #tpu.memory_space<vmem>>, %arg38: memref<64x32xf32, #tpu.memory_space<vmem>>, %arg39: memref<1x32xf32, #tpu.memory_space<vmem>>, %arg40: memref<1x32xf32, #tpu.memory_space<vmem>>, %arg41: memref<1x32xf32, #tpu.memory_space<vmem>>, %arg42: memref<32x128xf32, #tpu.memory_space<vmem>>, %arg43: memref<8x128xf32, #tpu.memory_space<vmem>>) attributes {dimension_semantics = [#tpu.dimension_semantics<parallel>], iteration_bounds = array<i64: 2>, scalar_prefetch = 0 : i64, scratch_operands = 0 : i64, tpu.core_type = #tpu.core_type<tc>, window_params = [{transform_indices = @transform_0, window_bounds = array<i64: 8, 8>}, {transform_indices = @transform_1, window_bounds = array<i64: 8, 6>}, {transform_indices = @transform_2, window_bounds = array<i64: 8, 1>}, {pipeline_mode = #tpu.pipeline_mode<synchronous>, transform_indices = @transform_3, window_bounds = array<i64: 1, 128>}, {pipeline_mode = #tpu.pipeline_mode<synchronous>, transform_indices = @transform_4, window_bounds = array<i64: 1, 128>}, {pipeline_mode = #tpu.pipeline_mode<synchronous>, transform_indices = @transform_5, window_bounds = array<i64: 32, 32>}, {pipeline_mode = #tpu.pipeline_mode<synchronous>, transform_indices = @transform_6, window_bounds = array<i64: 64, 64>}, {pipeline_mode = #tpu.pipeline_mode<synchronous>, transform_indices = @transform_7, window_bounds = array<i64: 128, 128>}, {pipeline_mode = #tpu.pipeline_mode<synchronous>, transform_indices = @transform_8, window_bounds = array<i64: 256, 256>}, {pipeline_mode = #tpu.pipeline_mode<synchronous>, transform_indices = @transform_9, window_bounds = array<i64: 8, 128>}, {pipeline_mode = #tpu.pipeline_mode<synchronous>, transform_indices = @transform_10, window_bounds = array<i64: 1, 128>}, {pipeline_mode = #tpu.pipeline_mode<synchronous>, transform_indices = @transform_11, window_bounds = array<i64: 6, 128>}, {pipeline_mode = #tpu.pipeline_mode<synchronous>, transform_indices = @transform_12, window_bounds = array<i64: 1, 128>}, {pipeline_mode = #tpu.pipeline_mode<synchronous>, transform_indices = @transform_13, window_bounds = array<i64: 128, 256>}, {pipeline_mode = #tpu.pipeline_mode<synchronous>, transform_indices = @transform_14, window_bounds = array<i64: 1, 256>}, {pipeline_mode = #tpu.pipeline_mode<synchronous>, transform_indices = @transform_15, window_bounds = array<i64: 1, 256>}, {pipeline_mode = #tpu.pipeline_mode<synchronous>, transform_indices = @transform_16, window_bounds = array<i64: 1, 256>}, {pipeline_mode = #tpu.pipeline_mode<synchronous>, transform_indices = @transform_17, window_bounds = array<i64: 256, 128>}, {pipeline_mode = #tpu.pipeline_mode<synchronous>, transform_indices = @transform_18, window_bounds = array<i64: 1, 128>}, {pipeline_mode = #tpu.pipeline_mode<synchronous>, transform_indices = @transform_19, window_bounds = array<i64: 128, 256>}, {pipeline_mode = #tpu.pipeline_mode<synchronous>, transform_indices = @transform_20, window_bounds = array<i64: 1, 256>}, {pipeline_mode = #tpu.pipeline_mode<synchronous>, transform_indices = @transform_21, window_bounds = array<i64: 1, 128>}, {pipeline_mode = #tpu.pipeline_mode<synchronous>, transform_indices = @transform_22, window_bounds = array<i64: 1, 128>}, {pipeline_mode = #tpu.pipeline_mode<synchronous>, transform_indices = @transform_23, window_bounds = array<i64: 128, 64>}, {pipeline_mode = #tpu.pipeline_mode<synchronous>, transform_indices = @transform_24, window_bounds = array<i64: 1, 64>}, {pipeline_mode = #tpu.pipeline_mode<synchronous>, transform_indices = @transform_25, window_bounds = array<i64: 1, 64>}, {pipeline_mode = #tpu.pipeline_mode<synchronous>, transform_indices = @transform_26, window_bounds = array<i64: 1, 64>}, {pipeline_mode = #tpu.pipeline_mode<synchronous>, transform_indices = @transform_27, window_bounds = array<i64: 64, 64>}, {pipeline_mode = #tpu.pipeline_mode<synchronous>, transform_indices = @transform_28, window_bounds = array<i64: 128, 64>}, {pipeline_mode = #tpu.pipeline_mode<synchronous>, transform_indices = @transform_29, window_bounds = array<i64: 1, 64>}, {pipeline_mode = #tpu.pipeline_mode<synchronous>, transform_indices = @transform_30, window_bounds = array<i64: 1, 64>}, {pipeline_mode = #tpu.pipeline_mode<synchronous>, transform_indices = @transform_31, window_bounds = array<i64: 1, 64>}, {pipeline_mode = #tpu.pipeline_mode<synchronous>, transform_indices = @transform_32, window_bounds = array<i64: 64, 32>}, {pipeline_mode = #tpu.pipeline_mode<synchronous>, transform_indices = @transform_33, window_bounds = array<i64: 1, 32>}, {pipeline_mode = #tpu.pipeline_mode<synchronous>, transform_indices = @transform_34, window_bounds = array<i64: 1, 32>}, {pipeline_mode = #tpu.pipeline_mode<synchronous>, transform_indices = @transform_35, window_bounds = array<i64: 1, 32>}, {pipeline_mode = #tpu.pipeline_mode<synchronous>, transform_indices = @transform_36, window_bounds = array<i64: 32, 32>}, {pipeline_mode = #tpu.pipeline_mode<synchronous>, transform_indices = @transform_37, window_bounds = array<i64: 64, 32>}, {pipeline_mode = #tpu.pipeline_mode<synchronous>, transform_indices = @transform_38, window_bounds = array<i64: 1, 32>}, {pipeline_mode = #tpu.pipeline_mode<synchronous>, transform_indices = @transform_39, window_bounds = array<i64: 1, 32>}, {pipeline_mode = #tpu.pipeline_mode<synchronous>, transform_indices = @transform_40, window_bounds = array<i64: 1, 32>}, {pipeline_mode = #tpu.pipeline_mode<synchronous>, transform_indices = @transform_41, window_bounds = array<i64: 32, 128>}, {transform_indices = @transform_42, window_bounds = array<i64: 8, 128>}]} {
    %c0 = arith.constant 0 : index
    %c0_0 = arith.constant 0 : index
    %0 = vector.load %arg1[%c0, %c0_0] : memref<8x8xf32, #tpu.memory_space<vmem>>, vector<8x8xf32>
    %c0_1 = arith.constant 0 : index
    %c0_2 = arith.constant 0 : index
    %1 = vector.load %arg10[%c0_1, %c0_2] : memref<8x128xf32, #tpu.memory_space<vmem>>, vector<8x128xf32>
    %cst = arith.constant dense<0.000000e+00> : vector<8x128xf32>
    %2 = tpu.matmul %0, %1, %cst {dimension_numbers = #tpu.dot_dimension_numbers<[1], [0], [0], [1], [0, 0, 1, 1], [], []>} : vector<8x8xf32>, vector<8x128xf32>, vector<8x128xf32> -> vector<8x128xf32>
    %c0_3 = arith.constant 0 : index
    %c0_4 = arith.constant 0 : index
    %3 = vector.load %arg11[%c0_3, %c0_4] : memref<1x128xf32, #tpu.memory_space<vmem>>, vector<1x128xf32>
    %4 = vector.broadcast %3 : vector<1x128xf32> to vector<8x128xf32>
    %5 = arith.addf %2, %4 : vector<8x128xf32>
    %c0_5 = arith.constant 0 : index
    %c0_6 = arith.constant 0 : index
    %6 = vector.load %arg2[%c0_5, %c0_6] : memref<8x6xf32, #tpu.memory_space<vmem>>, vector<8x6xf32>
    %c0_7 = arith.constant 0 : index
    %c0_8 = arith.constant 0 : index
    %7 = vector.load %arg12[%c0_7, %c0_8] : memref<6x128xf32, #tpu.memory_space<vmem>>, vector<6x128xf32>
    %cst_9 = arith.constant dense<0.000000e+00> : vector<8x128xf32>
    %8 = tpu.matmul %6, %7, %cst_9 {dimension_numbers = #tpu.dot_dimension_numbers<[1], [0], [0], [1], [0, 0, 1, 1], [], []>} : vector<8x6xf32>, vector<6x128xf32>, vector<8x128xf32> -> vector<8x128xf32>
    %c0_10 = arith.constant 0 : index
    %c0_11 = arith.constant 0 : index
    %9 = vector.load %arg13[%c0_10, %c0_11] : memref<1x128xf32, #tpu.memory_space<vmem>>, vector<1x128xf32>
    %10 = vector.broadcast %9 : vector<1x128xf32> to vector<8x128xf32>
    %11 = arith.addf %8, %10 : vector<8x128xf32>
    %c0_12 = arith.constant 0 : index
    %c0_13 = arith.constant 0 : index
    %12 = vector.load %arg3[%c0_12, %c0_13] : memref<8x1xf32, #tpu.memory_space<vmem>>, vector<8x1xf32>
    %c0_14 = arith.constant 0 : index
    %c0_15 = arith.constant 0 : index
    %13 = vector.load %arg4[%c0_14, %c0_15] : memref<1x128xf32, #tpu.memory_space<vmem>>, vector<1x128xf32>
    %14 = vector.broadcast %12 : vector<8x1xf32> to vector<8x128xf32>
    %15 = vector.broadcast %13 : vector<1x128xf32> to vector<8x128xf32>
    %16 = arith.mulf %14, %15 : vector<8x128xf32>
    %c0_16 = arith.constant 0 : index
    %c0_17 = arith.constant 0 : index
    %17 = vector.load %arg5[%c0_16, %c0_17] : memref<1x128xf32, #tpu.memory_space<vmem>>, vector<1x128xf32>
    %18 = vector.broadcast %17 : vector<1x128xf32> to vector<8x128xf32>
    %19 = arith.addf %16, %18 : vector<8x128xf32>
    %20 = math.sin %19 : vector<8x128xf32>
    %21 = arith.addf %20, %11 : vector<8x128xf32>
    %c0_18 = arith.constant 0 : index
    %c0_19 = arith.constant 0 : index
    %22 = vector.load %arg14[%c0_18, %c0_19] : memref<128x256xf32, #tpu.memory_space<vmem>>, vector<128x256xf32>
    %cst_20 = arith.constant dense<0.000000e+00> : vector<8x256xf32>
    %23 = tpu.matmul %21, %22, %cst_20 {dimension_numbers = #tpu.dot_dimension_numbers<[1], [0], [0], [1], [0, 0, 1, 1], [], []>} : vector<8x128xf32>, vector<128x256xf32>, vector<8x256xf32> -> vector<8x256xf32>
    %c0_21 = arith.constant 0 : index
    %c0_22 = arith.constant 0 : index
    %24 = vector.load %arg15[%c0_21, %c0_22] : memref<1x256xf32, #tpu.memory_space<vmem>>, vector<1x256xf32>
    %25 = vector.broadcast %24 : vector<1x256xf32> to vector<8x256xf32>
    %26 = arith.addf %23, %25 : vector<8x256xf32>
    %c0_23 = arith.constant 0 : index
    %c0_24 = arith.constant 0 : index
    %27 = vector.load %arg9[%c0_23, %c0_24] : memref<256x256xf32, #tpu.memory_space<vmem>>, vector<256x256xf32>
    %cst_25 = arith.constant dense<0.000000e+00> : vector<8x256xf32>
    %28 = tpu.matmul %26, %27, %cst_25 {dimension_numbers = #tpu.dot_dimension_numbers<[1], [0], [0], [1], [0, 0, 1, 1], [], []>} : vector<8x256xf32>, vector<256x256xf32>, vector<8x256xf32> -> vector<8x256xf32>
    %29 = arith.mulf %26, %26 : vector<8x256xf32>
    %cst_26 = arith.constant dense<0.000000e+00> : vector<8x256xf32>
    %30 = tpu.matmul %29, %27, %cst_26 {dimension_numbers = #tpu.dot_dimension_numbers<[1], [0], [0], [1], [0, 0, 1, 1], [], []>} : vector<8x256xf32>, vector<256x256xf32>, vector<8x256xf32> -> vector<8x256xf32>
    %31 = arith.mulf %28, %28 : vector<8x256xf32>
    %32 = arith.subf %30, %31 : vector<8x256xf32>
    %cst_27 = arith.constant 0.000000e+00 : f32
    %33 = vector.broadcast %cst_27 : f32 to vector<8x256xf32>
    %34 = arith.maximumf %32, %33 : vector<8x256xf32>
    %35 = arith.subf %26, %28 : vector<8x256xf32>
    %cst_28 = arith.constant 9.99999974E-6 : f32
    %36 = vector.broadcast %cst_28 : f32 to vector<8x256xf32>
    %37 = arith.addf %34, %36 : vector<8x256xf32>
    %38 = math.rsqrt %37 : vector<8x256xf32>
    %39 = arith.mulf %35, %38 : vector<8x256xf32>
    %c0_29 = arith.constant 0 : index
    %c0_30 = arith.constant 0 : index
    %40 = vector.load %arg16[%c0_29, %c0_30] : memref<1x256xf32, #tpu.memory_space<vmem>>, vector<1x256xf32>
    %41 = vector.broadcast %40 : vector<1x256xf32> to vector<8x256xf32>
    %42 = arith.mulf %39, %41 : vector<8x256xf32>
    %c0_31 = arith.constant 0 : index
    %c0_32 = arith.constant 0 : index
    %43 = vector.load %arg17[%c0_31, %c0_32] : memref<1x256xf32, #tpu.memory_space<vmem>>, vector<1x256xf32>
    %44 = vector.broadcast %43 : vector<1x256xf32> to vector<8x256xf32>
    %45 = arith.addf %42, %44 : vector<8x256xf32>
    %46 = arith.negf %45 : vector<8x256xf32>
    %47 = math.exp %46 : vector<8x256xf32>
    %cst_33 = arith.constant 1.000000e+00 : f32
    %48 = vector.broadcast %cst_33 : f32 to vector<8x256xf32>
    %49 = arith.addf %48, %47 : vector<8x256xf32>
    %50 = arith.divf %48, %49 : vector<8x256xf32>
    %51 = arith.mulf %45, %50 : vector<8x256xf32>
    %c0_34 = arith.constant 0 : index
    %c0_35 = arith.constant 0 : index
    %52 = vector.load %arg18[%c0_34, %c0_35] : memref<256x128xf32, #tpu.memory_space<vmem>>, vector<256x128xf32>
    %cst_36 = arith.constant dense<0.000000e+00> : vector<8x128xf32>
    %53 = tpu.matmul %51, %52, %cst_36 {dimension_numbers = #tpu.dot_dimension_numbers<[1], [0], [0], [1], [0, 0, 1, 1], [], []>} : vector<8x256xf32>, vector<256x128xf32>, vector<8x128xf32> -> vector<8x128xf32>
    %c0_37 = arith.constant 0 : index
    %c0_38 = arith.constant 0 : index
    %54 = vector.load %arg19[%c0_37, %c0_38] : memref<1x128xf32, #tpu.memory_space<vmem>>, vector<1x128xf32>
    %55 = vector.broadcast %54 : vector<1x128xf32> to vector<8x128xf32>
    %56 = arith.addf %53, %55 : vector<8x128xf32>
    %c0_39 = arith.constant 0 : index
    %c0_40 = arith.constant 0 : index
    %57 = vector.load %arg20[%c0_39, %c0_40] : memref<128x256xf32, #tpu.memory_space<vmem>>, vector<128x256xf32>
    %cst_41 = arith.constant dense<0.000000e+00> : vector<8x256xf32>
    %58 = tpu.matmul %56, %57, %cst_41 {dimension_numbers = #tpu.dot_dimension_numbers<[1], [0], [0], [1], [0, 0, 1, 1], [], []>} : vector<8x128xf32>, vector<128x256xf32>, vector<8x256xf32> -> vector<8x256xf32>
    %c0_42 = arith.constant 0 : index
    %c0_43 = arith.constant 0 : index
    %59 = vector.load %arg21[%c0_42, %c0_43] : memref<1x256xf32, #tpu.memory_space<vmem>>, vector<1x256xf32>
    %60 = vector.broadcast %59 : vector<1x256xf32> to vector<8x256xf32>
    %61 = arith.addf %58, %60 : vector<8x256xf32>
    %c0_44 = arith.constant 0 : index
    %c0_45 = arith.constant 0 : index
    %62 = vector.load %arg8[%c0_44, %c0_45] : memref<128x128xf32, #tpu.memory_space<vmem>>, vector<128x128xf32>
    %cst_46 = arith.constant dense<0.000000e+00> : vector<8x128xf32>
    %63 = tpu.matmul %5, %62, %cst_46 {dimension_numbers = #tpu.dot_dimension_numbers<[1], [0], [0], [1], [0, 0, 1, 1], [], []>} : vector<8x128xf32>, vector<128x128xf32>, vector<8x128xf32> -> vector<8x128xf32>
    %64 = arith.mulf %5, %5 : vector<8x128xf32>
    %cst_47 = arith.constant dense<0.000000e+00> : vector<8x128xf32>
    %65 = tpu.matmul %64, %62, %cst_47 {dimension_numbers = #tpu.dot_dimension_numbers<[1], [0], [0], [1], [0, 0, 1, 1], [], []>} : vector<8x128xf32>, vector<128x128xf32>, vector<8x128xf32> -> vector<8x128xf32>
    %66 = arith.mulf %63, %63 : vector<8x128xf32>
    %67 = arith.subf %65, %66 : vector<8x128xf32>
    %cst_48 = arith.constant 0.000000e+00 : f32
    %68 = vector.broadcast %cst_48 : f32 to vector<8x128xf32>
    %69 = arith.maximumf %67, %68 : vector<8x128xf32>
    %70 = arith.subf %5, %63 : vector<8x128xf32>
    %cst_49 = arith.constant 9.99999974E-6 : f32
    %71 = vector.broadcast %cst_49 : f32 to vector<8x128xf32>
    %72 = arith.addf %69, %71 : vector<8x128xf32>
    %73 = math.rsqrt %72 : vector<8x128xf32>
    %74 = arith.mulf %70, %73 : vector<8x128xf32>
    %c0_50 = arith.constant 0 : index
    %c0_51 = arith.constant 0 : index
    %75 = vector.load %arg22[%c0_50, %c0_51] : memref<1x128xf32, #tpu.memory_space<vmem>>, vector<1x128xf32>
    %76 = vector.broadcast %75 : vector<1x128xf32> to vector<8x128xf32>
    %77 = arith.mulf %74, %76 : vector<8x128xf32>
    %c0_52 = arith.constant 0 : index
    %c0_53 = arith.constant 0 : index
    %78 = vector.load %arg23[%c0_52, %c0_53] : memref<1x128xf32, #tpu.memory_space<vmem>>, vector<1x128xf32>
    %79 = vector.broadcast %78 : vector<1x128xf32> to vector<8x128xf32>
    %80 = arith.addf %77, %79 : vector<8x128xf32>
    %81 = arith.negf %80 : vector<8x128xf32>
    %82 = math.exp %81 : vector<8x128xf32>
    %cst_54 = arith.constant 1.000000e+00 : f32
    %83 = vector.broadcast %cst_54 : f32 to vector<8x128xf32>
    %84 = arith.addf %83, %82 : vector<8x128xf32>
    %85 = arith.divf %83, %84 : vector<8x128xf32>
    %86 = arith.mulf %80, %85 : vector<8x128xf32>
    %c0_55 = arith.constant 0 : index
    %c0_56 = arith.constant 0 : index
    %87 = vector.load %arg24[%c0_55, %c0_56] : memref<128x64xf32, #tpu.memory_space<vmem>>, vector<128x64xf32>
    %cst_57 = arith.constant dense<0.000000e+00> : vector<8x64xf32>
    %88 = tpu.matmul %86, %87, %cst_57 {dimension_numbers = #tpu.dot_dimension_numbers<[1], [0], [0], [1], [0, 0, 1, 1], [], []>} : vector<8x128xf32>, vector<128x64xf32>, vector<8x64xf32> -> vector<8x64xf32>
    %c0_58 = arith.constant 0 : index
    %c0_59 = arith.constant 0 : index
    %89 = vector.load %arg25[%c0_58, %c0_59] : memref<1x64xf32, #tpu.memory_space<vmem>>, vector<1x64xf32>
    %90 = vector.broadcast %89 : vector<1x64xf32> to vector<8x64xf32>
    %91 = arith.addf %88, %90 : vector<8x64xf32>
    %92 = vector.extract_strided_slice %61 {offsets = [0, 0], sizes = [8, 64], strides = [1, 1]} : vector<8x256xf32> to vector<8x64xf32>
    %93 = arith.addf %91, %92 : vector<8x64xf32>
    %c0_60 = arith.constant 0 : index
    %c0_61 = arith.constant 0 : index
    %94 = vector.load %arg7[%c0_60, %c0_61] : memref<64x64xf32, #tpu.memory_space<vmem>>, vector<64x64xf32>
    %cst_62 = arith.constant dense<0.000000e+00> : vector<8x64xf32>
    %95 = tpu.matmul %93, %94, %cst_62 {dimension_numbers = #tpu.dot_dimension_numbers<[1], [0], [0], [1], [0, 0, 1, 1], [], []>} : vector<8x64xf32>, vector<64x64xf32>, vector<8x64xf32> -> vector<8x64xf32>
    %96 = arith.mulf %93, %93 : vector<8x64xf32>
    %cst_63 = arith.constant dense<0.000000e+00> : vector<8x64xf32>
    %97 = tpu.matmul %96, %94, %cst_63 {dimension_numbers = #tpu.dot_dimension_numbers<[1], [0], [0], [1], [0, 0, 1, 1], [], []>} : vector<8x64xf32>, vector<64x64xf32>, vector<8x64xf32> -> vector<8x64xf32>
    %98 = arith.mulf %95, %95 : vector<8x64xf32>
    %99 = arith.subf %97, %98 : vector<8x64xf32>
    %cst_64 = arith.constant 0.000000e+00 : f32
    %100 = vector.broadcast %cst_64 : f32 to vector<8x64xf32>
    %101 = arith.maximumf %99, %100 : vector<8x64xf32>
    %102 = arith.subf %93, %95 : vector<8x64xf32>
    %cst_65 = arith.constant 9.99999974E-6 : f32
    %103 = vector.broadcast %cst_65 : f32 to vector<8x64xf32>
    %104 = arith.addf %101, %103 : vector<8x64xf32>
    %105 = math.rsqrt %104 : vector<8x64xf32>
    %106 = arith.mulf %102, %105 : vector<8x64xf32>
    %c0_66 = arith.constant 0 : index
    %c0_67 = arith.constant 0 : index
    %107 = vector.load %arg26[%c0_66, %c0_67] : memref<1x64xf32, #tpu.memory_space<vmem>>, vector<1x64xf32>
    %108 = vector.broadcast %107 : vector<1x64xf32> to vector<8x64xf32>
    %109 = arith.mulf %106, %108 : vector<8x64xf32>
    %c0_68 = arith.constant 0 : index
    %c0_69 = arith.constant 0 : index
    %110 = vector.load %arg27[%c0_68, %c0_69] : memref<1x64xf32, #tpu.memory_space<vmem>>, vector<1x64xf32>
    %111 = vector.broadcast %110 : vector<1x64xf32> to vector<8x64xf32>
    %112 = arith.addf %109, %111 : vector<8x64xf32>
    %113 = arith.negf %112 : vector<8x64xf32>
    %114 = math.exp %113 : vector<8x64xf32>
    %cst_70 = arith.constant 1.000000e+00 : f32
    %115 = vector.broadcast %cst_70 : f32 to vector<8x64xf32>
    %116 = arith.addf %115, %114 : vector<8x64xf32>
    %117 = arith.divf %115, %116 : vector<8x64xf32>
    %118 = arith.mulf %112, %117 : vector<8x64xf32>
    %c0_71 = arith.constant 0 : index
    %c0_72 = arith.constant 0 : index
    %119 = vector.load %arg28[%c0_71, %c0_72] : memref<64x64xf32, #tpu.memory_space<vmem>>, vector<64x64xf32>
    %cst_73 = arith.constant dense<0.000000e+00> : vector<8x64xf32>
    %120 = tpu.matmul %118, %119, %cst_73 {dimension_numbers = #tpu.dot_dimension_numbers<[1], [0], [0], [1], [0, 0, 1, 1], [], []>} : vector<8x64xf32>, vector<64x64xf32>, vector<8x64xf32> -> vector<8x64xf32>
    %c0_74 = arith.constant 0 : index
    %c0_75 = arith.constant 0 : index
    %121 = vector.load %arg29[%c0_74, %c0_75] : memref<128x64xf32, #tpu.memory_space<vmem>>, vector<128x64xf32>
    %cst_76 = arith.constant dense<0.000000e+00> : vector<8x64xf32>
    %122 = tpu.matmul %5, %121, %cst_76 {dimension_numbers = #tpu.dot_dimension_numbers<[1], [0], [0], [1], [0, 0, 1, 1], [], []>} : vector<8x128xf32>, vector<128x64xf32>, vector<8x64xf32> -> vector<8x64xf32>
    %123 = arith.addf %120, %122 : vector<8x64xf32>
    %c0_77 = arith.constant 0 : index
    %c0_78 = arith.constant 0 : index
    %124 = vector.load %arg30[%c0_77, %c0_78] : memref<1x64xf32, #tpu.memory_space<vmem>>, vector<1x64xf32>
    %125 = vector.broadcast %124 : vector<1x64xf32> to vector<8x64xf32>
    %126 = arith.addf %123, %125 : vector<8x64xf32>
    %c0_79 = arith.constant 0 : index
    %c0_80 = arith.constant 0 : index
    %127 = vector.load %arg7[%c0_79, %c0_80] : memref<64x64xf32, #tpu.memory_space<vmem>>, vector<64x64xf32>
    %cst_81 = arith.constant dense<0.000000e+00> : vector<8x64xf32>
    %128 = tpu.matmul %126, %127, %cst_81 {dimension_numbers = #tpu.dot_dimension_numbers<[1], [0], [0], [1], [0, 0, 1, 1], [], []>} : vector<8x64xf32>, vector<64x64xf32>, vector<8x64xf32> -> vector<8x64xf32>
    %129 = arith.mulf %126, %126 : vector<8x64xf32>
    %cst_82 = arith.constant dense<0.000000e+00> : vector<8x64xf32>
    %130 = tpu.matmul %129, %127, %cst_82 {dimension_numbers = #tpu.dot_dimension_numbers<[1], [0], [0], [1], [0, 0, 1, 1], [], []>} : vector<8x64xf32>, vector<64x64xf32>, vector<8x64xf32> -> vector<8x64xf32>
    %131 = arith.mulf %128, %128 : vector<8x64xf32>
    %132 = arith.subf %130, %131 : vector<8x64xf32>
    %cst_83 = arith.constant 0.000000e+00 : f32
    %133 = vector.broadcast %cst_83 : f32 to vector<8x64xf32>
    %134 = arith.maximumf %132, %133 : vector<8x64xf32>
    %135 = arith.subf %126, %128 : vector<8x64xf32>
    %cst_84 = arith.constant 9.99999974E-6 : f32
    %136 = vector.broadcast %cst_84 : f32 to vector<8x64xf32>
    %137 = arith.addf %134, %136 : vector<8x64xf32>
    %138 = math.rsqrt %137 : vector<8x64xf32>
    %139 = arith.mulf %135, %138 : vector<8x64xf32>
    %c0_85 = arith.constant 0 : index
    %c0_86 = arith.constant 0 : index
    %140 = vector.load %arg31[%c0_85, %c0_86] : memref<1x64xf32, #tpu.memory_space<vmem>>, vector<1x64xf32>
    %141 = vector.broadcast %140 : vector<1x64xf32> to vector<8x64xf32>
    %142 = arith.mulf %139, %141 : vector<8x64xf32>
    %c0_87 = arith.constant 0 : index
    %c0_88 = arith.constant 0 : index
    %143 = vector.load %arg32[%c0_87, %c0_88] : memref<1x64xf32, #tpu.memory_space<vmem>>, vector<1x64xf32>
    %144 = vector.broadcast %143 : vector<1x64xf32> to vector<8x64xf32>
    %145 = arith.addf %142, %144 : vector<8x64xf32>
    %146 = arith.negf %145 : vector<8x64xf32>
    %147 = math.exp %146 : vector<8x64xf32>
    %cst_89 = arith.constant 1.000000e+00 : f32
    %148 = vector.broadcast %cst_89 : f32 to vector<8x64xf32>
    %149 = arith.addf %148, %147 : vector<8x64xf32>
    %150 = arith.divf %148, %149 : vector<8x64xf32>
    %151 = arith.mulf %145, %150 : vector<8x64xf32>
    %c0_90 = arith.constant 0 : index
    %c0_91 = arith.constant 0 : index
    %152 = vector.load %arg33[%c0_90, %c0_91] : memref<64x32xf32, #tpu.memory_space<vmem>>, vector<64x32xf32>
    %cst_92 = arith.constant dense<0.000000e+00> : vector<8x32xf32>
    %153 = tpu.matmul %151, %152, %cst_92 {dimension_numbers = #tpu.dot_dimension_numbers<[1], [0], [0], [1], [0, 0, 1, 1], [], []>} : vector<8x64xf32>, vector<64x32xf32>, vector<8x32xf32> -> vector<8x32xf32>
    %c0_93 = arith.constant 0 : index
    %c0_94 = arith.constant 0 : index
    %154 = vector.load %arg34[%c0_93, %c0_94] : memref<1x32xf32, #tpu.memory_space<vmem>>, vector<1x32xf32>
    %155 = vector.broadcast %154 : vector<1x32xf32> to vector<8x32xf32>
    %156 = arith.addf %153, %155 : vector<8x32xf32>
    %157 = vector.extract_strided_slice %61 {offsets = [0, 128], sizes = [8, 32], strides = [1, 1]} : vector<8x256xf32> to vector<8x32xf32>
    %158 = arith.addf %156, %157 : vector<8x32xf32>
    %c0_95 = arith.constant 0 : index
    %c0_96 = arith.constant 0 : index
    %159 = vector.load %arg6[%c0_95, %c0_96] : memref<32x32xf32, #tpu.memory_space<vmem>>, vector<32x32xf32>
    %cst_97 = arith.constant dense<0.000000e+00> : vector<8x32xf32>
    %160 = tpu.matmul %158, %159, %cst_97 {dimension_numbers = #tpu.dot_dimension_numbers<[1], [0], [0], [1], [0, 0, 1, 1], [], []>} : vector<8x32xf32>, vector<32x32xf32>, vector<8x32xf32> -> vector<8x32xf32>
    %161 = arith.mulf %158, %158 : vector<8x32xf32>
    %cst_98 = arith.constant dense<0.000000e+00> : vector<8x32xf32>
    %162 = tpu.matmul %161, %159, %cst_98 {dimension_numbers = #tpu.dot_dimension_numbers<[1], [0], [0], [1], [0, 0, 1, 1], [], []>} : vector<8x32xf32>, vector<32x32xf32>, vector<8x32xf32> -> vector<8x32xf32>
    %163 = arith.mulf %160, %160 : vector<8x32xf32>
    %164 = arith.subf %162, %163 : vector<8x32xf32>
    %cst_99 = arith.constant 0.000000e+00 : f32
    %165 = vector.broadcast %cst_99 : f32 to vector<8x32xf32>
    %166 = arith.maximumf %164, %165 : vector<8x32xf32>
    %167 = arith.subf %158, %160 : vector<8x32xf32>
    %cst_100 = arith.constant 9.99999974E-6 : f32
    %168 = vector.broadcast %cst_100 : f32 to vector<8x32xf32>
    %169 = arith.addf %166, %168 : vector<8x32xf32>
    %170 = math.rsqrt %169 : vector<8x32xf32>
    %171 = arith.mulf %167, %170 : vector<8x32xf32>
    %c0_101 = arith.constant 0 : index
    %c0_102 = arith.constant 0 : index
    %172 = vector.load %arg35[%c0_101, %c0_102] : memref<1x32xf32, #tpu.memory_space<vmem>>, vector<1x32xf32>
    %173 = vector.broadcast %172 : vector<1x32xf32> to vector<8x32xf32>
    %174 = arith.mulf %171, %173 : vector<8x32xf32>
    %c0_103 = arith.constant 0 : index
    %c0_104 = arith.constant 0 : index
    %175 = vector.load %arg36[%c0_103, %c0_104] : memref<1x32xf32, #tpu.memory_space<vmem>>, vector<1x32xf32>
    %176 = vector.broadcast %175 : vector<1x32xf32> to vector<8x32xf32>
    %177 = arith.addf %174, %176 : vector<8x32xf32>
    %178 = arith.negf %177 : vector<8x32xf32>
    %179 = math.exp %178 : vector<8x32xf32>
    %cst_105 = arith.constant 1.000000e+00 : f32
    %180 = vector.broadcast %cst_105 : f32 to vector<8x32xf32>
    %181 = arith.addf %180, %179 : vector<8x32xf32>
    %182 = arith.divf %180, %181 : vector<8x32xf32>
    %183 = arith.mulf %177, %182 : vector<8x32xf32>
    %c0_106 = arith.constant 0 : index
    %c0_107 = arith.constant 0 : index
    %184 = vector.load %arg37[%c0_106, %c0_107] : memref<32x32xf32, #tpu.memory_space<vmem>>, vector<32x32xf32>
    %cst_108 = arith.constant dense<0.000000e+00> : vector<8x32xf32>
    %185 = tpu.matmul %183, %184, %cst_108 {dimension_numbers = #tpu.dot_dimension_numbers<[1], [0], [0], [1], [0, 0, 1, 1], [], []>} : vector<8x32xf32>, vector<32x32xf32>, vector<8x32xf32> -> vector<8x32xf32>
    %c0_109 = arith.constant 0 : index
    %c0_110 = arith.constant 0 : index
    %186 = vector.load %arg38[%c0_109, %c0_110] : memref<64x32xf32, #tpu.memory_space<vmem>>, vector<64x32xf32>
    %cst_111 = arith.constant dense<0.000000e+00> : vector<8x32xf32>
    %187 = tpu.matmul %126, %186, %cst_111 {dimension_numbers = #tpu.dot_dimension_numbers<[1], [0], [0], [1], [0, 0, 1, 1], [], []>} : vector<8x64xf32>, vector<64x32xf32>, vector<8x32xf32> -> vector<8x32xf32>
    %188 = arith.addf %185, %187 : vector<8x32xf32>
    %c0_112 = arith.constant 0 : index
    %c0_113 = arith.constant 0 : index
    %189 = vector.load %arg39[%c0_112, %c0_113] : memref<1x32xf32, #tpu.memory_space<vmem>>, vector<1x32xf32>
    %190 = vector.broadcast %189 : vector<1x32xf32> to vector<8x32xf32>
    %191 = arith.addf %188, %190 : vector<8x32xf32>
    %c0_114 = arith.constant 0 : index
    %c0_115 = arith.constant 0 : index
    %192 = vector.load %arg6[%c0_114, %c0_115] : memref<32x32xf32, #tpu.memory_space<vmem>>, vector<32x32xf32>
    %cst_116 = arith.constant dense<0.000000e+00> : vector<8x32xf32>
    %193 = tpu.matmul %191, %192, %cst_116 {dimension_numbers = #tpu.dot_dimension_numbers<[1], [0], [0], [1], [0, 0, 1, 1], [], []>} : vector<8x32xf32>, vector<32x32xf32>, vector<8x32xf32> -> vector<8x32xf32>
    %194 = arith.mulf %191, %191 : vector<8x32xf32>
    %cst_117 = arith.constant dense<0.000000e+00> : vector<8x32xf32>
    %195 = tpu.matmul %194, %192, %cst_117 {dimension_numbers = #tpu.dot_dimension_numbers<[1], [0], [0], [1], [0, 0, 1, 1], [], []>} : vector<8x32xf32>, vector<32x32xf32>, vector<8x32xf32> -> vector<8x32xf32>
    %196 = arith.mulf %193, %193 : vector<8x32xf32>
    %197 = arith.subf %195, %196 : vector<8x32xf32>
    %cst_118 = arith.constant 0.000000e+00 : f32
    %198 = vector.broadcast %cst_118 : f32 to vector<8x32xf32>
    %199 = arith.maximumf %197, %198 : vector<8x32xf32>
    %200 = arith.subf %191, %193 : vector<8x32xf32>
    %cst_119 = arith.constant 9.99999974E-6 : f32
    %201 = vector.broadcast %cst_119 : f32 to vector<8x32xf32>
    %202 = arith.addf %199, %201 : vector<8x32xf32>
    %203 = math.rsqrt %202 : vector<8x32xf32>
    %204 = arith.mulf %200, %203 : vector<8x32xf32>
    %c0_120 = arith.constant 0 : index
    %c0_121 = arith.constant 0 : index
    %205 = vector.load %arg40[%c0_120, %c0_121] : memref<1x32xf32, #tpu.memory_space<vmem>>, vector<1x32xf32>
    %206 = vector.broadcast %205 : vector<1x32xf32> to vector<8x32xf32>
    %207 = arith.mulf %204, %206 : vector<8x32xf32>
    %c0_122 = arith.constant 0 : index
    %c0_123 = arith.constant 0 : index
    %208 = vector.load %arg41[%c0_122, %c0_123] : memref<1x32xf32, #tpu.memory_space<vmem>>, vector<1x32xf32>
    %209 = vector.broadcast %208 : vector<1x32xf32> to vector<8x32xf32>
    %210 = arith.addf %207, %209 : vector<8x32xf32>
    %211 = arith.negf %210 : vector<8x32xf32>
    %212 = math.exp %211 : vector<8x32xf32>
    %cst_124 = arith.constant 1.000000e+00 : f32
    %213 = vector.broadcast %cst_124 : f32 to vector<8x32xf32>
    %214 = arith.addf %213, %212 : vector<8x32xf32>
    %215 = arith.divf %213, %214 : vector<8x32xf32>
    %216 = arith.mulf %210, %215 : vector<8x32xf32>
    %c0_125 = arith.constant 0 : index
    %c0_126 = arith.constant 0 : index
    %217 = vector.load %arg42[%c0_125, %c0_126] : memref<32x128xf32, #tpu.memory_space<vmem>>, vector<32x128xf32>
    %cst_127 = arith.constant dense<0.000000e+00> : vector<8x128xf32>
    %218 = tpu.matmul %216, %217, %cst_127 {dimension_numbers = #tpu.dot_dimension_numbers<[1], [0], [0], [1], [0, 0, 1, 1], [], []>} : vector<8x32xf32>, vector<32x128xf32>, vector<8x128xf32> -> vector<8x128xf32>
    %c0_128 = arith.constant 0 : index
    %c0_129 = arith.constant 0 : index
    %219 = vector.load %arg43[%c0_128, %c0_129] : memref<8x128xf32, #tpu.memory_space<vmem>>, vector<8x128xf32>
    tpu.vector_store %arg43[%c0_128, %c0_129], %218 {strides = array<i32>} : memref<8x128xf32, #tpu.memory_space<vmem>>, vector<8x128xf32>,
    return
  }
  func.func @transform_0(%arg0: i32) -> (i32, i32) {
    %c0_i32 = arith.constant 0 : i32
    %c0_i32_0 = arith.constant 0 : i32
    return %arg0, %c0_i32 : i32, i32
  }
  func.func @transform_1(%arg0: i32) -> (i32, i32) {
    %c0_i32 = arith.constant 0 : i32
    %c0_i32_0 = arith.constant 0 : i32
    return %arg0, %c0_i32 : i32, i32
  }
  func.func @transform_2(%arg0: i32) -> (i32, i32) {
    %c0_i32 = arith.constant 0 : i32
    %c0_i32_0 = arith.constant 0 : i32
    return %arg0, %c0_i32 : i32, i32
  }
  func.func @transform_3(%arg0: i32) -> (i32, i32) {
    %c0_i32 = arith.constant 0 : i32
    %c0_i32_0 = arith.constant 0 : i32
    %c0_i32_1 = arith.constant 0 : i32
    return %c0_i32, %c0_i32_0 : i32, i32
  }
  func.func @transform_4(%arg0: i32) -> (i32, i32) {
    %c0_i32 = arith.constant 0 : i32
    %c0_i32_0 = arith.constant 0 : i32
    %c0_i32_1 = arith.constant 0 : i32
    return %c0_i32, %c0_i32_0 : i32, i32
  }
  func.func @transform_5(%arg0: i32) -> (i32, i32) {
    %c0_i32 = arith.constant 0 : i32
    %c0_i32_0 = arith.constant 0 : i32
    %c0_i32_1 = arith.constant 0 : i32
    return %c0_i32, %c0_i32_0 : i32, i32
  }
  func.func @transform_6(%arg0: i32) -> (i32, i32) {
    %c0_i32 = arith.constant 0 : i32
    %c0_i32_0 = arith.constant 0 : i32
    %c0_i32_1 = arith.constant 0 : i32
    return %c0_i32, %c0_i32_0 : i32, i32
  }
  func.func @transform_7(%arg0: i32) -> (i32, i32) {
    %c0_i32 = arith.constant 0 : i32
    %c0_i32_0 = arith.constant 0 : i32
    %c0_i32_1 = arith.constant 0 : i32
    return %c0_i32, %c0_i32_0 : i32, i32
  }
  func.func @transform_8(%arg0: i32) -> (i32, i32) {
    %c0_i32 = arith.constant 0 : i32
    %c0_i32_0 = arith.constant 0 : i32
    %c0_i32_1 = arith.constant 0 : i32
    return %c0_i32, %c0_i32_0 : i32, i32
  }
  func.func @transform_9(%arg0: i32) -> (i32, i32) {
    %c0_i32 = arith.constant 0 : i32
    %c0_i32_0 = arith.constant 0 : i32
    %c0_i32_1 = arith.constant 0 : i32
    return %c0_i32, %c0_i32_0 : i32, i32
  }
  func.func @transform_10(%arg0: i32) -> (i32, i32) {
    %c0_i32 = arith.constant 0 : i32
    %c0_i32_0 = arith.constant 0 : i32
    %c0_i32_1 = arith.constant 0 : i32
    return %c0_i32, %c0_i32_0 : i32, i32
  }
  func.func @transform_11(%arg0: i32) -> (i32, i32) {
    %c0_i32 = arith.constant 0 : i32
    %c0_i32_0 = arith.constant 0 : i32
    %c0_i32_1 = arith.constant 0 : i32
    return %c0_i32, %c0_i32_0 : i32, i32
  }
  func.func @transform_12(%arg0: i32) -> (i32, i32) {
    %c0_i32 = arith.constant 0 : i32
    %c0_i32_0 = arith.constant 0 : i32
    %c0_i32_1 = arith.constant 0 : i32
    return %c0_i32, %c0_i32_0 : i32, i32
  }
  func.func @transform_13(%arg0: i32) -> (i32, i32) {
    %c0_i32 = arith.constant 0 : i32
    %c0_i32_0 = arith.constant 0 : i32
    %c0_i32_1 = arith.constant 0 : i32
    return %c0_i32, %c0_i32_0 : i32, i32
  }
  func.func @transform_14(%arg0: i32) -> (i32, i32) {
    %c0_i32 = arith.constant 0 : i32
    %c0_i32_0 = arith.constant 0 : i32
    %c0_i32_1 = arith.constant 0 : i32
    return %c0_i32, %c0_i32_0 : i32, i32
  }
  func.func @transform_15(%arg0: i32) -> (i32, i32) {
    %c0_i32 = arith.constant 0 : i32
    %c0_i32_0 = arith.constant 0 : i32
    %c0_i32_1 = arith.constant 0 : i32
    return %c0_i32, %c0_i32_0 : i32, i32
  }
  func.func @transform_16(%arg0: i32) -> (i32, i32) {
    %c0_i32 = arith.constant 0 : i32
    %c0_i32_0 = arith.constant 0 : i32
    %c0_i32_1 = arith.constant 0 : i32
    return %c0_i32, %c0_i32_0 : i32, i32
  }
  func.func @transform_17(%arg0: i32) -> (i32, i32) {
    %c0_i32 = arith.constant 0 : i32
    %c0_i32_0 = arith.constant 0 : i32
    %c0_i32_1 = arith.constant 0 : i32
    return %c0_i32, %c0_i32_0 : i32, i32
  }
  func.func @transform_18(%arg0: i32) -> (i32, i32) {
    %c0_i32 = arith.constant 0 : i32
    %c0_i32_0 = arith.constant 0 : i32
    %c0_i32_1 = arith.constant 0 : i32
    return %c0_i32, %c0_i32_0 : i32, i32
  }
  func.func @transform_19(%arg0: i32) -> (i32, i32) {
    %c0_i32 = arith.constant 0 : i32
    %c0_i32_0 = arith.constant 0 : i32
    %c0_i32_1 = arith.constant 0 : i32
    return %c0_i32, %c0_i32_0 : i32, i32
  }
  func.func @transform_20(%arg0: i32) -> (i32, i32) {
    %c0_i32 = arith.constant 0 : i32
    %c0_i32_0 = arith.constant 0 : i32
    %c0_i32_1 = arith.constant 0 : i32
    return %c0_i32, %c0_i32_0 : i32, i32
  }
  func.func @transform_21(%arg0: i32) -> (i32, i32) {
    %c0_i32 = arith.constant 0 : i32
    %c0_i32_0 = arith.constant 0 : i32
    %c0_i32_1 = arith.constant 0 : i32
    return %c0_i32, %c0_i32_0 : i32, i32
  }
  func.func @transform_22(%arg0: i32) -> (i32, i32) {
    %c0_i32 = arith.constant 0 : i32
    %c0_i32_0 = arith.constant 0 : i32
    %c0_i32_1 = arith.constant 0 : i32
    return %c0_i32, %c0_i32_0 : i32, i32
  }
  func.func @transform_23(%arg0: i32) -> (i32, i32) {
    %c0_i32 = arith.constant 0 : i32
    %c0_i32_0 = arith.constant 0 : i32
    %c0_i32_1 = arith.constant 0 : i32
    return %c0_i32, %c0_i32_0 : i32, i32
  }
  func.func @transform_24(%arg0: i32) -> (i32, i32) {
    %c0_i32 = arith.constant 0 : i32
    %c0_i32_0 = arith.constant 0 : i32
    %c0_i32_1 = arith.constant 0 : i32
    return %c0_i32, %c0_i32_0 : i32, i32
  }
  func.func @transform_25(%arg0: i32) -> (i32, i32) {
    %c0_i32 = arith.constant 0 : i32
    %c0_i32_0 = arith.constant 0 : i32
    %c0_i32_1 = arith.constant 0 : i32
    return %c0_i32, %c0_i32_0 : i32, i32
  }
  func.func @transform_26(%arg0: i32) -> (i32, i32) {
    %c0_i32 = arith.constant 0 : i32
    %c0_i32_0 = arith.constant 0 : i32
    %c0_i32_1 = arith.constant 0 : i32
    return %c0_i32, %c0_i32_0 : i32, i32
  }
  func.func @transform_27(%arg0: i32) -> (i32, i32) {
    %c0_i32 = arith.constant 0 : i32
    %c0_i32_0 = arith.constant 0 : i32
    %c0_i32_1 = arith.constant 0 : i32
    return %c0_i32, %c0_i32_0 : i32, i32
  }
  func.func @transform_28(%arg0: i32) -> (i32, i32) {
    %c0_i32 = arith.constant 0 : i32
    %c0_i32_0 = arith.constant 0 : i32
    %c0_i32_1 = arith.constant 0 : i32
    return %c0_i32, %c0_i32_0 : i32, i32
  }
  func.func @transform_29(%arg0: i32) -> (i32, i32) {
    %c0_i32 = arith.constant 0 : i32
    %c0_i32_0 = arith.constant 0 : i32
    %c0_i32_1 = arith.constant 0 : i32
    return %c0_i32, %c0_i32_0 : i32, i32
  }
  func.func @transform_30(%arg0: i32) -> (i32, i32) {
    %c0_i32 = arith.constant 0 : i32
    %c0_i32_0 = arith.constant 0 : i32
    %c0_i32_1 = arith.constant 0 : i32
    return %c0_i32, %c0_i32_0 : i32, i32
  }
  func.func @transform_31(%arg0: i32) -> (i32, i32) {
    %c0_i32 = arith.constant 0 : i32
    %c0_i32_0 = arith.constant 0 : i32
    %c0_i32_1 = arith.constant 0 : i32
    return %c0_i32, %c0_i32_0 : i32, i32
  }
  func.func @transform_32(%arg0: i32) -> (i32, i32) {
    %c0_i32 = arith.constant 0 : i32
    %c0_i32_0 = arith.constant 0 : i32
    %c0_i32_1 = arith.constant 0 : i32
    return %c0_i32, %c0_i32_0 : i32, i32
  }
  func.func @transform_33(%arg0: i32) -> (i32, i32) {
    %c0_i32 = arith.constant 0 : i32
    %c0_i32_0 = arith.constant 0 : i32
    %c0_i32_1 = arith.constant 0 : i32
    return %c0_i32, %c0_i32_0 : i32, i32
  }
  func.func @transform_34(%arg0: i32) -> (i32, i32) {
    %c0_i32 = arith.constant 0 : i32
    %c0_i32_0 = arith.constant 0 : i32
    %c0_i32_1 = arith.constant 0 : i32
    return %c0_i32, %c0_i32_0 : i32, i32
  }
  func.func @transform_35(%arg0: i32) -> (i32, i32) {
    %c0_i32 = arith.constant 0 : i32
    %c0_i32_0 = arith.constant 0 : i32
    %c0_i32_1 = arith.constant 0 : i32
    return %c0_i32, %c0_i32_0 : i32, i32
  }
  func.func @transform_36(%arg0: i32) -> (i32, i32) {
    %c0_i32 = arith.constant 0 : i32
    %c0_i32_0 = arith.constant 0 : i32
    %c0_i32_1 = arith.constant 0 : i32
    return %c0_i32, %c0_i32_0 : i32, i32
  }
  func.func @transform_37(%arg0: i32) -> (i32, i32) {
    %c0_i32 = arith.constant 0 : i32
    %c0_i32_0 = arith.constant 0 : i32
    %c0_i32_1 = arith.constant 0 : i32
    return %c0_i32, %c0_i32_0 : i32, i32
  }
  func.func @transform_38(%arg0: i32) -> (i32, i32) {
    %c0_i32 = arith.constant 0 : i32
    %c0_i32_0 = arith.constant 0 : i32
    %c0_i32_1 = arith.constant 0 : i32
    return %c0_i32, %c0_i32_0 : i32, i32
  }
  func.func @transform_39(%arg0: i32) -> (i32, i32) {
    %c0_i32 = arith.constant 0 : i32
    %c0_i32_0 = arith.constant 0 : i32
    %c0_i32_1 = arith.constant 0 : i32
    return %c0_i32, %c0_i32_0 : i32, i32
  }
  func.func @transform_40(%arg0: i32) -> (i32, i32) {
    %c0_i32 = arith.constant 0 : i32
    %c0_i32_0 = arith.constant 0 : i32
    %c0_i32_1 = arith.constant 0 : i32
    return %c0_i32, %c0_i32_0 : i32, i32
  }
  func.func @transform_41(%arg0: i32) -> (i32, i32) {
    %c0_i32 = arith.constant 0 : i32
    %c0_i32_0 = arith.constant 0 : i32
    %c0_i32_1 = arith.constant 0 : i32
    return %c0_i32, %c0_i32_0 : i32, i32
  }
  func.func @transform_42(%arg0: i32) -> (i32, i32) {
    %c0_i32 = arith.constant 0 : i32
    %c0_i32_0 = arith.constant 0 : i32
    return %arg0, %c0_i32 : i32, i32
  }
}

</mosaic_0001>

<bundles_post_ra>
// kernel: tpu_custom_call.1
= control target key start
LH: loop header
LB: loop body
LE: loop exit
PB: predicated region body
PF: predicated region fallthrough
CT: control target
= control target key end

     0   :  { %s6462_s6 = smov 1   ;;  %s6463_s10 = smov 2   ;;  %s7729_s0 = inlined_call_operand.smem [shape: u32[43], index: -1, kind: input, shape index: {}] }
   0x1   :  { %s6548_s5 = sld [smem:[%s7729_s0]]   ;;  %s6464_s14 = smov 3  }
   0x2   :  { %s6553_s9 = sld [smem:[%s7729_s0 + %s6462_s6]]   ;;  %s6465_s18 = smov 4  }
   0x3   :  { %s6558_s13 = sld [smem:[%s7729_s0 + %s6463_s10]]   ;;  %s6466_s22 = smov 5  }
   0x4   :  { %s6563_s17 = sld [smem:[%s7729_s0 + %s6464_s14]]   ;;  %s6467_s26 = smov 6  }
   0x5   :  { %s6568_s21 = sld [smem:[%s7729_s0 + %s6465_s18]]   ;;  %s6468_s30 = smov 7  }
   0x6   :  { %s6573_s25 = sld [smem:[%s7729_s0 + %s6466_s22]]   ;;  %s6469_s4 = smov 8  }
   0x7   :  { %7771 = sst [smem:[#allocation48_spill]] %s6548_s5  ;;  %s6470_s10 = smov 9  }
   0x8   :  { %7772 = sst [smem:[#allocation49_spill]] %s6553_s9  ;;  %s6471_s15 = smov 10  }
   0x9   :  { %7773 = sst [smem:[#allocation50_spill]] %s6558_s13  ;;  %s6472_s20 = smov 11  }
   0xa   :  { %7774 = sst [smem:[#allocation51_spill]] %s6563_s17  ;;  %s6474_s1 = smov 13  }
   0xb   :  { %s6578_s29 = sld [smem:[%s7729_s0 + %s6467_s26]]   ;;  %s6473_s26 = smov 12  }
   0xc   :  { %s6583_s3 = sld [smem:[%s7729_s0 + %s6468_s30]]   ;;  %s6475_s7 = smov 14  }
   0xd   :  { %s6588_s8 = sld [smem:[%s7729_s0 + %s6469_s4]]   ;;  %s6477_s22 = smov 16  }
   0xe   :  { %s6593_s14 = sld [smem:[%s7729_s0 + %s6470_s10]]   ;;  %s6478_s28 = smov 17  }
   0xf   :  { %s6598_s19 = sld [smem:[%s7729_s0 + %s6471_s15]]   ;;  %s6476_s15 = smov 15  }
  0x10   :  { %s6603_s24 = sld [smem:[%s7729_s0 + %s6472_s20]]  }
  0x11   :  { %s6608_s30 = sld [smem:[%s7729_s0 + %s6473_s26]]  }
  0x12   :  { %7775 = sst [smem:[#allocation52_spill]] %s6583_s3 }
  0x13   :  { %7776 = sst [smem:[#allocation53_spill]] %s6588_s8 }
  0x14   :  { %7777 = sst [smem:[#allocation54_spill]] %s6593_s14 }
  0x15   :  { %s6613_s6 = sld [smem:[%s7729_s0 + %s6474_s1]]  }
  0x16   :  { %7778 = sst [smem:[#allocation55_spill]] %s6603_s24 }
  0x17   :  { %s6618_s12 = sld [smem:[%s7729_s0 + %s6475_s7]]   ;;  %s6479_s7 = smov 18  }
  0x18   :  { %s6623_s20 = sld [smem:[%s7729_s0 + %s6476_s15]]   ;;  %s6480_s15 = smov 19  }
  0x19   :  { %s6628_s27 = sld [smem:[%s7729_s0 + %s6477_s22]]   ;;  %s6481_s22 = smov 20  }
  0x1a   :  { %s6633_s4 = sld [smem:[%s7729_s0 + %s6478_s28]]   ;;  %s6482_s28 = smov 21  }
  0x1b   :  { %7779 = sst [smem:[#allocation56_spill]] %s6613_s6 }
  0x1c   :  { %s6638_s3 = sld [smem:[%s7729_s0 + %s6479_s7]]   ;;  %s6483_s7 = smov 22  }
  0x1d   :  { %7780 = sst [smem:[#allocation57_spill]] %s6618_s12 }
  0x1e   :  { %s6643_s17 = sld [smem:[%s7729_s0 + %s6480_s15]]   ;;  %s6484_s15 = smov 23  }
  0x1f   :  { %7781 = sst [smem:[#allocation58_spill]] %s6628_s27 }
  0x20   :  { %7782 = sst [smem:[#allocation59_spill]] %s6633_s4 }
  0x21   :  { %s6648_s8 = sld [smem:[%s7729_s0 + %s6481_s22]]   ;;  %s6485_s22 = smov 24  }
  0x22   :  { %7783 = sst [smem:[#allocation60_spill]] %s6638_s3 }
  0x23   :  { %s6653_s5 = sld [smem:[%s7729_s0 + %s6482_s28]]   ;;  %s6486_s28 = smov 25  }
  0x24   :  { %7784 = sst [smem:[#allocation61_spill]] %s6643_s17 }
  0x25   :  { %s6658_s3 = sld [smem:[%s7729_s0 + %s6483_s7]]   ;;  %s6487_s7 = smov 26  }
  0x26   :  { %s6663_s9 = sld [smem:[%s7729_s0 + %s6484_s15]]   ;;  %s6488_s15 = smov 27  }
  0x27   :  { %7785 = sst [smem:[#allocation62_spill]] %s6648_s8 }
  0x28   :  { %s6668_s8 = sld [smem:[%s7729_s0 + %s6485_s22]]   ;;  %s6489_s22 = smov 28  }
  0x29   :  { %7786 = sst [smem:[#allocation63_spill]] %s6653_s5 }
  0x2a   :  { %s6673_s5 = sld [smem:[%s7729_s0 + %s6486_s28]]   ;;  %s6490_s28 = smov 29  }
  0x2b   :  { %7787 = sst [smem:[#allocation64_spill]] %s6658_s3 }
  0x2c   :  { %7788 = sst [smem:[#allocation65_spill]] %s6663_s9 }
  0x2d   :  { %s6678_s3 = sld [smem:[%s7729_s0 + %s6487_s7]]   ;;  %s6491_s7 = smov 30  }
  0x2e   :  { %7789 = sst [smem:[#allocation66_spill]] %s6668_s8 }
  0x2f   :  { %s6683_s9 = sld [smem:[%s7729_s0 + %s6488_s15]]   ;;  %s6492_s15 = smov 31  }
  0x30   :  { %7790 = sst [smem:[#allocation67_spill]] %s6673_s5 }
  0x31   :  { %s6688_s8 = sld [smem:[%s7729_s0 + %s6489_s22]]   ;;  %s6493_s22 = smov 32  }
  0x32   :  { %s6693_s13 = sld [smem:[%s7729_s0 + %s6490_s28]]   ;;  %s6494_s28 = smov 33  }
  0x33   :  { %7791 = sst [smem:[#allocation68_spill]] %s6678_s3 }
  0x34   :  { %s6698_s3 = sld [smem:[%s7729_s0 + %s6491_s7]]   ;;  %s6495_s7 = smov 34  }
  0x35   :  { %s6703_s17 = sld [smem:[%s7729_s0 + %s6492_s15]]   ;;  %s6496_s15 = smov 35  }
  0x37   :  { %7792 = sst [smem:[#allocation69_spill]] %s6688_s8 }
  0x38   :  { %7793 = sst [smem:[#allocation70_spill]] %s6693_s13 }
  0x39   :  { %s6708_s8 = sld [smem:[%s7729_s0 + %s6493_s22]]   ;;  %s6497_s22 = smov 36  }
  0x3a   :  { %7794 = sst [smem:[#allocation71_spill]] %s6698_s3 }
  0x3b   :  { %7795 = sst [smem:[#allocation72_spill]] %s6703_s17 }
  0x3c   :  { %s6713_s13 = sld [smem:[%s7729_s0 + %s6494_s28]]   ;;  %s6498_s28 = smov 37  }
  0x3d   :  { %s6718_s3 = sld [smem:[%s7729_s0 + %s6495_s7]]   ;;  %s6499_s7 = smov 38  }
  0x3e   :  { %s6723_s17 = sld [smem:[%s7729_s0 + %s6496_s15]]   ;;  %s6500_s15 = smov 39  }
  0x3f   :  { %7796 = sst [smem:[#allocation73_spill]] %s6708_s8 }
  0x40   :  { %s6728_s8 = sld [smem:[%s7729_s0 + %s6497_s22]]   ;;  %s6501_s22 = smov 40  }
  0x41   :  { %s6733_s27 = sld [smem:[%s7729_s0 + %s6498_s28]]   ;;  %s6502_s28 = smov 41  }
  0x42   :  { %s6743_s12 = sld [smem:[%s7729_s0 + %s6500_s15]]  }
  0x43   :  { %7797 = sst [smem:[#allocation74_spill]] %s6718_s3 }
  0x44   :  { %s6738_s3 = sld [smem:[%s7729_s0 + %s6499_s7]]   ;;  %s6503_s7 = smov 42  }
  0x46   :  { %7798 = sst [smem:[#allocation75_spill]] %s6728_s8 }
  0x47   :  { %7799 = sst [smem:[#allocation76_spill]] %s6733_s27 }
  0x48   :  { %s6748_s8 = sld [smem:[%s7729_s0 + %s6501_s22]]  }
  0x49   :  { %s6753_s27 = sld [smem:[%s7729_s0 + %s6502_s28]]  }
  0x4a   :  { %7800 = sst [smem:[#allocation77_spill]] %s6738_s3 }
  0x4b   :  { %s6758_s3 = sld [smem:[%s7729_s0 + %s6503_s7]]  }
  0x4e   :  { %7801 = sst [smem:[#allocation78_spill]] %s6748_s8 }
  0x4f   :  { %90 = vsyncpa [#allocation3], 0 }
  0x50   :  { %91 = vsyncpa [#allocation6], 0 }
  0x51   :  { %92 = vsyncpa [#allocation9], 0 }
  0x52   :  { %93 = vsyncpa [#allocation12], 0 }
  0x53   :  { %94 = vsyncpa [#allocation15], 0 }
  0x54   :  { %95 = vsyncpa [#allocation18], 0 }
  0x55   :  { %96 = vsyncpa [#allocation21], 0 }
  0x56   :  { %97 = vsyncpa [#allocation24], 0 }
  0x57   :  { %98 = vsyncpa [#allocation27], 0 }
  0x58   :  { %99 = vsyncpa [#allocation30], 0 }
  0x59   :  { %100 = vsyncpa [#allocation33], 0 }
  0x5a   :  { %101 = vsyncpa [#allocation4], 0 }
  0x5b   :  { %103 = vsyncpa [#allocation4 + $0x1], 0  ;;  %s6760_s15 = smov 0   ;;  %s6762_s16 = smov 0  }
  0x5c   :  { %s6764_s18 = smov 0   ;;  %s6766_s0 = smov 0  }
  0x5d LB: > { %s7802_s6 = sld [smem:[#allocation56_spill]]  ;;  %s7803_s5 = sld [smem:[#allocation67_spill]]  ;;  %s6448_s15 = sphi %s6760_s15, %s7884_s15   ;;  %s6460_s0 = sphi %s6766_s0, %s7881_s0   ;;  %s6456_s18 = sphi %s6764_s18, %s7883_s18   ;;  %s6452_s16 = sphi %s6762_s16, %s7885_s16  }
  0x5e   : > { %s7804_s4 = sld [smem:[#allocation59_spill]]  ;;  %s7805_s24 = sld [smem:[#allocation55_spill]] }
  0x5f   : > { %s7806_s14 = sld [smem:[#allocation54_spill]]  ;;  %7807 = sst [smem:[#allocation79_spill]] %s6448_s15 }
  0x60   : > { %7808 = sst [smem:[#allocation80_spill]] %s6456_s18  ;;  %s6781_s22 = sadd.s32 4294967295, %s6460_s0  }
  0x61   : > { %7809 = sst [smem:[#allocation81_spill]] %s6460_s0  ;;  %s4320_s23 = sadd.s32 4294967294, %s6460_s0  }
  0x62   : > { %s6785_s26 = sadd.s32 1, %s6460_s0   ;;  %s1013_s28 = sadd.s32 1, %s6456_s18 }
  0x63   : > { %7810 = sst [smem:[#allocation82_spill]] %s6785_s26  ;;  %s1010_s1 = ssub.s32 %s6460_s0, %s6785_s26 }
  0x64   : > { %p1023_p0 = scmp.ne.s32.totalorder %s6456_s18, %s6452_s16  ;;  %p1011_p1 = scmp.eq.s32.totalorder %s1010_s1, 0 }
  0x65   : > { %p1024_p2 = scmp.eq.s32.totalorder %s6781_s22, 1  ;;  %p1029_p3 = scmp.ne.s32.totalorder %s6452_s16, %s6448_s15 }
  0x66   : > { %p1030_p4 = scmp.eq.s32.totalorder %s4320_s23, 1  ;;  %p4321_p7 = scmp.ge.s32.totalorder %s6460_s0, 1 }
  0x67   : > { %s6796_s2 = scalar_select %p1011_p1, %s6456_s18, %s1013_s28  }
  0x68   : > { %p6798_p5 = por %p1024_p2, %p1023_p0  ;;  %p6802_p6 = por %p1030_p4, %p1029_p3 }
  0x69   : > { %7811 = sst [smem:[#allocation83_spill]] %s6796_s2  ;;  %p1037_p8 = scmp.lt.s32.totalorder %s6460_s0, 3 }
  0x6a   : > { %s7812_s7 = scalar_select %p6798_p5, 1, 0 }
  0x6b   : > { %s7813_s10 = scalar_select %p6802_p6, 1, 0 }
  0x6c   : > { %p7749_p9 = scmp.eq.s32.totalorder %s6781_s22, 0  ;;  %p6809_p10 = pnand %p4321_p7, %p1037_p8 }
  0x6d   : > { %7814 = sst [smem:[#allocation84_spill]] %s7813_s10  ;;  %s6504_s23 = smov [#allocation5]  }
  0x6e   : > { %s7815_s11 = scalar_select %p6809_p10, 1, 0 }
  0x6f   : > { %s1063_s28 = sshll.u32 %s6504_s23, 4  ;;  %p5499_p11 = pneg %p6809_p10  ;;  %s6815_s28 = int_to_ptr.vmem [resolvable:$true] %s1063_s28 }
  0x70   : > { %s6505_s2 = smov [#allocation8]   ;;  %s6506_s26 = smov [#allocation11]  }
  0x71   : > { %p6819_p12 = pnand %p7749_p9, %p5499_p11  ;;  %s1096_s18 = sshll.u32 %s6505_s2, 4  ;;  %s6823_s18 = int_to_ptr.vmem [resolvable:$true] %s1096_s18 }
  0x72   : > { %s6825_s10 = sshll.u32 %s6506_s26, 4  ;;  %s5766_s15 = scalar_lea.hbm %s6573_s25, 512  ;;  %s1119_s10 = int_to_ptr.vmem [resolvable:$true] %s6825_s10 }
  0x73   : > { %p5767_p13 = scmp.ne.s32.totalorder %s6573_s25, %s5766_s15  ;;  %p6831_p0 = pneg %p6819_p12 }
  0x74   : > { %p5773_p3 = scmp.lt.u32.totalorder %s5766_s15, %s6573_s25 }
  0x75   : > { %p5769_p1 = pnand %p6831_p0, %p5767_p13 }
  0x77   : > { %p5770_p2 = pneg %p5769_p1 }
  0x79   : > { %p5775_p4 = pnand %p5773_p3, %p5770_p2 }
  0x7b   : > { %5778 = shalt.err (!%p5775_p4)
}
  0x7c   : > { %s5779_s26 = scalar_lea.vmem %s6815_s28, 512  ;;  %p5787_p9 = scmp.lt.s32.totalorder %s6815_s28, %s6815_s28 }
  0x7d   : > { %p5780_p7 = scmp.ne.s32.totalorder %s6815_s28, %s5779_s26  ;;  %p5788_p6 = scmp.lt.s32.totalorder %s5779_s26, %s5779_s26 }
  0x7f   : > { %p5782_p8 = pnand %p5780_p7, %p6831_p0  ;;  %p5789_p5 = por %p5788_p6, %p5787_p9 }
  0x81   : > { %p5783_p11 = pneg %p5782_p8 }
  0x83   : > { %p5790_p10 = pnand %p5789_p5, %p5783_p11 }
  0x85   : > { %5793 = shalt.err (!%p5790_p10)
}
  0x86   : > { %s7753_s2 = smov 128   ;;  %s7755_s15 = smov 8  }
  0x87   : > { %5505 = dma.hbm_to_vmem [thread:$0]  (!%p6819_p12), %s6573_s25, 512, %s6815_s28, [#allocation6], %s7753_s2, %s7753_s2, %s7755_s15  }
  0x88   : > { %s5794_s0 = scalar_lea.hbm %s7806_s14, 128 }
  0x89   : > { %p5795_p13 = scmp.ne.s32.totalorder %s7806_s14, %s5794_s0  ;;  %p5801_p9 = scmp.lt.u32.totalorder %s5794_s0, %s7806_s14 }
  0x8b   : > { %p5797_p6 = pnand %p5795_p13, %p6831_p0 }
  0x8d   : > { %p5798_p5 = pneg %p5797_p6 }
  0x8f   : > { %p5803_p10 = pnand %p5801_p9, %p5798_p5 }
  0x91   : > { %5806 = shalt.err (!%p5803_p10)
}
  0x92   : > { %s5807_s26 = scalar_lea.vmem %s6823_s18, 128  ;;  %p5815_p4 = scmp.lt.s32.totalorder %s6823_s18, %s6823_s18 }
  0x93   : > { %p5808_p1 = scmp.ne.s32.totalorder %s6823_s18, %s5807_s26  ;;  %p5816_p7 = scmp.lt.s32.totalorder %s5807_s26, %s5807_s26 }
  0x95   : > { %p5810_p2 = pnand %p5808_p1, %p6831_p0  ;;  %p5817_p8 = por %p5816_p7, %p5815_p4 }
  0x97   : > { %p5811_p3 = pneg %p5810_p2 }
  0x99   : > { %p5818_p11 = pnand %p5817_p8, %p5811_p3 }
  0x9b   : > { %5821 = shalt.err (!%p5818_p11)
}
  0x9c   : > { %5511 = dma.hbm_to_vmem [thread:$0]  (!%p6819_p12), %s7806_s14, 128, %s6823_s18, [#allocation9]  }
  0x9d   : > { %s5822_s0 = scalar_lea.hbm %s7805_s24, 128 }
  0x9e   : > { %p5823_p13 = scmp.ne.s32.totalorder %s7805_s24, %s5822_s0  ;;  %p5829_p9 = scmp.lt.u32.totalorder %s5822_s0, %s7805_s24 }
  0xa0   : > { %p5825_p6 = pnand %p5823_p13, %p6831_p0 }
  0xa2   : > { %p5826_p5 = pneg %p5825_p6 }
  0xa4   : > { %p5831_p10 = pnand %p5829_p9, %p5826_p5 }
  0xa6   : > { %5834 = shalt.err (!%p5831_p10)
}
  0xa7   : > { %s5835_s28 = scalar_lea.vmem %s1119_s10, 128  ;;  %p5843_p4 = scmp.lt.s32.totalorder %s1119_s10, %s1119_s10 }
  0xa8   : > { %p5836_p1 = scmp.ne.s32.totalorder %s1119_s10, %s5835_s28  ;;  %p5844_p7 = scmp.lt.s32.totalorder %s5835_s28, %s5835_s28 }
  0xaa   : > { %p5838_p2 = pnand %p5836_p1, %p6831_p0  ;;  %p5845_p8 = por %p5844_p7, %p5843_p4 }
  0xac   : > { %p5839_p3 = pneg %p5838_p2 }
  0xae   : > { %p5846_p11 = pnand %p5845_p8, %p5839_p3 }
  0xb0   : > { %5849 = shalt.err (!%p5846_p11)
}
  0xb1   : > { %5517 = dma.hbm_to_vmem [thread:$0]  (!%p6819_p12), %s7805_s24, 128, %s1119_s10, [#allocation12]  }
  0xb2   : > { %s6509_s18 = smov [#allocation14]   ;;  %s5850_s0 = scalar_lea.hbm %s7802_s6, 4096 }
  0xb3   : > { %s1139_s26 = sshll.u32 %s6509_s18, 4  ;;  %p5851_p13 = scmp.ne.s32.totalorder %s7802_s6, %s5850_s0  ;;  %s1140_s26 = int_to_ptr.vmem [resolvable:$true] %s1139_s26 }
  0xb4   : > { %p5857_p9 = scmp.lt.u32.totalorder %s5850_s0, %s7802_s6 }
  0xb5   : > { %p5853_p6 = pnand %p5851_p13, %p6831_p0 }
  0xb7   : > { %p5854_p5 = pneg %p5853_p6 }
  0xb9   : > { %p5859_p10 = pnand %p5857_p9, %p5854_p5 }
  0xbb   : > { %5862 = shalt.err (!%p5859_p10)
}
  0xbc   : > { %s5863_s28 = scalar_lea.vmem %s1140_s26, 4096  ;;  %p5871_p4 = scmp.lt.s32.totalorder %s1140_s26, %s1140_s26 }
  0xbd   : > { %p5864_p1 = scmp.ne.s32.totalorder %s1140_s26, %s5863_s28  ;;  %p5872_p7 = scmp.lt.s32.totalorder %s5863_s28, %s5863_s28 }
  0xbf   : > { %p5866_p2 = pnand %p5864_p1, %p6831_p0  ;;  %p5873_p8 = por %p5872_p7, %p5871_p4 }
  0xc1   : > { %p5867_p3 = pneg %p5866_p2 }
  0xc3   : > { %p5874_p11 = pnand %p5873_p8, %p5867_p3 }
  0xc5   : > { %5877 = shalt.err (!%p5874_p11)
}
  0xc6   : > { %s7759_s10 = smov 256   ;;  %s7760_s18 = smov 16  }
  0xc7   : > { %5523 = dma.hbm_to_vmem [thread:$0]  (!%p6819_p12), %s7802_s6, 4096, %s1140_s26, [#allocation15], %s7759_s10, %s7759_s10, %s7760_s18  }
  0xc8   : > { %s6512_s0 = smov [#allocation17]   ;;  %s6513_s15 = smov [#allocation20]  }
  0xc9   : > { %s1164_s2 = sshll.u32 %s6512_s0, 4  ;;  %s1185_s28 = sshll.u32 %s6513_s15, 4  ;;  %s1165_s2 = int_to_ptr.vmem [resolvable:$true] %s1164_s2  ;;  %s6890_s28 = int_to_ptr.vmem [resolvable:$true] %s1185_s28 }
  0xca   : > { %s5878_s14 = scalar_lea.hbm %s6623_s20, 32 }
  0xcb   : > { %p5879_p13 = scmp.ne.s32.totalorder %s6623_s20, %s5878_s14  ;;  %p5885_p9 = scmp.lt.u32.totalorder %s5878_s14, %s6623_s20 }
  0xcd   : > { %p5881_p6 = pnand %p5879_p13, %p6831_p0 }
  0xcf   : > { %p5882_p5 = pneg %p5881_p6 }
  0xd1   : > { %p5887_p10 = pnand %p5885_p9, %p5882_p5 }
  0xd3   : > { %5890 = shalt.err (!%p5887_p10)
}
  0xd4   : > { %s5891_s24 = scalar_lea.vmem %s1165_s2, 32  ;;  %p5899_p4 = scmp.lt.s32.totalorder %s1165_s2, %s1165_s2 }
  0xd5   : > { %p5892_p1 = scmp.ne.s32.totalorder %s1165_s2, %s5891_s24  ;;  %p5900_p7 = scmp.lt.s32.totalorder %s5891_s24, %s5891_s24 }
  0xd7   : > { %p5894_p2 = pnand %p5892_p1, %p6831_p0  ;;  %p5901_p8 = por %p5900_p7, %p5899_p4 }
  0xd9   : > { %p5895_p3 = pneg %p5894_p2 }
  0xdb   : > { %p5902_p11 = pnand %p5901_p8, %p5895_p3 }
  0xdd   : > { %5905 = shalt.err (!%p5902_p11)
}
  0xde   : > { %5529 = dma.hbm_to_vmem [thread:$0]  (!%p6819_p12), %s6623_s20, 32, %s1165_s2, [#allocation18]  }
  0xdf   : > { %s5906_s14 = scalar_lea.hbm %s7804_s4, 4096 }
  0xe0   : > { %p5907_p13 = scmp.ne.s32.totalorder %s7804_s4, %s5906_s14  ;;  %p5913_p9 = scmp.lt.u32.totalorder %s5906_s14, %s7804_s4 }
  0xe2   : > { %p5909_p6 = pnand %p5907_p13, %p6831_p0 }
  0xe4   : > { %p5910_p5 = pneg %p5909_p6 }
  0xe6   : > { %p5915_p10 = pnand %p5913_p9, %p5910_p5 }
  0xe8   : > { %5918 = shalt.err (!%p5915_p10)
}
  0xe9   : > { %s5919_s24 = scalar_lea.vmem %s6890_s28, 4096  ;;  %p5927_p4 = scmp.lt.s32.totalorder %s6890_s28, %s6890_s28 }
  0xea   : > { %p5920_p1 = scmp.ne.s32.totalorder %s6890_s28, %s5919_s24  ;;  %p5928_p7 = scmp.lt.s32.totalorder %s5919_s24, %s5919_s24 }
  0xec   : > { %p5922_p2 = pnand %p5920_p1, %p6831_p0  ;;  %p5929_p8 = por %p5928_p7, %p5927_p4 }
  0xee   : > { %p5923_p3 = pneg %p5922_p2 }
  0xf0   : > { %p5930_p11 = pnand %p5929_p8, %p5923_p3 }
  0xf2   : > { %5933 = shalt.err (!%p5930_p11)
}
  0xf3   : > { %s7818_s2 = smov 8   ;;  %s7819_s15 = smov 128  }
  0xf4   : > { %5535 = dma.hbm_to_vmem [thread:$0]  (!%p6819_p12), %s7804_s4, 4096, %s6890_s28, [#allocation21], %s7819_s15, %s7819_s15, %s7818_s2  }
  0xf5   : > { %s6514_s26 = smov [#allocation23]   ;;  %s6515_s14 = smov [#allocation26]  }
  0xf6   : > { %s1230_s0 = sshll.u32 %s6514_s26, 4  ;;  %s1251_s10 = sshll.u32 %s6515_s14, 4  ;;  %s1231_s0 = int_to_ptr.vmem [resolvable:$true] %s1230_s0  ;;  %s6920_s10 = int_to_ptr.vmem [resolvable:$true] %s1251_s10 }
  0xf7   : > { %s5934_s24 = scalar_lea.hbm %s7803_s5, 16 }
  0xf8   : > { %p5935_p13 = scmp.ne.s32.totalorder %s7803_s5, %s5934_s24  ;;  %p5941_p9 = scmp.lt.u32.totalorder %s5934_s24, %s7803_s5 }
  0xfa   : > { %p5937_p6 = pnand %p5935_p13, %p6831_p0 }
  0xfc   : > { %p5938_p5 = pneg %p5937_p6 }
  0xfe   : > { %p5943_p10 = pnand %p5941_p9, %p5938_p5 }
 0x100   : > { %5946 = shalt.err (!%p5943_p10)
}
 0x101   : > { %s5947_s18 = scalar_lea.vmem %s1231_s0, 16  ;;  %s5954_s28 = scalar_lea.vmem %s1231_s0, 32 }
 0x102   : > { %p5948_p1 = scmp.ne.s32.totalorder %s1231_s0, %s5947_s18  ;;  %p5955_p4 = scmp.lt.s32.totalorder %s1231_s0, %s1231_s0 }
 0x103   : > { %p5956_p7 = scmp.lt.s32.totalorder %s5954_s28, %s5947_s18 }
 0x104   : > { %p5950_p2 = pnand %p5948_p1, %p6831_p0 }
 0x105   : > { %p5957_p8 = por %p5956_p7, %p5955_p4 }
 0x106   : > { %p5951_p3 = pneg %p5950_p2 }
 0x108   : > { %p5958_p11 = pnand %p5957_p8, %p5951_p3 }
 0x10a   : > { %5961 = shalt.err (!%p5958_p11)
}
 0x10b   : > { %5541 = dma.hbm_to_vmem [thread:$0]  (!%p6819_p12), %s7803_s5, 16, %s1231_s0, [#allocation24]  }
 0x10c   : > { %s5962_s26 = scalar_lea.hbm %s6683_s9, 1024 }
 0x10d   : > { %p5963_p13 = scmp.ne.s32.totalorder %s6683_s9, %s5962_s26  ;;  %p5969_p9 = scmp.lt.u32.totalorder %s5962_s26, %s6683_s9 }
 0x10f   : > { %p5965_p6 = pnand %p5963_p13, %p6831_p0 }
 0x111   : > { %p5966_p5 = pneg %p5965_p6 }
 0x113   : > { %p5971_p10 = pnand %p5969_p9, %p5966_p5 }
 0x115   : > { %5974 = shalt.err (!%p5971_p10)
}
 0x116   : > { %s5975_s18 = scalar_lea.vmem %s6920_s10, 1024  ;;  %p5983_p4 = scmp.lt.s32.totalorder %s6920_s10, %s6920_s10 }
 0x117   : > { %p5976_p1 = scmp.ne.s32.totalorder %s6920_s10, %s5975_s18  ;;  %p5984_p7 = scmp.lt.s32.totalorder %s5975_s18, %s5975_s18 }
 0x119   : > { %p5978_p2 = pnand %p5976_p1, %p6831_p0  ;;  %p5985_p8 = por %p5984_p7, %p5983_p4 }
 0x11b   : > { %p5979_p3 = pneg %p5978_p2 }
 0x11d   : > { %p5986_p11 = pnand %p5985_p8, %p5979_p3 }
 0x11f   : > { %5989 = shalt.err (!%p5986_p11)
}
 0x120   : > { %5547 = dma.hbm_to_vmem [thread:$0]  (!%p6819_p12), %s6683_s9, 1024, %s6920_s10, [#allocation27], %s7819_s15, %s7819_s15, %s7818_s2  }
 0x121   : > { %s6516_s0 = smov [#allocation29]   ;;  %s6517_s24 = smov [#allocation32]  }
 0x122   : > { %s1288_s14 = sshll.u32 %s6516_s0, 4  ;;  %s1310_s28 = sshll.u32 %s6517_s24, 4  ;;  %s1289_s14 = int_to_ptr.vmem [resolvable:$true] %s1288_s14  ;;  %s6950_s28 = int_to_ptr.vmem [resolvable:$true] %s1310_s28 }
 0x123   : > { %s5990_s26 = scalar_lea.hbm %s6713_s13, 16 }
 0x124   : > { %p5991_p13 = scmp.ne.s32.totalorder %s6713_s13, %s5990_s26  ;;  %p5997_p9 = scmp.lt.u32.totalorder %s5990_s26, %s6713_s13 }
 0x126   : > { %p5993_p6 = pnand %p5991_p13, %p6831_p0 }
 0x128   : > { %p5994_p5 = pneg %p5993_p6 }
 0x12a   : > { %p5999_p10 = pnand %p5997_p9, %p5994_p5 }
 0x12c   : > { %6002 = shalt.err (!%p5999_p10)
}
 0x12d   : > { %s6003_s18 = scalar_lea.vmem %s1289_s14, 16  ;;  %s6010_s10 = scalar_lea.vmem %s1289_s14, 32 }
 0x12e   : > { %p6004_p1 = scmp.ne.s32.totalorder %s1289_s14, %s6003_s18  ;;  %p6011_p4 = scmp.lt.s32.totalorder %s1289_s14, %s1289_s14 }
 0x12f   : > { %p6012_p7 = scmp.lt.s32.totalorder %s6010_s10, %s6003_s18 }
 0x130   : > { %p6006_p2 = pnand %p6004_p1, %p6831_p0 }
 0x131   : > { %p6013_p8 = por %p6012_p7, %p6011_p4 }
 0x132   : > { %p6007_p3 = pneg %p6006_p2 }
 0x134   : > { %p6014_p11 = pnand %p6013_p8, %p6007_p3 }
 0x136   : > { %6017 = shalt.err (!%p6014_p11)
}
 0x137   : > { %5553 = dma.hbm_to_vmem [thread:$0]  (!%p6819_p12), %s6713_s13, 16, %s1289_s14, [#allocation30]  }
 0x138   : > { %s6018_s0 = scalar_lea.hbm %s6723_s17, 16 }
 0x139   : > { %p6019_p13 = scmp.ne.s32.totalorder %s6723_s17, %s6018_s0  ;;  %p6025_p9 = scmp.lt.u32.totalorder %s6018_s0, %s6723_s17 }
 0x13b   : > { %p6021_p6 = pnand %p6019_p13, %p6831_p0 }
 0x13d   : > { %p6022_p5 = pneg %p6021_p6 }
 0x13f   : > { %p6027_p10 = pnand %p6025_p9, %p6022_p5 }
 0x141   : > { %6030 = shalt.err (!%p6027_p10)
}
 0x142   : > { %s6031_s24 = scalar_lea.vmem %s6950_s28, 16  ;;  %s6038_s26 = scalar_lea.vmem %s6950_s28, 32 }
 0x143   : > { %p6032_p1 = scmp.ne.s32.totalorder %s6950_s28, %s6031_s24  ;;  %p6039_p4 = scmp.lt.s32.totalorder %s6950_s28, %s6950_s28 }
 0x144   : > { %p6040_p7 = scmp.lt.s32.totalorder %s6038_s26, %s6031_s24 }
 0x145   : > { %p6034_p2 = pnand %p6032_p1, %p6831_p0 }
 0x146   : > { %p6041_p8 = por %p6040_p7, %p6039_p4 }
 0x147   : > { %p6035_p3 = pneg %p6034_p2 }
 0x149   : > { %p6042_p11 = pnand %p6041_p8, %p6035_p3 }
 0x14b   : > { %6045 = shalt.err (!%p6042_p11)
}
 0x14c   : > { %5559 = dma.hbm_to_vmem [thread:$0]  (!%p6819_p12), %s6723_s17, 16, %s6950_s28, [#allocation33]  }
 0x14d   : > { %s6518_s14 = smov [#allocation2]   ;;  %s6519_s10 = smov [#allocation7]  }
 0x14e   : > { %s1053_s18 = sshll.u32 %s6518_s14, 4  ;;  %s1076_s0 = sshll.u32 %s6519_s10, 4  ;;  %s1054_s18 = int_to_ptr.vmem [resolvable:$true] %s1053_s18  ;;  %s6978_s0 = int_to_ptr.vmem [resolvable:$true] %s1076_s0 }
 0x14f   : > { %s6046_s24 = scalar_lea.hbm %s6568_s21, 16 }
 0x150   : > { %p6047_p13 = scmp.ne.s32.totalorder %s6568_s21, %s6046_s24  ;;  %p6053_p9 = scmp.lt.u32.totalorder %s6046_s24, %s6568_s21 }
 0x152   : > { %p6049_p6 = pnand %p6047_p13, %p6831_p0 }
 0x154   : > { %p6050_p5 = pneg %p6049_p6 }
 0x156   : > { %p6055_p10 = pnand %p6053_p9, %p6050_p5 }
 0x158   : > { %6058 = shalt.err (!%p6055_p10)
}
 0x159   : > { %s6059_s26 = scalar_lea.vmem %s1054_s18, 16  ;;  %s6066_s28 = scalar_lea.vmem %s1054_s18, 32 }
 0x15a   : > { %p6060_p1 = scmp.ne.s32.totalorder %s1054_s18, %s6059_s26  ;;  %p6067_p4 = scmp.lt.s32.totalorder %s1054_s18, %s1054_s18 }
 0x15b   : > { %p6068_p7 = scmp.lt.s32.totalorder %s6066_s28, %s6059_s26 }
 0x15c   : > { %p6062_p2 = pnand %p6060_p1, %p6831_p0 }
 0x15d   : > { %p6069_p8 = por %p6068_p7, %p6067_p4 }
 0x15e   : > { %p6063_p3 = pneg %p6062_p2 }
 0x160   : > { %p6070_p11 = pnand %p6069_p8, %p6063_p3 }
 0x162   : > { %6073 = shalt.err (!%p6070_p11)
}
 0x163   : > { %5502 = dma.hbm_to_vmem [thread:$0]  (!%p6819_p12), %s6568_s21, 16, %s1054_s18, [#allocation3]  }
 0x164   : > { %s6074_s14 = scalar_lea.hbm %s6578_s29, 1024 }
 0x165   : > { %p6075_p13 = scmp.ne.s32.totalorder %s6578_s29, %s6074_s14  ;;  %p6081_p9 = scmp.lt.u32.totalorder %s6074_s14, %s6578_s29 }
 0x167   : > { %p6077_p6 = pnand %p6075_p13, %p6831_p0 }
 0x169   : > { %p6078_p5 = pneg %p6077_p6 }
 0x16b   : > { %p6083_p10 = pnand %p6081_p9, %p6078_p5 }
 0x16d   : > { %6086 = shalt.err (!%p6083_p10)
}
 0x16e   : > { %s6087_s10 = scalar_lea.vmem %s6978_s0, 1024  ;;  %p6095_p4 = scmp.lt.s32.totalorder %s6978_s0, %s6978_s0 }
 0x16f   : > { %p6088_p1 = scmp.ne.s32.totalorder %s6978_s0, %s6087_s10  ;;  %p6096_p7 = scmp.lt.s32.totalorder %s6087_s10, %s6087_s10 }
 0x171   : > { %p6090_p2 = pnand %p6088_p1, %p6831_p0  ;;  %p6097_p8 = por %p6096_p7, %p6095_p4 }
 0x173   : > { %p6091_p3 = pneg %p6090_p2 }
 0x175   : > { %p6098_p11 = pnand %p6097_p8, %p6091_p3 }
 0x177   : > { %6101 = shalt.err (!%p6098_p11)
}
 0x178   : > { %5508 = dma.hbm_to_vmem [thread:$0]  (!%p6819_p12), %s6578_s29, 1024, %s6978_s0, [#allocation6], %s7819_s15, %s7819_s15, %s7818_s2  }
 0x179   : > { %s6520_s18 = smov [#allocation10]   ;;  %s6521_s26 = smov [#allocation13]  }
 0x17a   : > { %s1107_s24 = sshll.u32 %s6520_s18, 4  ;;  %s1129_s28 = sshll.u32 %s6521_s26, 4  ;;  %s1108_s24 = int_to_ptr.vmem [resolvable:$true] %s1107_s24  ;;  %s7008_s28 = int_to_ptr.vmem [resolvable:$true] %s1129_s28 }
 0x17b   : > { %s6102_s14 = scalar_lea.hbm %s6598_s19, 16 }
 0x17c   : > { %p6103_p13 = scmp.ne.s32.totalorder %s6598_s19, %s6102_s14  ;;  %p6109_p9 = scmp.lt.u32.totalorder %s6102_s14, %s6598_s19 }
 0x17e   : > { %p6105_p6 = pnand %p6103_p13, %p6831_p0 }
 0x180   : > { %p6106_p5 = pneg %p6105_p6 }
 0x182   : > { %p6111_p10 = pnand %p6109_p9, %p6106_p5 }
 0x184   : > { %6114 = shalt.err (!%p6111_p10)
}
 0x185   : > { %s6115_s10 = scalar_lea.vmem %s1108_s24, 16  ;;  %s6122_s2 = scalar_lea.vmem %s1108_s24, 32 }
 0x186   : > { %p6116_p1 = scmp.ne.s32.totalorder %s1108_s24, %s6115_s10  ;;  %p6123_p4 = scmp.lt.s32.totalorder %s1108_s24, %s1108_s24 }
 0x187   : > { %p6124_p7 = scmp.lt.s32.totalorder %s6122_s2, %s6115_s10 }
 0x188   : > { %p6118_p2 = pnand %p6116_p1, %p6831_p0 }
 0x189   : > { %p6125_p8 = por %p6124_p7, %p6123_p4 }
 0x18a   : > { %p6119_p3 = pneg %p6118_p2 }
 0x18c   : > { %p6126_p11 = pnand %p6125_p8, %p6119_p3 }
 0x18e   : > { %6129 = shalt.err (!%p6126_p11)
}
 0x18f   : > { %5514 = dma.hbm_to_vmem [thread:$0]  (!%p6819_p12), %s6598_s19, 16, %s1108_s24, [#allocation9]  }
 0x190   : > { %s6130_s15 = scalar_lea.hbm %s6608_s30, 16 }
 0x191   : > { %p6131_p13 = scmp.ne.s32.totalorder %s6608_s30, %s6130_s15  ;;  %p6137_p9 = scmp.lt.u32.totalorder %s6130_s15, %s6608_s30 }
 0x193   : > { %p6133_p6 = pnand %p6131_p13, %p6831_p0 }
 0x195   : > { %p6134_p5 = pneg %p6133_p6 }
 0x197   : > { %p6139_p10 = pnand %p6137_p9, %p6134_p5 }
 0x199   : > { %6142 = shalt.err (!%p6139_p10)
}
 0x19a   : > { %s6143_s0 = scalar_lea.vmem %s7008_s28, 16  ;;  %s6150_s18 = scalar_lea.vmem %s7008_s28, 32 }
 0x19b   : > { %p6144_p1 = scmp.ne.s32.totalorder %s7008_s28, %s6143_s0  ;;  %p6151_p4 = scmp.lt.s32.totalorder %s7008_s28, %s7008_s28 }
 0x19c   : > { %p6152_p7 = scmp.lt.s32.totalorder %s6150_s18, %s6143_s0 }
 0x19d   : > { %p6146_p2 = pnand %p6144_p1, %p6831_p0 }
 0x19e   : > { %p6153_p8 = por %p6152_p7, %p6151_p4 }
 0x19f   : > { %p6147_p3 = pneg %p6146_p2 }
 0x1a1   : > { %p6154_p11 = pnand %p6153_p8, %p6147_p3 }
 0x1a3   : > { %6157 = shalt.err (!%p6154_p11)
}
 0x1a4   : > { %s7820_s24 = sld [smem:[#allocation57_spill]]  ;;  %s6522_s26 = smov [#allocation16]  }
 0x1a5   : > { %5520 = dma.hbm_to_vmem [thread:$0]  (!%p6819_p12), %s6608_s30, 16, %s7008_s28, [#allocation12]  }
 0x1a6   : > { %s1153_s14 = sshll.u32 %s6522_s26, 4  ;;  %s6523_s10 = smov [#allocation19]   ;;  %s1154_s14 = int_to_ptr.vmem [resolvable:$true] %s1153_s14 }
 0x1a7   : > { %s1175_s2 = sshll.u32 %s6523_s10, 4  ;;  %s7036_s2 = int_to_ptr.vmem [resolvable:$true] %s1175_s2 }
 0x1aa   : > { %s6158_s15 = scalar_lea.hbm %s7820_s24, 32 }
 0x1ab   : > { %p6159_p13 = scmp.ne.s32.totalorder %s7820_s24, %s6158_s15  ;;  %p6165_p9 = scmp.lt.u32.totalorder %s6158_s15, %s7820_s24 }
 0x1ad   : > { %p6161_p6 = pnand %p6159_p13, %p6831_p0 }
 0x1af   : > { %p6162_p5 = pneg %p6161_p6 }
 0x1b1   : > { %p6167_p10 = pnand %p6165_p9, %p6162_p5 }
 0x1b3   : > { %6170 = shalt.err (!%p6167_p10)
}
 0x1b4   : > { %s6171_s0 = scalar_lea.vmem %s1154_s14, 32  ;;  %p6179_p4 = scmp.lt.s32.totalorder %s1154_s14, %s1154_s14 }
 0x1b5   : > { %p6172_p1 = scmp.ne.s32.totalorder %s1154_s14, %s6171_s0  ;;  %p6180_p7 = scmp.lt.s32.totalorder %s6171_s0, %s6171_s0 }
 0x1b7   : > { %p6174_p2 = pnand %p6172_p1, %p6831_p0  ;;  %p6181_p8 = por %p6180_p7, %p6179_p4 }
 0x1b9   : > { %p6175_p3 = pneg %p6174_p2 }
 0x1bb   : > { %p6182_p11 = pnand %p6181_p8, %p6175_p3 }
 0x1bd   : > { %6185 = shalt.err (!%p6182_p11)
}
 0x1be   : > { %s7821_s28 = sld [smem:[#allocation58_spill]] }
 0x1bf   : > { %5526 = dma.hbm_to_vmem [thread:$0]  (!%p6819_p12), %s7820_s24, 32, %s1154_s14, [#allocation15]  }
 0x1c4   : > { %s6186_s18 = scalar_lea.hbm %s7821_s28, 32 }
 0x1c5   : > { %p6187_p13 = scmp.ne.s32.totalorder %s7821_s28, %s6186_s18  ;;  %p6193_p9 = scmp.lt.u32.totalorder %s6186_s18, %s7821_s28 }
 0x1c7   : > { %p6189_p6 = pnand %p6187_p13, %p6831_p0 }
 0x1c9   : > { %p6190_p5 = pneg %p6189_p6 }
 0x1cb   : > { %p6195_p10 = pnand %p6193_p9, %p6190_p5 }
 0x1cd   : > { %6198 = shalt.err (!%p6195_p10)
}
 0x1ce   : > { %s6199_s26 = scalar_lea.vmem %s7036_s2, 32  ;;  %p6207_p4 = scmp.lt.s32.totalorder %s7036_s2, %s7036_s2 }
 0x1cf   : > { %p6200_p1 = scmp.ne.s32.totalorder %s7036_s2, %s6199_s26  ;;  %p6208_p7 = scmp.lt.s32.totalorder %s6199_s26, %s6199_s26 }
 0x1d1   : > { %p6202_p2 = pnand %p6200_p1, %p6831_p0  ;;  %p6209_p8 = por %p6208_p7, %p6207_p4 }
 0x1d3   : > { %p6203_p3 = pneg %p6202_p2 }
 0x1d5   : > { %p6210_p11 = pnand %p6209_p8, %p6203_p3 }
 0x1d7   : > { %6213 = shalt.err (!%p6210_p11)
}
 0x1d8   : > { %s7822_s14 = sld [smem:[#allocation61_spill]]  ;;  %s6524_s10 = smov [#allocation22]  }
 0x1d9   : > { %5532 = dma.hbm_to_vmem [thread:$0]  (!%p6819_p12), %s7821_s28, 32, %s7036_s2, [#allocation18]  }
 0x1da   : > { %s1201_s15 = sshll.u32 %s6524_s10, 4  ;;  %s6525_s0 = smov [#allocation25]   ;;  %s1202_s15 = int_to_ptr.vmem [resolvable:$true] %s1201_s15 }
 0x1db   : > { %s1241_s18 = sshll.u32 %s6525_s0, 4  ;;  %s7063_s18 = int_to_ptr.vmem [resolvable:$true] %s1241_s18 }
 0x1de   : > { %s6214_s26 = scalar_lea.hbm %s7822_s14, 4096 }
 0x1df   : > { %p6215_p13 = scmp.ne.s32.totalorder %s7822_s14, %s6214_s26  ;;  %p6221_p9 = scmp.lt.u32.totalorder %s6214_s26, %s7822_s14 }
 0x1e1   : > { %p6217_p6 = pnand %p6215_p13, %p6831_p0 }
 0x1e3   : > { %p6218_p5 = pneg %p6217_p6 }
 0x1e5   : > { %p6223_p10 = pnand %p6221_p9, %p6218_p5 }
 0x1e7   : > { %6226 = shalt.err (!%p6223_p10)
}
 0x1e8   : > { %s6227_s4 = scalar_lea.vmem %s1202_s15, 4096  ;;  %p6235_p4 = scmp.lt.s32.totalorder %s1202_s15, %s1202_s15 }
 0x1e9   : > { %p6228_p1 = scmp.ne.s32.totalorder %s1202_s15, %s6227_s4  ;;  %p6236_p7 = scmp.lt.s32.totalorder %s6227_s4, %s6227_s4 }
 0x1eb   : > { %p6230_p2 = pnand %p6228_p1, %p6831_p0  ;;  %p6237_p8 = por %p6236_p7, %p6235_p4 }
 0x1ed   : > { %p6231_p3 = pneg %p6230_p2 }
 0x1ef   : > { %p6238_p11 = pnand %p6237_p8, %p6231_p3 }
 0x1f1   : > { %6241 = shalt.err (!%p6238_p11)
}
 0x1f2   : > { %s7823_s2 = smov 16   ;;  %s7824_s10 = smov 256  }
 0x1f3   : > { %s7825_s0 = sld [smem:[#allocation68_spill]] }
 0x1f4   : > { %5538 = dma.hbm_to_vmem [thread:$0]  (!%p6819_p12), %s7822_s14, 4096, %s1202_s15, [#allocation21], %s7824_s10, %s7824_s10, %s7823_s2  }
 0x1f9   : > { %s7826_s26 = smov %s7825_s0  ;;  %s6242_s5 = scalar_lea.hbm %s7825_s0, 16 }
 0x1fa   : > { %p6243_p13 = scmp.ne.s32.totalorder %s7826_s26, %s6242_s5  ;;  %p6249_p9 = scmp.lt.u32.totalorder %s6242_s5, %s7826_s26 }
 0x1fc   : > { %p6245_p6 = pnand %p6243_p13, %p6831_p0 }
 0x1fe   : > { %p6246_p5 = pneg %p6245_p6 }
 0x200   : > { %p6251_p10 = pnand %p6249_p9, %p6246_p5 }
 0x202   : > { %6254 = shalt.err (!%p6251_p10)
}
 0x203   : > { %s6255_s4 = scalar_lea.vmem %s7063_s18, 16  ;;  %s6262_s6 = scalar_lea.vmem %s7063_s18, 32 }
 0x204   : > { %p6256_p1 = scmp.ne.s32.totalorder %s7063_s18, %s6255_s4  ;;  %p6263_p4 = scmp.lt.s32.totalorder %s7063_s18, %s7063_s18 }
 0x205   : > { %p6264_p7 = scmp.lt.s32.totalorder %s6262_s6, %s6255_s4 }
 0x206   : > { %p6258_p2 = pnand %p6256_p1, %p6831_p0 }
 0x207   : > { %p6265_p8 = por %p6264_p7, %p6263_p4 }
 0x208   : > { %p6259_p3 = pneg %p6258_p2 }
 0x20a   : > { %p6266_p11 = pnand %p6265_p8, %p6259_p3 }
 0x20c   : > { %6269 = shalt.err (!%p6266_p11)
}
 0x20d   : > { %s7827_s5 = sld [smem:[#allocation72_spill]]  ;;  %s6526_s15 = smov [#allocation28]  }
 0x20e   : > { %5544 = dma.hbm_to_vmem [thread:$0]  (!%p6819_p12), %s7826_s26, 16, %s7063_s18, [#allocation24]  }
 0x20f   : > { %s1274_s2 = sshll.u32 %s6526_s15, 4  ;;  %s6527_s10 = smov [#allocation31]   ;;  %s1275_s2 = int_to_ptr.vmem [resolvable:$true] %s1274_s2 }
 0x210   : > { %s1299_s0 = sshll.u32 %s6527_s10, 4  ;;  %s7094_s0 = int_to_ptr.vmem [resolvable:$true] %s1299_s0 }
 0x213   : > { %s6270_s6 = scalar_lea.hbm %s7827_s5, 16 }
 0x214   : > { %p6271_p13 = scmp.ne.s32.totalorder %s7827_s5, %s6270_s6  ;;  %p6277_p9 = scmp.lt.u32.totalorder %s6270_s6, %s7827_s5 }
 0x216   : > { %p6273_p6 = pnand %p6271_p13, %p6831_p0 }
 0x218   : > { %p6274_p5 = pneg %p6273_p6 }
 0x21a   : > { %p6279_p10 = pnand %p6277_p9, %p6274_p5 }
 0x21c   : > { %6282 = shalt.err (!%p6279_p10)
}
 0x21d   : > { %s6283_s4 = scalar_lea.vmem %s1275_s2, 16  ;;  %s6290_s18 = scalar_lea.vmem %s1275_s2, 32 }
 0x21e   : > { %p6284_p1 = scmp.ne.s32.totalorder %s1275_s2, %s6283_s4  ;;  %p6291_p4 = scmp.lt.s32.totalorder %s1275_s2, %s1275_s2 }
 0x21f   : > { %p6292_p7 = scmp.lt.s32.totalorder %s6290_s18, %s6283_s4 }
 0x220   : > { %p6286_p2 = pnand %p6284_p1, %p6831_p0 }
 0x221   : > { %p6293_p8 = por %p6292_p7, %p6291_p4 }
 0x222   : > { %p6287_p3 = pneg %p6286_p2 }
 0x224   : > { %p6294_p11 = pnand %p6293_p8, %p6287_p3 }
 0x226   : > { %6297 = shalt.err (!%p6294_p11)
}
 0x227   : > { %s7828_s15 = sld [smem:[#allocation74_spill]] }
 0x228   : > { %5550 = dma.hbm_to_vmem [thread:$0]  (!%p6819_p12), %s7827_s5, 16, %s1275_s2, [#allocation27]  }
 0x22d   : > { %s7829_s10 = smov %s7828_s15  ;;  %s6298_s6 = scalar_lea.hbm %s7828_s15, 16 }
 0x22e   : > { %p6299_p13 = scmp.ne.s32.totalorder %s7829_s10, %s6298_s6  ;;  %p6305_p9 = scmp.lt.u32.totalorder %s6298_s6, %s7829_s10 }
 0x230   : > { %p6301_p6 = pnand %p6299_p13, %p6831_p0 }
 0x232   : > { %p6302_p5 = pneg %p6301_p6 }
 0x234   : > { %p6307_p10 = pnand %p6305_p9, %p6302_p5 }
 0x236   : > { %6310 = shalt.err (!%p6307_p10)
}
 0x237   : > { %s6311_s4 = scalar_lea.vmem %s7094_s0, 16  ;;  %s6318_s18 = scalar_lea.vmem %s7094_s0, 32 }
 0x238   : > { %p6312_p1 = scmp.ne.s32.totalorder %s7094_s0, %s6311_s4  ;;  %p6319_p4 = scmp.lt.s32.totalorder %s7094_s0, %s7094_s0 }
 0x239   : > { %p6320_p7 = scmp.lt.s32.totalorder %s6318_s18, %s6311_s4 }
 0x23a   : > { %p6314_p2 = pnand %p6312_p1, %p6831_p0 }
 0x23b   : > { %p6321_p8 = por %p6320_p7, %p6319_p4 }
 0x23c   : > { %p6315_p3 = pneg %p6314_p2 }
 0x23e   : > { %p6322_p11 = pnand %p6321_p8, %p6315_p3 }
 0x240   : > { %6325 = shalt.err (!%p6322_p11)
}
 0x241   : > { %s7830_s2 = sld [smem:[#allocation77_spill]]  ;;  %s6528_s15 = smov [#allocation34]  }
 0x242   : > { %5556 = dma.hbm_to_vmem [thread:$0]  (!%p6819_p12), %s7829_s10, 16, %s7094_s0, [#allocation30]  }
 0x243   : > { %s1327_s6 = sshll.u32 %s6528_s15, 4  ;;  %s1328_s6 = int_to_ptr.vmem [resolvable:$true] %s1327_s6 }
 0x247   : > { %s6326_s5 = scalar_lea.hbm %s7830_s2, 16 }
 0x248   : > { %p6327_p13 = scmp.ne.s32.totalorder %s7830_s2, %s6326_s5  ;;  %p6333_p9 = scmp.lt.u32.totalorder %s6326_s5, %s7830_s2 }
 0x24a   : > { %p6329_p6 = pnand %p6327_p13, %p6831_p0 }
 0x24c   : > { %p6330_p5 = pneg %p6329_p6 }
 0x24e   : > { %p6335_p10 = pnand %p6333_p9, %p6330_p5 }
 0x250   : > { %6338 = shalt.err (!%p6335_p10)
}
 0x251   : > { %s6339_s4 = scalar_lea.vmem %s1328_s6, 16  ;;  %s6346_s18 = scalar_lea.vmem %s1328_s6, 32 }
 0x252   : > { %p6340_p1 = scmp.ne.s32.totalorder %s1328_s6, %s6339_s4  ;;  %p6347_p4 = scmp.lt.s32.totalorder %s1328_s6, %s1328_s6 }
 0x253   : > { %p6348_p7 = scmp.lt.s32.totalorder %s6346_s18, %s6339_s4 }
 0x254   : > { %p6342_p2 = pnand %p6340_p1, %p6831_p0 }
 0x255   : > { %p6349_p8 = por %p6348_p7, %p6347_p4 }
 0x256   : > { %p6343_p3 = pneg %p6342_p2 }
 0x258   : > { %p6350_p11 = pnand %p6349_p8, %p6343_p3 }
 0x25a   : > { %6353 = shalt.err (!%p6350_p11)
}
 0x25b   : > { %5562 = dma.hbm_to_vmem [thread:$0]  (!%p6819_p12), %s7830_s2, 16, %s1328_s6, [#allocation33]  }
 0x25c   : > { %p7831_p13 = scmp.ne.s32.totalorder %s7815_s11, 0 }
 0x25d   : > { %p7832_p6 = scmp.eq.s32.totalorder (!%p7831_p13), %s6781_s22, 0 }
 0x25e   : > { %1370 = sbr.rel (%p7831_p13) target bundleno = 4015 (0xfaf), region = 188 }
 0x265   : > { %6399 = dma.done.wait (%p7832_p6), [#allocation3], 16   ;;  %p7833_p5 = pmov %p7832_p6 }
 0x267   : > { %6401 = vsyncadd (%p7833_p5), [#allocation3], 4294967280  ;;  %p7834_p0 = pmov %p7833_p5 }
 0x269   : > { %6403 = dma.done.wait (%p7834_p0), [#allocation6], 1536   ;;  %p7835_p9 = pmov %p7834_p0 }
 0x26a   : > { %p7836_p10 = pmov %p7834_p0 }
 0x26b   : > { %6405 = vsyncadd (%p7835_p9), [#allocation6], 4294965760 }
 0x26c   : > { %6407 = dma.done.wait (%p7836_p10), [#allocation9], 144   ;;  %p7837_p12 = pmov %p7834_p0 }
 0x26d   : > { %p7838_p1 = pmov %p7834_p0 }
 0x26e   : > { %6409 = vsyncadd (%p7837_p12), [#allocation9], 4294967152 }
 0x26f   : > { %6411 = dma.done.wait (%p7838_p1), [#allocation12], 144   ;;  %p7839_p2 = pmov %p7834_p0 }
 0x270   : > { %p7840_p3 = pmov %p7834_p0 }
 0x271   : > { %6413 = vsyncadd (%p7839_p2), [#allocation12], 4294967152 }
 0x272   : > { %6415 = dma.done.wait (%p7840_p3), [#allocation15], 4128   ;;  %p7841_p4 = pmov %p7834_p0 }
 0x273   : > { %p7842_p7 = pmov %p7834_p0 }
 0x274   : > { %6417 = vsyncadd (%p7841_p4), [#allocation15], 4294963168 }
 0x275   : > { %6419 = dma.done.wait (%p7842_p7), [#allocation18], 64   ;;  %p7843_p8 = pmov %p7834_p0 }
 0x276   : > { %p7844_p11 = pmov %p7834_p0 }
 0x277   : > { %6421 = vsyncadd (%p7843_p8), [#allocation18], 4294967232 }
 0x278   : > { %6423 = dma.done.wait (%p7844_p11), [#allocation21], 8192   ;;  %p7845_p13 = pmov %p7834_p0 }
 0x279   : > { %p7846_p6 = pmov %p7834_p0 }
 0x27a   : > { %6425 = vsyncadd (%p7845_p13), [#allocation21], 4294959104 }
 0x27b   : > { %6427 = dma.done.wait (%p7846_p6), [#allocation24], 32   ;;  %p7847_p5 = pmov %p7834_p0 }
 0x27d   : > { %6429 = vsyncadd (%p7847_p5), [#allocation24], 4294967264 }
 0x27e   : > { %6431 = dma.done.wait (%p7834_p0), [#allocation27], 1040   ;;  %p7848_p9 = pmov %p7834_p0 }
 0x27f   : > { %p7849_p10 = pmov %p7834_p0 }
 0x280   : > { %6433 = vsyncadd (%p7848_p9), [#allocation27], 4294966256 }
 0x281   : > { %6435 = dma.done.wait (%p7849_p10), [#allocation30], 32   ;;  %p7850_p12 = pmov %p7834_p0 }
 0x282   : > { %p7851_p1 = pmov %p7834_p0 }
 0x283   : > { %6437 = vsyncadd (%p7850_p12), [#allocation30], 4294967264 }
 0x284   : > { %6439 = dma.done.wait (%p7851_p1), [#allocation33], 32   ;;  %p7852_p2 = pmov %p7834_p0 }
 0x285   : > { %s7853_s11 = sld [smem:[#allocation50_spill]]  ;;  %s7854_s1 = sld [smem:[#allocation49_spill]]  ;;  %v6529_v0 = vmov 0   ;;  %v6530_v1 = vmov 0.0   ;;  %vm6531_vm0 = vmmov 0   ;;  %vm1667_vm1 = vcmask 1045504  }
 0x286   : > { %6441 = vsyncadd (%p7852_p2), [#allocation33], 4294967264  ;;  %p1559_p3 = scmp.lt.s32.totalorder %s6781_s22, 1  ;;  %5719 = vset.pattern.permute.xlu0 %v6529_v0  ;;  %4625 = vmatprep.subr.mxu1 %v6530_v1  ;;  %s7855_s23 = sld [smem:[#allocation48_spill]]  ;;  %vm1663_vm2 = vcmask 48128   ;;  %v1572_v5 = vld [vmem:[#allocation8] sm:$0xff] }
 0x287   : > { %4627 = vmatprep.mubr.msk.f32.mxu1 %vm6531_vm0, %v6530_v1  ;;  %4620 = vmatprep.subr.mxu0 %v6530_v1  ;;  %v1655_v3 = vld [vmem:[#allocation11] sm:$0x3f]  ;;  %vm1580_vm3 = vcmask 64512   ;;  %v1869_v6 = vld [vmem:[#allocation14 + $0x8] sm:$0xff]  ;;  %v1868_v10 = vld [vmem:[#allocation14] sm:$0xff]  ;;  %s7856_s18 = sld [smem:[#allocation53_spill]] }
 0x288   : > { %s1560_s5 = scalar_select %p1559_p3, %s6781_s22, 1  ;;  %4622 = vmatprep.mubr.msk.f32.mxu0 %vm6531_vm0, %v6530_v1  ;;  %4626 = vmatpush3.msk.msra.mxu1 %vm1667_vm1, %v1655_v3  ;;  %v1871_v7 = vld [vmem:[#allocation14 + $0x18] sm:$0xff]  ;;  %v1870_v11 = vld [vmem:[#allocation14 + $0x10] sm:$0xff]  ;;  %v1873_v13 = vld [vmem:[#allocation14 + $0x28] sm:$0xff] }
 0x289   : > { %4621 = vmatpush3.msra.mxu0 %v1572_v5  ;;  %v4969_v9 = vpack.c.bf16 %v1871_v7, %v1869_v6  ;;  %v4971_v12 = vpack.c.bf16 %v1870_v11, %v1868_v10  ;;  %v1875_v14 = vld [vmem:[#allocation14 + $0x38] sm:$0xff]  ;;  %v1872_v15 = vld [vmem:[#allocation14 + $0x20] sm:$0xff]  ;;  %v1874_v17 = vld [vmem:[#allocation14 + $0x30] sm:$0xff]  ;;  %s7875_s8 = sld [smem:[#allocation78_spill]]  ;;  %p7876_p7 = scmp.ne.s32.totalorder %s7812_s7, 0 }
 0x28a   : > { %s4367_s0 = sshll.u32 %s1560_s5, 3  ;;  %v4973_v16 = vpack.c.bf16 %v1875_v14, %v1873_v13  ;;  %v1877_v18 = vld [vmem:[#allocation14 + $0x48] sm:$0xff]  ;;  %v1879_v19 = vld [vmem:[#allocation14 + $0x58] sm:$0xff]  ;;  %v4975_v20 = vpack.c.bf16 %v1874_v17, %v1872_v15  ;;  %v1876_v22 = vld [vmem:[#allocation14 + $0x40] sm:$0xff]  ;;  %s7860_s5 = sld [smem:[#allocation60_spill]] }
 0x28b   : > { %s1570_s15 = scalar_lea.vmem %s7853_s11, %s4367_s0  ;;  %s1566_s6 = scalar_lea.vmem %s7854_s1, %s4367_s0  ;;  %4970 = vmatprep.subr.bf16.mxu0 %v4969_v9  ;;  %v4977_v21 = vpack.c.bf16 %v1879_v19, %v1877_v18  ;;  %v1878_v23 = vld [vmem:[#allocation14 + $0x50] sm:$0xff]  ;;  %v1881_v24 = vld [vmem:[#allocation14 + $0x68] sm:$0xff]  ;;  %v1883_v25 = vld [vmem:[#allocation14 + $0x78] sm:$0xff] }
 0x28c   : > { %v1741_v2 = vld [vmem:[%s1570_s15] sm:$0xff]  ;;  %s1562_s4 = scalar_lea.vmem %s7855_s23, %s4367_s0  ;;  %v4979_v26 = vpack.c.bf16 %v1878_v23, %v1876_v22  ;;  %v4981_v27 = vpack.c.bf16 %v1883_v25, %v1881_v24  ;;  %v1880_v28 = vld [vmem:[#allocation14 + $0x60] sm:$0xff]  ;;  %v1887_v31 = vld [vmem:[#allocation14 + $0x98] sm:$0xff]  ;;  %s7858_s1 = sld [smem:[#allocation51_spill]] }
 0x28d   : > { %v1654_v4 = vld [vmem:[%s1566_s6] sm:$0xff]  ;;  %1745 = vperm.xlu0 %5719, %v1741_v2   ;;  %v1884_v34 = vld [vmem:[#allocation14 + $0x80] sm:$0xff]  ;;  %v1891_v37 = vld [vmem:[#allocation14 + $0xb8] sm:$0xff]  ;;  %s7857_s11 = smov %s7856_s18  ;;  %s7859_s23 = sld [smem:[#allocation52_spill]] }
 0x28e   : > { %4628 = vmatmul.mubr.msk.f32.vlgmr.msra.gmra.mrb[0].mxu1 %vm1663_vm2, %v1654_v4  ;;  %v1571_v8 = vld [vmem:[%s1562_s4] sm:$0xff]  ;;  %v1888_v40 = vld [vmem:[#allocation14 + $0xa0] sm:$0xff]  ;;  %v1895_v43 = vld [vmem:[#allocation14 + $0xd8] sm:$0xff]  ;;  %s7861_s0 = sld [smem:[#allocation65_spill]]  ;;  %s7863_s15 = sld [smem:[#allocation63_spill]]  ;;  %vm2760_vm2 = vcmask 523264  }
 0x28f   : > { %4623 = vmatmul.mubr.msk.f32.vlgmr.msra.gmra.mrb[0].mxu0 %vm1580_vm3, %v1571_v8  ;;  %v1882_v29 = vld [vmem:[#allocation14 + $0x70] sm:$0xff]  ;;  %v1885_v30 = vld [vmem:[#allocation14 + $0x88] sm:$0xff]  ;;  %v1892_v46 = vld [vmem:[#allocation14 + $0xc0] sm:$0xff]  ;;  %s7864_s4 = sld [smem:[#allocation64_spill]]  ;;  %vm3383_vm3 = vcmask 261120  }
 0x290   : > { %1976 = vmatprep.mubr.f32.mxu0 %v6530_v1  ;;  %4972 = vmatpush1.bf16.msra.mxu0 %v4971_v12  ;;  %v4983_v32 = vpack.c.bf16 %v1882_v29, %v1880_v28  ;;  %v4985_v33 = vpack.c.bf16 %v1887_v31, %v1885_v30  ;;  %v1886_v35 = vld [vmem:[#allocation14 + $0x90] sm:$0xff]  ;;  %v1889_v36 = vld [vmem:[#allocation14 + $0xa8] sm:$0xff]  ;;  %v1899_v50 = vld [vmem:[#allocation14 + $0xf8] sm:$0xff] }
 0x291   : > { %4974 = vmatprep.subr.bf16.mxu0 %v4973_v16  ;;  %v4987_v38 = vpack.c.bf16 %v1886_v35, %v1884_v34  ;;  %v4989_v39 = vpack.c.bf16 %v1891_v37, %v1889_v36  ;;  %v1890_v41 = vld [vmem:[#allocation14 + $0xb0] sm:$0xff]  ;;  %v1893_v42 = vld [vmem:[#allocation14 + $0xc8] sm:$0xff]  ;;  %v1896_v52 = vld [vmem:[#allocation14 + $0xe0] sm:$0xff] }
 0x292   : > { %v4991_v44 = vpack.c.bf16 %v1890_v41, %v1888_v40  ;;  %v4993_v45 = vpack.c.bf16 %v1895_v43, %v1893_v42  ;;  %v1894_v47 = vld [vmem:[#allocation14 + $0xd0] sm:$0xff]  ;;  %v1897_v49 = vld [vmem:[#allocation14 + $0xe8] sm:$0xff]  ;;  %v1985_v59 = vld [vmem:[%s7857_s11 + $0x10] sm:$0xff] }
 0x293   : > { %v4995_v48 = vpack.c.bf16 %v1894_v47, %v1892_v46  ;;  %v4997_v51 = vpack.c.bf16 %v1899_v50, %v1897_v49  ;;  %v1898_v53 = vld [vmem:[#allocation14 + $0xf0] sm:$0xff]  ;;  %v1986_v56 = vld [vmem:[%s7857_s11 + $0x18] sm:$0xff]  ;;  %v1989_v2 = vld [vmem:[%s7857_s11 + $0x30] sm:$0xff] }
 0x294   : > { %4976 = vmatpush1.bf16.msra.mxu0 %v4975_v20  ;;  %v4999_v54 = vpack.c.bf16 %v1898_v53, %v1896_v52  ;;  %v1984_v55 = vld [vmem:[%s7856_s18 + $0x8] sm:$0xff]  ;;  %v1983_v57 = vld [vmem:[%s7857_s11] sm:$0xff]  ;;  %v1990_v61 = vld [vmem:[%s7857_s11 + $0x38] sm:$0xff]  ;;  %s7862_s6 = smov %s7861_s0  ;;  %s7865_s18 = sld [smem:[#allocation62_spill]] }
 0x295   : > { %4978 = vmatprep.subr.bf16.mxu0 %v4977_v21  ;;  %v5001_v58 = vpack.c.bf16 %v1986_v56, %v1984_v55  ;;  %v1988_v60 = vld [vmem:[%s7857_s11 + $0x28] sm:$0xff]  ;;  %v7196_v62 = vpack.c.bf16 %v1985_v59, %v1983_v57  ;;  %v1987_v0 = vld [vmem:[%s7857_s11 + $0x20] sm:$0xff]  ;;  %v1994_v5 = vld [vmem:[%s7857_s11 + $0x58] sm:$0xff] }
 0x296   : > { %v7198_v63 = vpack.c.bf16 %v1990_v61, %v1988_v60  ;;  %v7203_v3 = vpack.c.bf16 %v1989_v2, %v1987_v0  ;;  %v1992_v4 = vld [vmem:[%s7857_s11 + $0x48] sm:$0xff]  ;;  %v1991_v6 = vld [vmem:[%s7857_s11 + $0x40] sm:$0xff]  ;;  %v1993_v8 = vld [vmem:[%s7857_s11 + $0x50] sm:$0xff] }
 0x297   : > { %5002 = vmatprep.subr.bf16.mxu1 %v5001_v58  ;;  %v7209_v7 = vpack.c.bf16 %v1994_v5, %v1992_v4  ;;  %v7213_v9 = vpack.c.bf16 %v1993_v8, %v1991_v6  ;;  %v1996_v10 = vld [vmem:[%s7857_s11 + $0x68] sm:$0xff]  ;;  %v1998_v11 = vld [vmem:[%s7857_s11 + $0x78] sm:$0xff]  ;;  %v1995_v12 = vld [vmem:[%s7857_s11 + $0x60] sm:$0xff] }
 0x298   : > { %4980 = vmatpush1.bf16.msra.mxu0 %v4979_v26  ;;  %5004 = vmatpush1.bf16.msra.mxu1 %v7196_v62  ;;  %v7219_v13 = vpack.c.bf16 %v1998_v11, %v1996_v10  ;;  %v1997_v14 = vld [vmem:[%s7857_s11 + $0x70] sm:$0xff]  ;;  %v2000_v16 = vld [vmem:[%s7857_s11 + $0x88] sm:$0xff]  ;;  %v2002_v17 = vld [vmem:[%s7857_s11 + $0x98] sm:$0xff] }
 0x299   : > { %4982 = vmatprep.subr.bf16.mxu0 %v4981_v27  ;;  %5006 = vmatprep.subr.bf16.mxu1 %v7198_v63  ;;  %v7223_v15 = vpack.c.bf16 %v1997_v14, %v1995_v12  ;;  %v1999_v18 = vld [vmem:[%s7857_s11 + $0x80] sm:$0xff]  ;;  %v7229_v19 = vpack.c.bf16 %v2002_v17, %v2000_v16  ;;  %v2001_v20 = vld [vmem:[%s7857_s11 + $0x90] sm:$0xff]  ;;  %v2004_v22 = vld [vmem:[%s7857_s11 + $0xa8] sm:$0xff] }
 0x29a   : > { %v7233_v21 = vpack.c.bf16 %v2001_v20, %v1999_v18  ;;  %v2006_v23 = vld [vmem:[%s7857_s11 + $0xb8] sm:$0xff]  ;;  %v2003_v24 = vld [vmem:[%s7857_s11 + $0xa0] sm:$0xff]  ;;  %v2005_v26 = vld [vmem:[%s7857_s11 + $0xb0] sm:$0xff] }
 0x29b   : > { %v7239_v25 = vpack.c.bf16 %v2006_v23, %v2004_v22  ;;  %v7243_v27 = vpack.c.bf16 %v2005_v26, %v2003_v24  ;;  %v2008_v28 = vld [vmem:[%s7857_s11 + $0xc8] sm:$0xff]  ;;  %v2010_v29 = vld [vmem:[%s7857_s11 + $0xd8] sm:$0xff]  ;;  %v2007_v30 = vld [vmem:[%s7857_s11 + $0xc0] sm:$0xff] }
 0x29c   : > { %4984 = vmatpush1.bf16.msra.mxu0 %v4983_v32  ;;  %5008 = vmatpush1.bf16.msra.mxu1 %v7203_v3  ;;  %v7249_v31 = vpack.c.bf16 %v2010_v29, %v2008_v28  ;;  %v2009_v32 = vld [vmem:[%s7857_s11 + $0xd0] sm:$0xff]  ;;  %v2012_v34 = vld [vmem:[%s7857_s11 + $0xe8] sm:$0xff]  ;;  %v2014_v35 = vld [vmem:[%s7857_s11 + $0xf8] sm:$0xff] }
 0x29d   : > { %4986 = vmatprep.subr.bf16.mxu0 %v4985_v33  ;;  %5010 = vmatprep.subr.bf16.mxu1 %v7209_v7  ;;  %v7253_v33 = vpack.c.bf16 %v2009_v32, %v2007_v30  ;;  %v2011_v36 = vld [vmem:[%s7857_s11 + $0xe0] sm:$0xff]  ;;  %v7259_v37 = vpack.c.bf16 %v2014_v35, %v2012_v34  ;;  %v2016_v40 = vld [vmem:[%s7857_s11 + $0x108] sm:$0xff]  ;;  %v2018_v41 = vld [vmem:[%s7857_s11 + $0x118] sm:$0xff] }
 0x29e   : > { %v2015_v42 = vld [vmem:[%s7857_s11 + $0x100] sm:$0xff]  ;;  %v7269_v43 = vpack.c.bf16 %v2018_v41, %v2016_v40  ;;  %v2020_v46 = vld [vmem:[%s7857_s11 + $0x128] sm:$0xff]  ;;  %v2022_v47 = vld [vmem:[%s7857_s11 + $0x138] sm:$0xff] }
 0x29f   : > { %v7279_v49 = vpack.c.bf16 %v2022_v47, %v2020_v46  ;;  %v2021_v50 = vld [vmem:[%s7857_s11 + $0x130] sm:$0xff]  ;;  %v2024_v53 = vld [vmem:[%s7857_s11 + $0x148] sm:$0xff]  ;;  %v2023_v55 = vld [vmem:[%s7857_s11 + $0x140] sm:$0xff] }
 0x2a0   : > { %4988 = vmatpush1.bf16.msra.mxu0 %v4987_v38  ;;  %5012 = vmatpush1.bf16.msra.mxu1 %v7213_v9  ;;  %v2013_v38 = vld [vmem:[%s7857_s11 + $0xf0] sm:$0xff]  ;;  %v4376_v56 = vld [vmem:[#allocation2] ss:$0 sm:$0xff]  ;;  %v2028_v2 = vld [vmem:[%s7857_s11 + $0x168] sm:$0xff] }
 0x2a1   : > { %4990 = vmatprep.subr.bf16.mxu0 %v4989_v39  ;;  %5014 = vmatprep.subr.bf16.mxu1 %v7219_v13  ;;  %v7263_v39 = vpack.c.bf16 %v2013_v38, %v2011_v36  ;;  %v2025_v59 = vld [vmem:[%s7857_s11 + $0x150] sm:$0xff]  ;;  %v2030_v4 = vld [vmem:[%s7857_s11 + $0x178] sm:$0xff]  ;;  %v2027_v5 = vld [vmem:[%s7857_s11 + $0x160] sm:$0xff] }
 0x2a2   : > { %v7294_v61 = vpack.c.bf16 %v2025_v59, %v2023_v55  ;;  %v7302_v6 = vpack.c.bf16 %v2030_v4, %v2028_v2  ;;  %v2029_v8 = vld [vmem:[%s7857_s11 + $0x170] sm:$0xff]  ;;  %v2032_v14 = vld [vmem:[%s7857_s11 + $0x188] sm:$0xff]  ;;  %v2034_v17 = vld [vmem:[%s7857_s11 + $0x198] sm:$0xff]  ;;  %v6534_v55 = vmov 683565275  }
 0x2a3   : > { %v7307_v11 = vpack.c.bf16 %v2029_v8, %v2027_v5  ;;  %v2031_v18 = vld [vmem:[%s7857_s11 + $0x180] sm:$0xff]  ;;  %v2033_v20 = vld [vmem:[%s7857_s11 + $0x190] sm:$0xff]  ;;  %v7315_v23 = vpack.c.bf16 %v2034_v17, %v2032_v14  ;;  %v2036_v28 = vld [vmem:[%s7857_s11 + $0x1a8] sm:$0xff] }
 0x2a4   : > { %4992 = vmatpush1.bf16.msra.mxu0 %v4991_v44  ;;  %5016 = vmatpush1.bf16.msra.mxu1 %v7223_v15  ;;  %v2017_v44 = vld [vmem:[%s7857_s11 + $0x110] sm:$0xff]  ;;  %v7318_v24 = vpack.c.bf16 %v2033_v20, %v2031_v18  ;;  %v2038_v29 = vld [vmem:[%s7857_s11 + $0x1b8] sm:$0xff]  ;;  %v2035_v30 = vld [vmem:[%s7857_s11 + $0x1a0] sm:$0xff] }
 0x2a5   : > { %4994 = vmatprep.subr.bf16.mxu0 %v4993_v45  ;;  %5018 = vmatprep.subr.bf16.mxu1 %v7229_v19  ;;  %v7273_v45 = vpack.c.bf16 %v2017_v44, %v2015_v42  ;;  %v7326_v34 = vpack.c.bf16 %v2038_v29, %v2036_v28  ;;  %v2037_v35 = vld [vmem:[%s7857_s11 + $0x1b0] sm:$0xff]  ;;  %v2040_v41 = vld [vmem:[%s7857_s11 + $0x1c8] sm:$0xff]  ;;  %v2042_v42 = vld [vmem:[%s7857_s11 + $0x1d8] sm:$0xff] }
 0x2a6   : > { %v7330_v38 = vpack.c.bf16 %v2037_v35, %v2035_v30  ;;  %v7335_v46 = vpack.c.bf16 %v2042_v42, %v2040_v41  ;;  %v2039_v4 = vld [vmem:[%s7857_s11 + $0x1c0] sm:$0xff]  ;;  %v2041_v5 = vld [vmem:[%s7857_s11 + $0x1d0] sm:$0xff] }
 0x2a7   : > { %v7341_v30 = vpack.c.bf16 %v2041_v5, %v2039_v4 }
 0x2a8   : > { %4996 = vmatpush1.bf16.msra.mxu0 %v4995_v48  ;;  %5020 = vmatpush1.bf16.msra.mxu1 %v7233_v21  ;;  %v2019_v48 = vld [vmem:[%s7857_s11 + $0x120] sm:$0xff] }
 0x2a9   : > { %4998 = vmatprep.subr.bf16.mxu0 %v4997_v51  ;;  %5022 = vmatprep.subr.bf16.mxu1 %v7239_v25  ;;  %v4375_v51 = vld [vmem:[%s7858_s1] ss:$0 sm:$0xff]  ;;  %v7284_v52 = vpack.c.bf16 %v2021_v50, %v2019_v48  ;;  %v6532_v48 = vmov 2102212464   ;;  %s7866_s1 = sld [smem:[#allocation66_spill]] }
 0x2ac   : > { %5000 = vmatpush1.bf16.msra.mxu0 %v4999_v54  ;;  %5024 = vmatpush1.bf16.msra.mxu1 %v7243_v27  ;;  %v2026_v54 = vld [vmem:[%s7857_s11 + $0x158] sm:$0xff] }
 0x2ad   : > { %5066 = vmatprep.subr.bf16.mxu0 %v5001_v58  ;;  %5026 = vmatprep.subr.bf16.mxu1 %v7249_v31  ;;  %v7290_v58 = vpack.c.bf16 %v2026_v54, %v2024_v53 }
 0x2b0   : > { %5028 = vmatpush1.bf16.msra.mxu1 %v7253_v33 }
 0x2b1   : > { %5030 = vmatprep.subr.bf16.mxu1 %v7259_v37 }
 0x2b4   : > { %5032 = vmatpush1.bf16.msra.mxu1 %v7263_v39 }
 0x2b5   : > { %5034 = vmatprep.subr.bf16.mxu1 %v7269_v43 }
 0x2b8   : > { %5036 = vmatpush1.bf16.msra.mxu1 %v7273_v45 }
 0x2b9   : > { %5038 = vmatprep.subr.bf16.mxu1 %v7279_v49 }
 0x2bc   : > { %5040 = vmatpush1.bf16.msra.mxu1 %v7284_v52 }
 0x2bd   : > { %5042 = vmatprep.subr.bf16.mxu1 %v7290_v58 }
 0x2c0   : > { %5044 = vmatpush1.bf16.msra.mxu1 %v7294_v61 }
 0x2c1   : > { %5046 = vmatprep.subr.bf16.mxu1 %v7302_v6 }
 0x2c4   : > { %5048 = vmatpush1.bf16.msra.mxu1 %v7307_v11 }
 0x2c5   : > { %5050 = vmatprep.subr.bf16.mxu1 %v7315_v23 }
 0x2c8   : > { %5052 = vmatpush1.bf16.msra.mxu1 %v7318_v24 }
 0x2c9   : > { %5054 = vmatprep.subr.bf16.mxu1 %v7326_v34 }
 0x2cc   : > { %5056 = vmatpush1.bf16.msra.mxu1 %v7330_v38 }
 0x2cd   : > { %5058 = vmatprep.subr.bf16.mxu1 %v7335_v46 }
 0x2d0   : > { %5060 = vmatpush1.bf16.msra.mxu1 %v7341_v30 }
 0x30c   : > { %v1746_v57 = vpop.permute.xlu0 %1745 }
 0x30d   : > { %v1754_v60 = vmul.f32 %v4375_v51, %v1746_v57  ;;  %v6533_v51 = vmov 920167782   ;;  %v6535_v57 = vmov 2475754826  }
 0x30f   : > { %v7296_v0 = vadd.f32 %v4376_v56, %v1754_v60  ;;  %v6536_v60 = vmov 2131351028  }
 0x311   : > { %v1766_v10 = vand.u32 2139095040, %v7296_v0  ;;  %v1763_v16 = vand.u32 2147483647, %v7296_v0  ;;  %vm1765_vm11 = vcmp.lt.s32.totalorder %v7296_v0, 0  ;;  %vm1855_vm1 = vweird.f32 %v7296_v0 }
 0x313   : > { %v1767_v12 = vshrl.u32 %v1766_v10, 23  ;;  %v1770_v32 = vand.u32 8388607, %v1763_v16  ;;  %v6537_v10 = vmov 1326507024  }
 0x314   : > { %vm1764_vm12 = vcmp.le.f32.partialorder %v1763_v16, 0.7853982 }
 0x315   : > { %v4377_v22 = vadd.s32 4294967169, %v1767_v12  ;;  %v1771_v44 = vor.u32 8388608, %v1770_v32 }
 0x317   : > { %v1773_v26 = vadd.s32 1, %v4377_v22  ;;  %v1811_v22 = vshll.u32 %v1771_v44, 8 }
 0x319   : > { %vm1774_vm4 = vcmp.gt.s32.totalorder %v1773_v26, 0 }
 0x31a   : > { %v1775_v36 = vsel %vm1774_vm4, %v1773_v26, 0 }
 0x31b   : > { %v1777_v40 = vand.u32 31, %v1775_v36  ;;  %v1776_v54 = vshrl.u32 %v1775_v36, 5 }
 0x31d   : > { %v1778_v47 = vsub.s32 32, %v1777_v40  ;;  %v1789_v50 = vshll.u32 %v6532_v48, %v1777_v40  ;;  %v1792_v53 = vshll.u32 %v6533_v51, %v1777_v40  ;;  %v1780_v56 = vshll.u32 %v6534_v55, %v1777_v40 }
 0x31e   : > { %v1783_v59 = vshll.u32 %v6535_v57, %v1777_v40  ;;  %v1786_v2 = vshll.u32 %v6536_v60, %v1777_v40  ;;  %vm1798_vm5 = vcmp.lt.s32.totalorder %v1776_v54, 4  ;;  %vm1795_vm6 = vcmp.lt.s32.totalorder %v1776_v54, 1 }
 0x31f   : > { %v1790_v8 = vshrl.u32 %v6533_v51, %v1778_v47  ;;  %v1793_v12 = vshrl.u32 %v6537_v10, %v1778_v47  ;;  %v1781_v14 = vshrl.u32 %v6535_v57, %v1778_v47  ;;  %v1779_v17 = vshrl.u32 %v6534_v55, %v1778_v47 }
 0x320   : > { %v1784_v18 = vshrl.u32 %v6536_v60, %v1778_v47  ;;  %v1787_v20 = vshrl.u32 %v6532_v48, %v1778_v47  ;;  %vm1796_vm7 = vcmp.lt.s32.totalorder %v1776_v54, 2  ;;  %vm1797_vm8 = vcmp.lt.s32.totalorder %v1776_v54, 3 }
 0x321   : > { %v1791_v26 = vor.u32 %v1790_v8, %v1789_v50  ;;  %v1794_v28 = vor.u32 %v1793_v12, %v1792_v53  ;;  %v1782_v29 = vor.u32 %v1781_v14, %v1780_v56 }
 0x322   : > { %v1785_v32 = vor.u32 %v1784_v18, %v1783_v59  ;;  %v1788_v35 = vor.u32 %v1787_v20, %v1786_v2 }
 0x323   : > { %v1804_v36 = vsel %vm1798_vm5, %v1791_v26, 920167782  ;;  %v1808_v40 = vsel %vm1798_vm5, %v1794_v28, 1326507024  ;;  %v1799_v44 = vsel %vm1795_vm6, %v1779_v17, %v1782_v29 }
 0x324   : > { %v1800_v41 = vsel %vm1798_vm5, %v1788_v35, 2102212464  ;;  %v1803_v42 = vsel %vm1795_vm6, %v1782_v29, %v1785_v32  ;;  %v1805_v51 = vsel %vm1797_vm8, %v1788_v35, %v1804_v36  ;;  %v1807_v47 = vsel %vm1795_vm6, %v1785_v32, %v1788_v35 }
 0x325   : > { %v1801_v48 = vsel %vm1797_vm8, %v1785_v32, %v1800_v41  ;;  %v1806_v50 = vsel %vm1796_vm7, %v1803_v42, %v1805_v51  ;;  %v1809_v53 = vsel %vm1797_vm8, %v1791_v26, %v1808_v40 }
 0x326   : > { %v1810_v55 = vsel %vm1796_vm7, %v1807_v47, %v1809_v53  ;;  %v7344_v56 = vmul.u32.u64.low %v1811_v22, %v1806_v50  ;;  %v7345_v57 = vmul.u32.u64.high %v1811_v22, %v1806_v50, %v7344_v56  ;;  %v1802_v2 = vsel %vm1796_vm7, %v1799_v44, %v1801_v48 }
 0x327   : > { %v7347_v59 = vmul.u32.u64.low %v1811_v22, %v1810_v55  ;;  %v7348_v60 = vmul.u32.u64.high %v1811_v22, %v1810_v55, %v7347_v59  ;;  %v1818_v4 = vmul.u32 %v1811_v22, %v1802_v2 }
 0x328   : > { %v1821_v54 = vadd.s32 1, %v7345_v57 }
 0x329   : > { %vm1820_vm9 = vc.u32 %v7348_v60, %v7344_v56  ;;  %v1819_v32 = vadd.s32 %v7344_v56, %v7348_v60 }
 0x32a   : > { %v1822_v5 = vsel %vm1820_vm9, %v1821_v54, %v7345_v57 }
 0x32b   : > { %v1823_v8 = vadd.s32 %v1822_v5, %v1818_v4 }
 0x32d   : > { %v1824_v10 = vadd.s32 536870912, %v1823_v8 }
 0x32f   : > { %v1825_v12 = vshrl.u32 %v1824_v10, 30 }
 0x331   : > { %v1826_v14 = vshll.u32 %v1825_v12, 30  ;;  %v1849_v53 = vsub.s32 4, %v1825_v12 }
 0x333   : > { %v1827_v17 = vsub.s32 %v1823_v8, %v1826_v14  ;;  %v1850_v56 = vsel %vm1765_vm11, %v1849_v53, %v1825_v12  ;;  %v2253_v53 = vld [vmem:[#allocation20 + $0x30] sm:$0xff] }
 0x334   : > { %v1852_v60 = vsel %vm1764_vm12, 0, %v1850_v56  ;;  %v2272_v56 = vld [vmem:[#allocation20 + $0xc8] sm:$0xff] }
 0x335   : > { %v1829_v18 = vsub.s32 0, %v1827_v17  ;;  %v1856_v2 = vadd.s32 3, %v1852_v60 }
 0x337   : > { %v4378_v20 = vmin.u32 %v1829_v18, %v1827_v17  ;;  %v1857_v54 = vand.u32 3, %v1856_v2  ;;  %v2255_v2 = vld [vmem:[#allocation20 + $0x40] sm:$0xff] }
 0x339   : > { %v1831_v26 = vclz %v4378_v20  ;;  %vm1862_vm13 = vcmp.eq.s32.totalorder %v1857_v54, 2  ;;  %vm1859_vm14 = vcmp.eq.s32.totalorder %v1857_v54, 0  ;;  %vm1858_vm15 = vcmp.lt.s32.totalorder %v1857_v54, 2  ;;  %v2256_v54 = vld [vmem:[#allocation20 + $0x48] sm:$0xff] }
 0x33b   : > { %v4379_v28 = vadd.s32 4294967294, %v1831_v26 }
 0x33d   : > { %vm4380_vm10 = vcmp.lt.s32.totalorder %v4379_v28, 0 }
 0x33e   : > { %v1834_v29 = vsel %vm4380_vm10, 0, %v4379_v28 }
 0x33f   : > { %v1835_v35 = vsub.s32 32, %v1834_v29  ;;  %v1839_v36 = vsub.s32 4294967266, %v1834_v29  ;;  %v1836_v22 = vshll.u32 %v1827_v17, %v1834_v29  ;;  %v4372_v17 = vld [vmem:[#allocation13] ss:$0 sm:$0xff] }
 0x341   : > { %v1837_v40 = vshrl.u32 %v1819_v32, %v1835_v35  ;;  %v1840_v41 = vadd.s32 127, %v1839_v36  ;;  %v2249_v32 = vld [vmem:[#allocation20 + $0x10] sm:$0xff]  ;;  %v2250_v35 = vld [vmem:[#allocation20 + $0x18] sm:$0xff]  ;;  %v2267_v36 = vld [vmem:[#allocation20 + $0xa0] sm:$0xff] }
 0x343   : > { %v1838_v42 = vor.u32 %v1837_v40, %v1836_v22  ;;  %v1841_v51 = vshll.u32 %v1840_v41, 23  ;;  %v2268_v22 = vld [vmem:[#allocation20 + $0xa8] sm:$0xff]  ;;  %v5135_v40 = vpack.c.bf16 %v2250_v35, %v2249_v32  ;;  %v2371_v32 = vld [vmem:[#allocation22 + $0x78] sm:$0xff] }
 0x344   : > { %v5137_v41 = vpack.c.bf16 %v2268_v22, %v2267_v36  ;;  %v2368_v22 = vld [vmem:[#allocation22 + $0x60] sm:$0xff] }
 0x345   : > { %v1842_v47 = vor.u32 4788187, %v1841_v51  ;;  %v1845_v48 = vcvt.s32.f32 %v1838_v42  ;;  %v2251_v42 = vld [vmem:[#allocation20 + $0x20] sm:$0xff]  ;;  %v2252_v51 = vld [vmem:[#allocation20 + $0x28] sm:$0xff] }
 0x347   : > { %v1843_v44 = vand.u32 2147483647, %v1842_v47  ;;  %v2269_v47 = vld [vmem:[#allocation20 + $0xb0] sm:$0xff] }
 0x349   : > { %v1846_v50 = vmul.f32 %v1845_v48, %v1843_v44  ;;  %v2270_v44 = vld [vmem:[#allocation20 + $0xb8] sm:$0xff]  ;;  %v5139_v48 = vpack.c.bf16 %v2252_v51, %v2251_v42 }
 0x34a   : > { %v2375_v42 = vld [vmem:[#allocation22 + $0x98] sm:$0xff] }
 0x34b   : > { %v1847_v55 = vxor.u32 2147483648, %v1846_v50 }
 0x34d   : > { %v1848_v57 = vsel %vm1765_vm11, %v1847_v55, %v1846_v50  ;;  %v5141_v50 = vpack.c.bf16 %v2270_v44, %v2269_v47  ;;  %v2254_v55 = vld [vmem:[#allocation20 + $0x38] sm:$0xff]  ;;  %v2372_v44 = vld [vmem:[#allocation22 + $0x80] sm:$0xff] }
 0x34e   : > { %v1851_v59 = vsel %vm1764_vm12, %v7296_v0, %v1848_v57  ;;  %v2271_v57 = vld [vmem:[#allocation20 + $0xc0] sm:$0xff] }
 0x34f   : > { %5720 = vcosq.f32 %v1851_v59  ;;  %v5145_v60 = vpack.c.bf16 %v2272_v56, %v2271_v57  ;;  %v2376_v56 = vld [vmem:[#allocation22 + $0xa0] sm:$0xff] }
 0x350   : > { %5722 = vsinq.f32 %v1851_v59  ;;  %v5143_v59 = vpack.c.bf16 %v2254_v55, %v2253_v53  ;;  %v2379_v53 = vld [vmem:[#allocation22 + $0xb8] sm:$0xff] }
 0x359   : > { %v5721_v4 = vpop.eup %5720 }
 0x35a   : > { %v5723_v5 = vpop.eup %5722  ;;  %v1863_v8 = vxor.u32 2147483648, %v5721_v4 }
 0x35b   : > { %v1860_v10 = vxor.u32 2147483648, %v5723_v5 }
 0x35c   : > { %v1864_v14 = vsel %vm1862_vm13, %v1863_v8, %v5723_v5  ;;  %v2274_v5 = vld [vmem:[#allocation20 + $0xd8] sm:$0xff]  ;;  %v5147_v8 = vpack.c.bf16 %v2256_v54, %v2255_v2 }
 0x35d   : > { %v1861_v18 = vsel %vm1859_vm14, %v5721_v4, %v1860_v10  ;;  %v2273_v4 = vld [vmem:[#allocation20 + $0xd0] sm:$0xff]  ;;  %v2383_v2 = vld [vmem:[#allocation22 + $0xd8] sm:$0xff] }
 0x35e   : > { %v1865_v16 = vsel %vm1858_vm15, %v1861_v18, %v1864_v14  ;;  %v5149_v10 = vpack.c.bf16 %v2274_v5, %v2273_v4  ;;  %v2257_v14 = vld [vmem:[#allocation20 + $0x50] sm:$0xff]  ;;  %v2275_v18 = vld [vmem:[#allocation20 + $0xe0] sm:$0xff] }
 0x35f   : > { %v1866_v28 = vsel %vm1855_vm1, nan, %v1865_v16  ;;  %v2276_v16 = vld [vmem:[#allocation20 + $0xe8] sm:$0xff]  ;;  %v2380_v5 = vld [vmem:[#allocation22 + $0xc0] sm:$0xff] }
 0x361   : > { %v1737_v20 = vpop.f32.mrb[0].mxu1 }
 0x362   : > { %v1738_v12 = vadd.f32 %v4372_v17, %v1737_v20  ;;  %v4629_v26 = vpop.f32.mrb[1].mxu1  ;;  %v7369_v0 = vpop.f32.mrb[0].mxu0  ;;  %v2258_v17 = vld [vmem:[#allocation20 + $0x58] sm:$0xff] }
 0x363   : > { %v5151_v20 = vpack.c.bf16 %v2258_v17, %v2257_v14  ;;  %v2259_v26 = vld [vmem:[#allocation20 + $0x60] sm:$0xff] }
 0x364   : > { %v1867_v29 = vadd.f32 %v1866_v28, %v1738_v12  ;;  %v5153_v12 = vpack.c.bf16 %v2276_v16, %v2275_v18  ;;  %v2260_v28 = vld [vmem:[#allocation20 + $0x68] sm:$0xff] }
 0x366   : > { %1977 = vmatmul.mubr.f32.vlgmr.msra.gmra.mrb[2].mxu0 %v1867_v29  ;;  %v2277_v29 = vld [vmem:[#allocation20 + $0xf0] sm:$0xff] }
 0x367   : > { %5068 = vmatpush1.bf16.msra.mxu0 %v7196_v62  ;;  %v4624_v62 = vpop.f32.mrb[1].mxu0 }
 0x368   : > { %5070 = vmatprep.subr.bf16.mxu0 %v7198_v63  ;;  %v2044_v63 = vld [vmem:[%s7857_s11 + $0x1e8] sm:$0xff]  ;;  %v2278_v62 = vld [vmem:[#allocation20 + $0xf8] sm:$0xff] }
 0x36b   : > { %5072 = vmatpush1.bf16.msra.mxu0 %v7203_v3  ;;  %v2046_v3 = vld [vmem:[%s7857_s11 + $0x1f8] sm:$0xff] }
 0x36c   : > { %5074 = vmatprep.subr.bf16.mxu0 %v7209_v7  ;;  %v5061_v7 = vpack.c.bf16 %v2046_v3, %v2044_v63  ;;  %v5155_v63 = vpack.c.bf16 %v2260_v28, %v2259_v26  ;;  %v5157_v3 = vpack.c.bf16 %v2278_v62, %v2277_v29 }
 0x36e   : > { %5062 = vmatprep.subr.bf16.mxu1 %v5061_v7 }
 0x36f   : > { %5076 = vmatpush1.bf16.msra.mxu0 %v7213_v9  ;;  %v2043_v9 = vld [vmem:[%s7857_s11 + $0x1e0] sm:$0xff] }
 0x370   : > { %5078 = vmatprep.subr.bf16.mxu0 %v7219_v13  ;;  %v2045_v13 = vld [vmem:[%s7857_s11 + $0x1f0] sm:$0xff] }
 0x373   : > { %5080 = vmatpush1.bf16.msra.mxu0 %v7223_v15  ;;  %v5063_v15 = vpack.c.bf16 %v2045_v13, %v2043_v9  ;;  %v2262_v9 = vld [vmem:[#allocation20 + $0x78] sm:$0xff] }
 0x374   : > { %5082 = vmatprep.subr.bf16.mxu0 %v7229_v19  ;;  %v1902_v19 = vlaneseq }
 0x375   : > { %5064 = vmatpush1.bf16.msra.mxu1 %v5063_v15 }
 0x377   : > { %5084 = vmatpush1.bf16.msra.mxu0 %v7233_v21  ;;  %v1903_v21 = vshrl.u32 %v1902_v19, 7  ;;  %v2357_v19 = vld [vmem:[#allocation22 + $0x8] sm:$0xff] }
 0x378   : > { %5086 = vmatprep.subr.bf16.mxu0 %v7239_v25 }
 0x379   : > { %v7394_v25 = vsub.s32 0, %v1903_v21 }
 0x37b   : > { %5088 = vmatpush1.bf16.msra.mxu0 %v7243_v27  ;;  %v1900_v27 = vld [vmem:[#allocation16] sm:$0x3] }
 0x37c   : > { %5090 = vmatprep.subr.bf16.mxu0 %v7249_v31  ;;  %v7396_v31 = vsub.s32 1, %v1903_v21  ;;  %v2359_v21 = vld [vmem:[#allocation22 + $0x18] sm:$0xff] }
 0x37f   : > { %5092 = vmatpush1.bf16.msra.mxu0 %v7253_v33  ;;  %v1905_v33 = vrot.slane %v1900_v27, %v7394_v25 }
 0x380   : > { %5094 = vmatprep.subr.bf16.mxu0 %v7259_v37  ;;  %v1909_v37 = vrot.slane %v1900_v27, %v7396_v31  ;;  %v2356_v27 = vld [vmem:[#allocation22] sm:$0xff] }
 0x383   : > { %5096 = vmatpush1.bf16.msra.mxu0 %v7263_v39 }
 0x384   : > { %5098 = vmatprep.subr.bf16.mxu0 %v7269_v43 }
 0x387   : > { %5100 = vmatpush1.bf16.msra.mxu0 %v7273_v45 }
 0x388   : > { %5102 = vmatprep.subr.bf16.mxu0 %v7279_v49 }
 0x38b   : > { %5104 = vmatpush1.bf16.msra.mxu0 %v7284_v52 }
 0x38c   : > { %5106 = vmatprep.subr.bf16.mxu0 %v7290_v58 }
 0x38f   : > { %5108 = vmatpush1.bf16.msra.mxu0 %v7294_v61  ;;  %v2263_v61 = vld [vmem:[#allocation20 + $0x80] sm:$0xff] }
 0x390   : > { %5110 = vmatprep.subr.bf16.mxu0 %v7302_v6  ;;  %v2264_v6 = vld [vmem:[#allocation20 + $0x88] sm:$0xff] }
 0x393   : > { %5112 = vmatpush1.bf16.msra.mxu0 %v7307_v11  ;;  %v2247_v11 = vld [vmem:[#allocation20] sm:$0xff] }
 0x394   : > { %5114 = vmatprep.subr.bf16.mxu0 %v7315_v23  ;;  %v5129_v23 = vpack.c.bf16 %v2264_v6, %v2263_v61  ;;  %v2360_v61 = vld [vmem:[#allocation22 + $0x20] sm:$0xff]  ;;  %v2362_v6 = vld [vmem:[#allocation22 + $0x30] sm:$0xff] }
 0x396   : > { %5130 = vmatprep.subr.bf16.mxu1 %v5129_v23  ;;  %v2367_v23 = vld [vmem:[#allocation22 + $0x58] sm:$0xff] }
 0x397   : > { %5116 = vmatpush1.bf16.msra.mxu0 %v7318_v24  ;;  %v2248_v24 = vld [vmem:[#allocation20 + $0x8] sm:$0xff] }
 0x398   : > { %5118 = vmatprep.subr.bf16.mxu0 %v7326_v34  ;;  %v2265_v34 = vld [vmem:[#allocation20 + $0x90] sm:$0xff] }
 0x39b   : > { %5120 = vmatpush1.bf16.msra.mxu0 %v7330_v38  ;;  %v2266_v38 = vld [vmem:[#allocation20 + $0x98] sm:$0xff] }
 0x39c   : > { %5122 = vmatprep.subr.bf16.mxu0 %v7335_v46  ;;  %v5131_v46 = vpack.c.bf16 %v2248_v24, %v2247_v11  ;;  %v2365_v11 = vld [vmem:[#allocation22 + $0x48] sm:$0xff]  ;;  %v5167_v24 = vpack.c.bf16 %v2362_v6, %v2360_v61 }
 0x39f   : > { %5124 = vmatpush1.bf16.msra.mxu0 %v7341_v30  ;;  %v5133_v30 = vpack.c.bf16 %v2266_v38, %v2265_v34  ;;  %v5169_v34 = vpack.c.bf16 %v2367_v23, %v2365_v11  ;;  %v2364_v38 = vld [vmem:[#allocation22 + $0x40] sm:$0xff] }
 0x3a0   : > { %5126 = vmatprep.subr.bf16.mxu0 %v5061_v7  ;;  %v2261_v7 = vld [vmem:[#allocation20 + $0x70] sm:$0xff] }
 0x3a1   : > { %v5159_v13 = vpack.c.bf16 %v2262_v9, %v2261_v7  ;;  %v2205_v7 = vld [vmem:[#allocation17] sm:$0x3]  ;;  %v2219_v9 = vld [vmem:[#allocation19] sm:$0x3] }
 0x3a3   : > { %5128 = vmatpush1.bf16.msra.mxu0 %v5063_v15  ;;  %v6538_v15 = vmov 0.0|0.0  }
 0x439   : > { %v1978_v39 = vpop.f32.mrb[2].mxu0 }
 0x43a   : > { %v7400_v43 = vadd.f32 %v1978_v39, %v1905_v33  ;;  %v1980_v45 = vpop.f32.mrb[3].mxu0  ;;  %v5161_v33 = vpack.c.bf16 %v2359_v21, %v2357_v19  ;;  %v2361_v39 = vld [vmem:[#allocation22 + $0x28] sm:$0xff]  ;;  %v2210_v19 = vrot.slane %v2205_v7, %v7394_v25 }
 0x43b   : > { %v7402_v49 = vadd.f32 %v1980_v45, %v1909_v37  ;;  %v2358_v37 = vld [vmem:[#allocation22 + $0x10] sm:$0xff]  ;;  %v2363_v45 = vld [vmem:[#allocation22 + $0x38] sm:$0xff] }
 0x43c   : > { %v2118_v58 = vmul.f32 %v7400_v43, %v7400_v43  ;;  %5162 = vmatprep.subr.bf16.mxu0 %v5161_v33  ;;  %v2214_v33 = vrot.slane %v2205_v7, %v7396_v31 }
 0x43d   : > { %2111 = vmatprep.mubr.f32.mxu1 %v7402_v49  ;;  %v2119_v52 = vmul.f32 %v7402_v49, %v7402_v49 }
 0x43e   : > { %2112 = vmatmul.mubr.f32.vlgmr.msra.gmra.mrb[2].mxu1 %v7400_v43 }
 0x43f   : > { %2184 = vmatprep.mubr.f32.mxu0 %v2119_v52  ;;  %5132 = vmatpush3.bf16.msra.mxu1 %v5131_v46  ;;  %v5163_v52 = vpack.c.bf16 %v2358_v37, %v2356_v27  ;;  %v2366_v46 = vld [vmem:[#allocation22 + $0x50] sm:$0xff] }
 0x440   : > { %2185 = vmatmul.mubr.f32.vlgmr.msra.gmra.mrb[4].mxu0 %v2118_v58  ;;  %5134 = vmatprep.subr.bf16.mxu1 %v5133_v30  ;;  %v5165_v58 = vpack.c.bf16 %v2363_v45, %v2361_v39  ;;  %v2369_v30 = vld [vmem:[#allocation22 + $0x68] sm:$0xff]  ;;  %v5171_v35 = vpack.c.bf16 %v2366_v46, %v2364_v38  ;;  %v2224_v45 = vrot.slane %v2219_v9, %v7394_v25 }
 0x441   : > { %2464 = vmatprep.mubr.f32.mxu0 %v6530_v1  ;;  %5164 = vmatpush1.bf16.msra.mxu0 %v5163_v52  ;;  %v5173_v36 = vpack.c.bf16 %v2371_v32, %v2369_v30  ;;  %v2471_v30 = vld [vmem:[%s7859_s23] sm:$0xff]  ;;  %v2472_v32 = vld [vmem:[%s7859_s23 + $0x8] sm:$0xff] }
 0x442   : > { %5166 = vmatprep.subr.bf16.mxu0 %v5165_v58  ;;  %v2228_v58 = vrot.slane %v2219_v9, %v7396_v31 }
 0x443   : > { %5136 = vmatpush3.bf16.msra.mxu1 %v5135_v40  ;;  %v2370_v40 = vld [vmem:[#allocation22 + $0x70] sm:$0xff] }
 0x444   : > { %5138 = vmatprep.subr.bf16.mxu1 %v5137_v41  ;;  %v2373_v41 = vld [vmem:[#allocation22 + $0x88] sm:$0xff]  ;;  %v5175_v51 = vpack.c.bf16 %v2370_v40, %v2368_v22  ;;  %v5194_v40 = vpack.c.bf16 %v2472_v32, %v2471_v30  ;;  %v2669_v30 = vld [vmem:[%s7862_s6 + $0x58] sm:$0xff] }
 0x445   : > { %5168 = vmatpush1.bf16.msra.mxu0 %v5167_v24  ;;  %v5177_v47 = vpack.c.bf16 %v2375_v42, %v2373_v41  ;;  %v2473_v42 = vld [vmem:[%s7859_s23 + $0x10] sm:$0xff] }
 0x446   : > { %5170 = vmatprep.subr.bf16.mxu0 %v5169_v34 }
 0x447   : > { %5140 = vmatpush3.bf16.msra.mxu1 %v5139_v48  ;;  %v2374_v48 = vld [vmem:[#allocation22 + $0x90] sm:$0xff] }
 0x448   : > { %5142 = vmatprep.subr.bf16.mxu1 %v5141_v50  ;;  %v2377_v50 = vld [vmem:[#allocation22 + $0xa8] sm:$0xff]  ;;  %v5179_v55 = vpack.c.bf16 %v2374_v48, %v2372_v44 }
 0x449   : > { %5172 = vmatpush1.bf16.msra.mxu0 %v5171_v35  ;;  %v5181_v57 = vpack.c.bf16 %v2379_v53, %v2377_v50  ;;  %v2475_v44 = vld [vmem:[%s7859_s23 + $0x20] sm:$0xff]  ;;  %v2476_v48 = vld [vmem:[%s7859_s23 + $0x28] sm:$0xff]  ;;  %v2477_v53 = vld [vmem:[%s7859_s23 + $0x30] sm:$0xff] }
 0x44a   : > { %5174 = vmatprep.subr.bf16.mxu0 %v5173_v36  ;;  %v5200_v50 = vpack.c.bf16 %v2476_v48, %v2475_v44  ;;  %v2754_v48 = vld [vmem:[#allocation7 + $0x10] sm:$0xff] }
 0x44b   : > { %5144 = vmatpush3.bf16.msra.mxu1 %v5143_v59  ;;  %v2378_v59 = vld [vmem:[#allocation22 + $0xb0] sm:$0xff] }
 0x44c   : > { %5146 = vmatprep.subr.bf16.mxu1 %v5145_v60  ;;  %v2381_v60 = vld [vmem:[#allocation22 + $0xc8] sm:$0xff]  ;;  %v5183_v54 = vpack.c.bf16 %v2378_v59, %v2376_v56 }
 0x44d   : > { %5176 = vmatpush1.bf16.msra.mxu0 %v5175_v51  ;;  %v5185_v4 = vpack.c.bf16 %v2383_v2, %v2381_v60  ;;  %v2474_v51 = vld [vmem:[%s7859_s23 + $0x18] sm:$0xff]  ;;  %v2479_v56 = vld [vmem:[%s7859_s23 + $0x40] sm:$0xff]  ;;  %v2480_v59 = vld [vmem:[%s7859_s23 + $0x48] sm:$0xff] }
 0x44e   : > { %5178 = vmatprep.subr.bf16.mxu0 %v5177_v47  ;;  %v5197_v47 = vpack.c.bf16 %v2474_v51, %v2473_v42  ;;  %v5206_v60 = vpack.c.bf16 %v2480_v59, %v2479_v56  ;;  %v2481_v2 = vld [vmem:[%s7859_s23 + $0x50] sm:$0xff]  ;;  %v2752_v51 = vld [vmem:[#allocation7] sm:$0xff] }
 0x44f   : > { %5148 = vmatpush3.bf16.msra.mxu1 %v5147_v8  ;;  %v2382_v8 = vld [vmem:[#allocation22 + $0xd0] sm:$0xff] }
 0x450   : > { %5150 = vmatprep.subr.bf16.mxu1 %v5149_v10  ;;  %v5187_v10 = vpack.c.bf16 %v2382_v8, %v2380_v5  ;;  %v2483_v5 = vld [vmem:[%s7859_s23 + $0x60] sm:$0xff]  ;;  %v2484_v8 = vld [vmem:[%s7859_s23 + $0x68] sm:$0xff] }
 0x451   : > { %5180 = vmatpush1.bf16.msra.mxu0 %v5179_v55  ;;  %v2478_v55 = vld [vmem:[%s7859_s23 + $0x38] sm:$0xff] }
 0x452   : > { %5182 = vmatprep.subr.bf16.mxu0 %v5181_v57  ;;  %v5203_v57 = vpack.c.bf16 %v2478_v55, %v2477_v53  ;;  %v2756_v55 = vld [vmem:[#allocation7 + $0x20] sm:$0xff] }
 0x453   : > { %5152 = vmatpush3.bf16.msra.mxu1 %v5151_v20 }
 0x454   : > { %5154 = vmatprep.subr.bf16.mxu1 %v5153_v12 }
 0x455   : > { %5184 = vmatpush1.bf16.msra.mxu0 %v5183_v54  ;;  %v2482_v54 = vld [vmem:[%s7859_s23 + $0x58] sm:$0xff] }
 0x456   : > { %5186 = vmatprep.subr.bf16.mxu0 %v5185_v4  ;;  %v5209_v4 = vpack.c.bf16 %v2482_v54, %v2481_v2 }
 0x457   : > { %5156 = vmatpush3.bf16.msra.mxu1 %v5155_v63 }
 0x458   : > { %5158 = vmatprep.subr.bf16.mxu1 %v5157_v3 }
 0x459   : > { %5188 = vmatpush1.bf16.msra.mxu0 %v5187_v10  ;;  %v5212_v10 = vpack.c.bf16 %v2484_v8, %v2483_v5 }
 0x45b   : > { %5160 = vmatpush3.bf16.msra.mxu1 %v5159_v13 }
 0x45c   : > { %5193 = vmatprep.subr.bf16.mxu1 %v6538_v15 }
 0x511   : > { %v2113_v14 = vpop.f32.mrb[2].mxu1 }
 0x512   : > { %v2191_v17 = vmul.f32 %v2113_v14, %v2113_v14  ;;  %v2115_v18 = vpop.f32.mrb[3].mxu1  ;;  %v2197_v13 = vsub.f32 %v7400_v43, %v2113_v14  ;;  %v2485_v14 = vld [vmem:[%s7859_s23 + $0x70] sm:$0xff] }
 0x513   : > { %v2192_v16 = vmul.f32 %v2115_v18, %v2115_v18  ;;  %v2186_v20 = vpop.f32.mrb[4].mxu0  ;;  %v2198_v27 = vsub.f32 %v7402_v49, %v2115_v18 }
 0x514   : > { %v2193_v12 = vsub.f32 %v2186_v20, %v2191_v17  ;;  %v2188_v26 = vpop.f32.mrb[5].mxu0  ;;  %v2486_v17 = vld [vmem:[%s7859_s23 + $0x78] sm:$0xff] }
 0x515   : > { %v2194_v28 = vsub.f32 %v2188_v26, %v2192_v16  ;;  %v5215_v18 = vpack.c.bf16 %v2486_v17, %v2485_v14  ;;  %v4370_v16 = vld [vmem:[#allocation10] ss:$0 sm:$0xff]  ;;  %v2387_v26 = vld [vmem:[#allocation22 + $0xf8] sm:$0xff] }
 0x516   : > { %v2195_v29 = vmax.f32 %v2193_v12, 0.0  ;;  %v7444_v20 = vadd.f32 %v4370_v16, %v7369_v0  ;;  %v2385_v12 = vld [vmem:[#allocation22 + $0xe8] sm:$0xff]  ;;  %v4383_v0 = vld [vmem:[%s7860_s5] ss:$0 sm:$0xff]  ;;  %s7867_s5 = sld [smem:[#allocation69_spill]] }
 0x517   : > { %v2196_v62 = vmax.f32 %v2194_v28, 0.0  ;;  %v5189_v28 = vpack.c.bf16 %v2387_v26, %v2385_v12  ;;  %v4385_v12 = vld [vmem:[%s7864_s4] ss:$0 sm:$0xff] }
 0x518   : > { %v2199_v63 = vadd.f32 1e-05, %v2195_v29  ;;  %v2384_v29 = vld [vmem:[#allocation22 + $0xe0] sm:$0xff] }
 0x519   : > { %v2200_v3 = vadd.f32 1e-05, %v2196_v62  ;;  %v2386_v62 = vld [vmem:[#allocation22 + $0xf0] sm:$0xff]  ;;  %5190 = vmatprep.subr.bf16.mxu0 %v5189_v28 }
 0x51a   : > { %5724 = vrsqrt.f32 %v2199_v63  ;;  %v5191_v63 = vpack.c.bf16 %v2386_v62, %v2384_v29 }
 0x51b   : > { %5726 = vrsqrt.f32 %v2200_v3 }
 0x51c   : > { %5192 = vmatpush1.bf16.msra.mxu0 %v5191_v63 }
 0x51d   : > { %5217 = vmatprep.subr.bf16.mxu0 %v6538_v15 }
 0x524   : > { %v5725_v21 = vpop.eup %5724 }
 0x525   : > { %v5727_v37 = vpop.eup %5726  ;;  %v2203_v39 = vmul.f32 %v5725_v21, %v2197_v13 }
 0x526   : > { %v2204_v52 = vmul.f32 %v5727_v37, %v2198_v27  ;;  %v2557_v27 = vmul.f32 %v7444_v20, %v7444_v20  ;;  %v2659_v37 = vld [vmem:[%s7862_s6 + $0x8] sm:$0xff] }
 0x527   : > { %v2217_v61 = vmul.f32 %v2210_v19, %v2203_v39  ;;  %v2660_v39 = vld [vmem:[%s7862_s6 + $0x10] sm:$0xff] }
 0x528   : > { %v2218_v6 = vmul.f32 %v2214_v33, %v2204_v52  ;;  %v2658_v33 = vld [vmem:[%s7861_s0] sm:$0xff]  ;;  %v2661_v52 = vld [vmem:[%s7862_s6 + $0x18] sm:$0xff]  ;;  %s7868_s0 = sld [smem:[#allocation70_spill]] }
 0x529   : > { %v2231_v11 = vadd.f32 %v2224_v45, %v2217_v61  ;;  %v5242_v45 = vpack.c.bf16 %v2659_v37, %v2658_v33  ;;  %v2662_v61 = vld [vmem:[%s7862_s6 + $0x20] sm:$0xff]  ;;  %v2947_v37 = vld [vmem:[%s7867_s5 + $0x8] sm:$0xff] }
 0x52a   : > { %v2232_v43 = vadd.f32 %v2228_v58, %v2218_v6  ;;  %v5245_v58 = vpack.c.bf16 %v2661_v52, %v2660_v39  ;;  %v2663_v6 = vld [vmem:[%s7862_s6 + $0x28] sm:$0xff]  ;;  %v2946_v33 = vld [vmem:[%s7867_s5] sm:$0xff] }
 0x52b   : > { %v4381_v23 = vmul.f32 -1.442695, %v2231_v11 }
 0x52c   : > { %v4382_v24 = vmul.f32 -1.442695, %v2232_v43 }
 0x52d   : > { %5728 = vpow2.f32 %v4381_v23  ;;  %v2665_v23 = vld [vmem:[%s7862_s6 + $0x38] sm:$0xff] }
 0x52e   : > { %5730 = vpow2.f32 %v4382_v24 }
 0x537   : > { %v5729_v49 = vpop.eup %5728 }
 0x538   : > { %v5731_v34 = vpop.eup %5730  ;;  %v2239_v38 = vadd.f32 1.0, %v5729_v49  ;;  %v2666_v49 = vld [vmem:[%s7862_s6 + $0x40] sm:$0xff] }
 0x539   : > { %v2240_v46 = vadd.f32 1.0, %v5731_v34  ;;  %v2667_v34 = vld [vmem:[%s7862_s6 + $0x48] sm:$0xff] }
 0x53a   : > { %5732 = vrcp.f32 %v2239_v38  ;;  %v5254_v38 = vpack.c.bf16 %v2667_v34, %v2666_v49  ;;  %v2951_v49 = vld [vmem:[%s7867_s5 + $0x28] sm:$0xff] }
 0x53b   : > { %5734 = vrcp.f32 %v2240_v46  ;;  %v2668_v46 = vld [vmem:[%s7862_s6 + $0x50] sm:$0xff] }
 0x53c   : > { %v5257_v32 = vpack.c.bf16 %v2669_v30, %v2668_v46  ;;  %v2953_v46 = vld [vmem:[%s7867_s5 + $0x38] sm:$0xff] }
 0x544   : > { %v5733_v35 = vpop.eup %5732 }
 0x545   : > { %v5735_v36 = vpop.eup %5734  ;;  %v2245_v41 = vmul.f32 %v5733_v35, %v2231_v11  ;;  %v5248_v11 = vpack.c.bf16 %v2663_v6, %v2662_v61  ;;  %v2670_v35 = vld [vmem:[%s7862_s6 + $0x60] sm:$0xff]  ;;  %v5290_v61 = vpack.c.bf16 %v2947_v37, %v2946_v33 }
 0x546   : > { %v2246_v22 = vmul.f32 %v5735_v36, %v2232_v43  ;;  %v2664_v43 = vld [vmem:[%s7862_s6 + $0x30] sm:$0xff]  ;;  %v2671_v36 = vld [vmem:[%s7862_s6 + $0x68] sm:$0xff] }
 0x547   : > { %v5251_v24 = vpack.c.bf16 %v2665_v23, %v2664_v43  ;;  %v2949_v43 = vld [vmem:[%s7867_s5 + $0x18] sm:$0xff] }
 0x548   : > { %2350 = vmatprep.mubr.f32.mxu1 %v2246_v22  ;;  %v5260_v22 = vpack.c.bf16 %v2671_v36, %v2670_v35  ;;  %v2955_v35 = vld [vmem:[%s7867_s5 + $0x48] sm:$0xff] }
 0x549   : > { %2351 = vmatmul.mubr.f32.vlgmr.msra.gmra.mrb[4].mxu1 %v2245_v41  ;;  %v2673_v41 = vld [vmem:[%s7862_s6 + $0x78] sm:$0xff] }
 0x54a   : > { %5195 = vmatpush3.bf16.msra.mxu1 %v5194_v40  ;;  %4662 = vmatprep.mubr.msk.f32.mxu1 %vm6531_vm0, %v6530_v1 }
 0x54b   : > { %5196 = vmatprep.subr.bf16.mxu1 %v6538_v15 }
 0x54e   : > { %5198 = vmatpush3.bf16.msra.mxu1 %v5197_v47 }
 0x54f   : > { %5199 = vmatprep.subr.bf16.mxu1 %v6538_v15 }
 0x552   : > { %5201 = vmatpush3.bf16.msra.mxu1 %v5200_v50 }
 0x553   : > { %5202 = vmatprep.subr.bf16.mxu1 %v6538_v15 }
 0x556   : > { %5204 = vmatpush3.bf16.msra.mxu1 %v5203_v57 }
 0x557   : > { %5205 = vmatprep.subr.bf16.mxu1 %v6538_v15 }
 0x55a   : > { %5207 = vmatpush3.bf16.msra.mxu1 %v5206_v60 }
 0x55b   : > { %5208 = vmatprep.subr.bf16.mxu1 %v6538_v15 }
 0x55e   : > { %5210 = vmatpush3.bf16.msra.mxu1 %v5209_v4 }
 0x55f   : > { %5211 = vmatprep.subr.bf16.mxu1 %v6538_v15 }
 0x562   : > { %5213 = vmatpush3.bf16.msra.mxu1 %v5212_v10 }
 0x563   : > { %5214 = vmatprep.subr.bf16.mxu1 %v6538_v15 }
 0x566   : > { %5216 = vmatpush3.bf16.msra.mxu1 %v5215_v18 }
 0x567   : > { %5241 = vmatprep.subr.bf16.mxu1 %v6538_v15 }
 0x569   : > { %4663 = vmatmul.mubr.f32.vlgmr.msra.gmra.mrb[6].mxu1 %v7444_v20 }
 0x56a   : > { %4732 = vmatprep.mubr.msk.f32.mxu1 %vm6531_vm0, %v6530_v1  ;;  %5243 = vmatpush3.bf16.msra.mxu1 %v5242_v45 }
 0x56b   : > { %5244 = vmatprep.subr.bf16.mxu1 %v6538_v15 }
 0x56e   : > { %5246 = vmatpush3.bf16.msra.mxu1 %v5245_v58 }
 0x56f   : > { %5247 = vmatprep.subr.bf16.mxu1 %v6538_v15 }
 0x572   : > { %5249 = vmatpush3.bf16.msra.mxu1 %v5248_v11  ;;  %v2948_v11 = vld [vmem:[%s7867_s5 + $0x10] sm:$0xff] }
 0x573   : > { %5250 = vmatprep.subr.bf16.mxu1 %v6538_v15  ;;  %v5293_v23 = vpack.c.bf16 %v2949_v43, %v2948_v11 }
 0x576   : > { %5252 = vmatpush3.bf16.msra.mxu1 %v5251_v24  ;;  %v2950_v24 = vld [vmem:[%s7867_s5 + $0x20] sm:$0xff] }
 0x577   : > { %5253 = vmatprep.subr.bf16.mxu1 %v6538_v15  ;;  %v5296_v34 = vpack.c.bf16 %v2951_v49, %v2950_v24 }
 0x57a   : > { %5255 = vmatpush3.bf16.msra.mxu1 %v5254_v38  ;;  %v2952_v38 = vld [vmem:[%s7867_s5 + $0x30] sm:$0xff] }
 0x57b   : > { %5256 = vmatprep.subr.bf16.mxu1 %v6538_v15  ;;  %v5299_v30 = vpack.c.bf16 %v2953_v46, %v2952_v38 }
 0x57e   : > { %5258 = vmatpush3.bf16.msra.mxu1 %v5257_v32  ;;  %v2954_v32 = vld [vmem:[%s7867_s5 + $0x40] sm:$0xff] }
 0x57f   : > { %5259 = vmatprep.subr.bf16.mxu1 %v6538_v15  ;;  %v5302_v36 = vpack.c.bf16 %v2955_v35, %v2954_v32 }
 0x582   : > { %5261 = vmatpush3.bf16.msra.mxu1 %v5260_v22  ;;  %v2956_v22 = vld [vmem:[%s7867_s5 + $0x50] sm:$0xff] }
 0x583   : > { %5262 = vmatprep.subr.bf16.mxu1 %v6538_v15 }
 0x61c   : > { %v4456_v3 = vpop.f32.mrb[4].mxu1 }
 0x61d   : > { %v4457_v7 = vpop.f32.mrb[5].mxu1 }
 0x61e   : > { %v4458_v9 = vadd.f32 %v4457_v7, %v4456_v3  ;;  %v2758_v7 = vld [vmem:[#allocation7 + $0x30] sm:$0xff] }
 0x620   : > { %v2353_v13 = vadd.f32 %v4458_v9, %v4383_v0  ;;  %v2759_v9 = vld [vmem:[#allocation7 + $0x38] sm:$0xff] }
 0x622   : > { %2465 = vmatmul.mubr.f32.vlgmr.msra.gmra.mrb[6].mxu0 %v2353_v13  ;;  %v7520_v13 = vpack.c.bf16 %v2759_v9, %v2758_v7  ;;  %v4390_v9 = vld [vmem:[#allocation23] ss:$0 sm:$0xff] }
 0x623   : > { %5219 = vmatpush3.bf16.msra.mxu0 %v5194_v40  ;;  %4697 = vmatprep.mubr.msk.f32.mxu0 %vm6531_vm0, %v6530_v1  ;;  %v2672_v40 = vld [vmem:[%s7862_s6 + $0x70] sm:$0xff] }
 0x624   : > { %5220 = vmatprep.subr.bf16.mxu0 %v6538_v15  ;;  %v5263_v42 = vpack.c.bf16 %v2673_v41, %v2672_v40  ;;  %v2957_v40 = vld [vmem:[%s7867_s5 + $0x58] sm:$0xff] }
 0x625   : > { %v5305_v41 = vpack.c.bf16 %v2957_v40, %v2956_v22 }
 0x626   : > { %5264 = vmatpush3.bf16.msra.mxu1 %v5263_v42  ;;  %v2958_v42 = vld [vmem:[%s7867_s5 + $0x60] sm:$0xff] }
 0x627   : > { %5222 = vmatpush3.bf16.msra.mxu0 %v5197_v47  ;;  %5277 = vmatprep.subr.bf16.mxu1 %v6538_v15  ;;  %v2753_v47 = vld [vmem:[#allocation7 + $0x8] sm:$0xff] }
 0x628   : > { %5223 = vmatprep.subr.bf16.mxu0 %v6538_v15  ;;  %v7492_v44 = vpack.c.bf16 %v2753_v47, %v2752_v51  ;;  %v2959_v51 = vld [vmem:[%s7867_s5 + $0x68] sm:$0xff] }
 0x629   : > { %v5308_v47 = vpack.c.bf16 %v2959_v51, %v2958_v42  ;;  %v3380_v42 = vld [vmem:[#allocation5 + $0x8] sm:$0xff] }
 0x62b   : > { %5225 = vmatpush3.bf16.msra.mxu0 %v5200_v50  ;;  %v2755_v50 = vld [vmem:[#allocation7 + $0x18] sm:$0xff] }
 0x62c   : > { %5226 = vmatprep.subr.bf16.mxu0 %v6538_v15  ;;  %v7495_v53 = vpack.c.bf16 %v2755_v50, %v2754_v48  ;;  %v2960_v48 = vld [vmem:[%s7867_s5 + $0x70] sm:$0xff]  ;;  %v2961_v50 = vld [vmem:[%s7867_s5 + $0x78] sm:$0xff] }
 0x62f   : > { %5228 = vmatpush3.bf16.msra.mxu0 %v5203_v57  ;;  %v2757_v57 = vld [vmem:[#allocation7 + $0x28] sm:$0xff] }
 0x630   : > { %5229 = vmatprep.subr.bf16.mxu0 %v6538_v15  ;;  %v7499_v56 = vpack.c.bf16 %v2757_v57, %v2756_v55  ;;  %v5311_v55 = vpack.c.bf16 %v2961_v50, %v2960_v48  ;;  %v2939_v57 = vld [vmem:[#allocation26 + $0x8] sm:$0xff] }
 0x633   : > { %5231 = vmatpush3.bf16.msra.mxu0 %v5206_v60 }
 0x634   : > { %5232 = vmatprep.subr.bf16.mxu0 %v6538_v15 }
 0x637   : > { %5234 = vmatpush3.bf16.msra.mxu0 %v5209_v4 }
 0x638   : > { %5235 = vmatprep.subr.bf16.mxu0 %v6538_v15 }
 0x63b   : > { %5237 = vmatpush3.bf16.msra.mxu0 %v5212_v10 }
 0x63c   : > { %v7460_v19 = vpop.f32.mrb[6].mxu1  ;;  %5238 = vmatprep.subr.bf16.mxu0 %v6538_v15 }
 0x63d   : > { %v4664_v21 = vpop.f32.mrb[7].mxu1  ;;  %v2628_v2 = vmul.f32 %v7460_v19, %v7460_v19  ;;  %v2631_v14 = vsub.f32 %v7444_v20, %v7460_v19  ;;  %v7527_v19 = vld [vmem:[%s7865_s18] sm:$0x3]  ;;  %s7871_s18 = sld [smem:[#allocation71_spill]] }
 0x63e   : > { %v2393_v21 = vrot.slane %v7527_v19, %v7394_v25 }
 0x63f   : > { %5240 = vmatpush3.bf16.msra.mxu0 %v5215_v18  ;;  %v4384_v18 = vld [vmem:[%s7863_s15] ss:$0 sm:$0xff]  ;;  %s7869_s15 = sld [smem:[#allocation73_spill]] }
 0x640   : > { %5265 = vmatprep.subr.bf16.mxu0 %v6538_v15 }
 0x642   : > { %4698 = vmatmul.mubr.f32.vlgmr.msra.gmra.mrb[8].mxu0 %v2557_v27  ;;  %v4387_v27 = vld [vmem:[%s7866_s1] ss:$0 sm:$0xff]  ;;  %s7872_s1 = sld [smem:[#allocation76_spill]] }
 0x643   : > { %4751 = vmatprep.mubr.msk.f32.mxu0 %vm6531_vm0, %v6530_v1  ;;  %5267 = vmatpush3.bf16.msra.mxu0 %v7492_v44 }
 0x644   : > { %5268 = vmatprep.subr.bf16.mxu0 %v6538_v15 }
 0x645   : > { %s7870_s4 = smov %s7869_s15 }
 0x646   : > { %v3292_v49 = vld [vmem:[%s7870_s4 + $0x10] sm:$0xff]  ;;  %v3293_v38 = vld [vmem:[%s7870_s4 + $0x18] sm:$0xff]  ;;  %v3295_v32 = vld [vmem:[%s7870_s4 + $0x28] sm:$0xff] }
 0x647   : > { %5270 = vmatpush3.bf16.msra.mxu0 %v7495_v53  ;;  %v5353_v46 = vpack.c.bf16 %v3293_v38, %v3292_v49  ;;  %v3297_v22 = vld [vmem:[%s7870_s4 + $0x38] sm:$0xff] }
 0x648   : > { %5271 = vmatprep.subr.bf16.mxu0 %v6538_v15 }
 0x64b   : > { %5273 = vmatpush3.bf16.msra.mxu0 %v7499_v56 }
 0x64c   : > { %5274 = vmatprep.subr.bf16.mxu0 %v6538_v15 }
 0x64f   : > { %5276 = vmatpush3.bf16.msra.mxu0 %v7520_v13 }
 0x650   : > { %5289 = vmatprep.subr.bf16.mxu0 %v6538_v15 }
 0x6f5   : > { %v2466_v59 = vpop.f32.mrb[6].mxu0 }
 0x6f6   : > { %v7504_v60 = vpop.f32.mrb[7].mxu0  ;;  %v2467_v45 = vadd.f32 %v2466_v59, %v2393_v21  ;;  %v2940_v59 = vld [vmem:[#allocation26 + $0x10] sm:$0xff] }
 0x715   : > { %v2624_v54 = vpop.f32.mrb[8].mxu0 }
 0x716   : > { %v2629_v4 = vsub.f32 %v2624_v54, %v2628_v2  ;;  %v4699_v5 = vpop.f32.mrb[9].mxu0  ;;  %v2941_v54 = vld [vmem:[#allocation26 + $0x18] sm:$0xff] }
 0x717   : > { %v2942_v5 = vld [vmem:[#allocation26 + $0x20] sm:$0xff] }
 0x718   : > { %v2630_v8 = vmax.f32 %v2629_v4, 0.0  ;;  %v5317_v4 = vpack.c.bf16 %v2941_v54, %v2940_v59 }
 0x71a   : > { %v2632_v10 = vadd.f32 1e-05, %v2630_v8  ;;  %v2943_v8 = vld [vmem:[#allocation26 + $0x28] sm:$0xff] }
 0x71c   : > { %5736 = vrsqrt.f32 %v2632_v10  ;;  %v5320_v10 = vpack.c.bf16 %v2943_v8, %v2942_v5  ;;  %v4397_v5 = vld [vmem:[%s7871_s18] ss:$0 sm:$0xff] }
 0x726   : > { %v5737_v17 = vpop.eup %5736 }
 0x727   : > { %v2634_v16 = vmul.f32 %v5737_v17, %v2631_v14  ;;  %v2944_v14 = vld [vmem:[#allocation26 + $0x30] sm:$0xff]  ;;  %v2945_v17 = vld [vmem:[#allocation26 + $0x38] sm:$0xff] }
 0x729   : > { %v2642_v26 = vmul.f32 %v4384_v18, %v2634_v16  ;;  %v5323_v18 = vpack.c.bf16 %v2945_v17, %v2944_v14 }
 0x72b   : > { %v2650_v28 = vadd.f32 %v4385_v12, %v2642_v26 }
 0x72d   : > { %v4386_v29 = vmul.f32 -1.442695, %v2650_v28 }
 0x72f   : > { %5738 = vpow2.f32 %v4386_v29 }
 0x739   : > { %v5739_v62 = vpop.eup %5738 }
 0x73a   : > { %v2654_v63 = vadd.f32 1.0, %v5739_v62 }
 0x73c   : > { %5740 = vrcp.f32 %v2654_v63 }
 0x746   : > { %v5741_v3 = vpop.eup %5740 }
 0x747   : > { %v2657_v0 = vmul.f32 %v5741_v3, %v2650_v28 }
 0x749   : > { %4733 = vmatmul.mubr.f32.vlgmr.msra.gmra.mrb[8].mxu1 %v2657_v0 }
 0x74a   : > { %5279 = vmatpush3.bf16.msra.mxu1 %v7492_v44  ;;  %4770 = vmatprep.mubr.msk.f32.mxu1 %vm6531_vm0, %v6530_v1 }
 0x74b   : > { %5280 = vmatprep.subr.bf16.mxu1 %v6538_v15 }
 0x74e   : > { %5282 = vmatpush3.bf16.msra.mxu1 %v7495_v53 }
 0x74f   : > { %5283 = vmatprep.subr.bf16.mxu1 %v6538_v15 }
 0x752   : > { %5285 = vmatpush3.bf16.msra.mxu1 %v7499_v56 }
 0x753   : > { %5286 = vmatprep.subr.bf16.mxu1 %v6538_v15 }
 0x756   : > { %5288 = vmatpush3.bf16.msra.mxu1 %v7520_v13 }
 0x757   : > { %5313 = vmatprep.subr.bf16.mxu1 %v6538_v15 }
 0x81c   : > { %v2747_v39 = vpop.f32.mrb[8].mxu1 }
 0x81d   : > { %v2748_v52 = vadd.f32 %v4387_v27, %v2747_v39  ;;  %v4734_v58 = vpop.f32.mrb[9].mxu1  ;;  %v4391_v27 = vld [vmem:[#allocation25] ss:$0 sm:$0xff] }
 0x81f   : > { %v7534_v6 = vadd.f32 %v2748_v52, %v2467_v45 }
 0x821   : > { %v2834_v25 = vmul.f32 %v7534_v6, %v7534_v6  ;;  %4752 = vmatmul.mubr.msk.f32.vlgmr.msra.gmra.mrb[10].mxu0 %vm2760_vm2, %v7534_v6 }
 0x822   : > { %5291 = vmatpush3.bf16.msra.mxu0 %v5290_v61  ;;  %4805 = vmatprep.mubr.msk.f32.mxu0 %vm6531_vm0, %v6530_v1 }
 0x823   : > { %4771 = vmatmul.mubr.msk.f32.vlgmr.msra.gmra.mrb[10].mxu1 %vm2760_vm2, %v2834_v25  ;;  %5292 = vmatprep.subr.bf16.mxu0 %v6538_v15 }
 0x824   : > { %4824 = vmatprep.mubr.msk.f32.mxu1 %vm6531_vm0, %v6530_v1 }
 0x826   : > { %5294 = vmatpush3.bf16.msra.mxu0 %v5293_v23 }
 0x827   : > { %5295 = vmatprep.subr.bf16.mxu0 %v6538_v15 }
 0x82a   : > { %5297 = vmatpush3.bf16.msra.mxu0 %v5296_v34 }
 0x82b   : > { %5298 = vmatprep.subr.bf16.mxu0 %v6538_v15 }
 0x82e   : > { %5300 = vmatpush3.bf16.msra.mxu0 %v5299_v30  ;;  %v3294_v30 = vld [vmem:[%s7870_s4 + $0x20] sm:$0xff] }
 0x82f   : > { %5301 = vmatprep.subr.bf16.mxu0 %v6538_v15  ;;  %v5356_v35 = vpack.c.bf16 %v3295_v32, %v3294_v30 }
 0x832   : > { %5303 = vmatpush3.bf16.msra.mxu0 %v5302_v36  ;;  %v3296_v36 = vld [vmem:[%s7870_s4 + $0x30] sm:$0xff] }
 0x833   : > { %5304 = vmatprep.subr.bf16.mxu0 %v6538_v15  ;;  %v5359_v40 = vpack.c.bf16 %v3297_v22, %v3296_v36 }
 0x836   : > { %5306 = vmatpush3.bf16.msra.mxu0 %v5305_v41  ;;  %v3379_v41 = vld [vmem:[#allocation5] sm:$0xff] }
 0x837   : > { %5307 = vmatprep.subr.bf16.mxu0 %v6538_v15  ;;  %v7618_v51 = vpack.c.bf16 %v3380_v42, %v3379_v41 }
 0x83a   : > { %5309 = vmatpush3.bf16.msra.mxu0 %v5308_v47 }
 0x83b   : > { %5310 = vmatprep.subr.bf16.mxu0 %v6538_v15 }
 0x83e   : > { %5312 = vmatpush3.bf16.msra.mxu0 %v5311_v55 }
 0x83f   : > { %5337 = vmatprep.subr.bf16.mxu0 %v6538_v15 }
 0x841   : > { %4806 = vmatmul.mubr.f32.vlgmr.msra.gmra.mrb[12].mxu0 %v7444_v20  ;;  %v2938_v20 = vld [vmem:[#allocation26] sm:$0xff] }
 0x842   : > { %5339 = vmatpush3.bf16.msra.mxu0 %v7492_v44  ;;  %4862 = vmatprep.mubr.msk.f32.mxu0 %vm6531_vm0, %v6530_v1  ;;  %v5314_v2 = vpack.c.bf16 %v2939_v57, %v2938_v20 }
 0x843   : > { %5340 = vmatprep.subr.bf16.mxu0 %v6538_v15 }
 0x844   : > { %5315 = vmatpush3.bf16.msra.mxu1 %v5314_v2 }
 0x845   : > { %5316 = vmatprep.subr.bf16.mxu1 %v6538_v15 }
 0x846   : > { %5342 = vmatpush3.bf16.msra.mxu0 %v7495_v53 }
 0x847   : > { %5343 = vmatprep.subr.bf16.mxu0 %v6538_v15 }
 0x848   : > { %5318 = vmatpush3.bf16.msra.mxu1 %v5317_v4 }
 0x849   : > { %5319 = vmatprep.subr.bf16.mxu1 %v6538_v15 }
 0x84a   : > { %5345 = vmatpush3.bf16.msra.mxu0 %v7499_v56 }
 0x84b   : > { %5346 = vmatprep.subr.bf16.mxu0 %v6538_v15 }
 0x84c   : > { %5321 = vmatpush3.bf16.msra.mxu1 %v5320_v10  ;;  %v4398_v10 = vld [vmem:[#allocation28] ss:$0 sm:$0xff] }
 0x84d   : > { %5322 = vmatprep.subr.bf16.mxu1 %v6538_v15 }
 0x84e   : > { %5348 = vmatpush3.bf16.msra.mxu0 %v7520_v13 }
 0x84f   : > { %5361 = vmatprep.subr.bf16.mxu0 %v6538_v15 }
 0x850   : > { %5324 = vmatpush3.bf16.msra.mxu1 %v5323_v18 }
 0x851   : > { %5325 = vmatprep.subr.bf16.mxu1 %v6538_v15 }
 0x8f4   : > { %v2830_v16 = vpop.f32.mrb[10].mxu0 }
 0x8f5   : > { %v2908_v12 = vmul.f32 %v2830_v16, %v2830_v16  ;;  %v4753_v26 = vpop.f32.mrb[11].mxu0  ;;  %v2911_v0 = vsub.f32 %v7534_v6, %v2830_v16  ;;  %v4394_v6 = vld [vmem:[%s7868_s0] ss:$0 sm:$0xff]  ;;  %s7873_s0 = sld [smem:[#allocation75_spill]] }
 0x8f6   : > { %v2904_v28 = vpop.f32.mrb[10].mxu1 }
 0x8f7   : > { %v2909_v29 = vsub.f32 %v2904_v28, %v2908_v12  ;;  %v4772_v62 = vpop.f32.mrb[11].mxu1 }
 0x8f8   : > { %v3382_v62 = vld [vmem:[#allocation5 + $0x18] sm:$0xff] }
 0x8f9   : > { %v2910_v63 = vmax.f32 %v2909_v29, 0.0  ;;  %v3381_v29 = vld [vmem:[#allocation5 + $0x10] sm:$0xff] }
 0x8fb   : > { %v2912_v3 = vadd.f32 1e-05, %v2910_v63  ;;  %v7629_v63 = vpack.c.bf16 %v3382_v62, %v3381_v29  ;;  %s7874_s2 = smov %s7873_s0 }
 0x8fd   : > { %5742 = vrsqrt.f32 %v2912_v3  ;;  %v2397_v3 = vrot.slane %v7527_v19, %v7396_v31  ;;  %v3570_v19 = vld [vmem:[%s7872_s1 + $0x28] sm:$0xff] }
 0x907   : > { %v5743_v7 = vpop.eup %5742 }
 0x908   : > { %v2914_v21 = vmul.f32 %v5743_v7, %v2911_v0  ;;  %v4400_v0 = vld [vmem:[#allocation29] ss:$0 sm:$0xff] }
 0x909   : > { %v3565_v7 = vld [vmem:[%s7872_s1] sm:$0xff] }
 0x90a   : > { %v2922_v33 = vmul.f32 %v4390_v9, %v2914_v21  ;;  %v3566_v9 = vld [vmem:[%s7872_s1 + $0x8] sm:$0xff] }
 0x90c   : > { %v2930_v37 = vadd.f32 %v4391_v27, %v2922_v33  ;;  %v2469_v27 = vadd.f32 %v7504_v60, %v2397_v3  ;;  %v3569_v60 = vld [vmem:[%s7872_s1 + $0x20] sm:$0xff] }
 0x90e   : > { %v4392_v39 = vmul.f32 -1.442695, %v2930_v37 }
 0x910   : > { %5744 = vpow2.f32 %v4392_v39  ;;  %v5374_v39 = vpack.c.bf16 %v3566_v9, %v3565_v7 }
 0x914   : > { %v3028_v45 = vpop.f32.mrb[12].mxu0 }
 0x915   : > { %v4807_v52 = vpop.f32.mrb[13].mxu0 }
 0x916   : > { %v3567_v52 = vld [vmem:[%s7872_s1 + $0x10] sm:$0xff] }
 0x91a   : > { %v5745_v58 = vpop.eup %5744 }
 0x91b   : > { %v2934_v61 = vadd.f32 1.0, %v5745_v58  ;;  %v3568_v58 = vld [vmem:[%s7872_s1 + $0x18] sm:$0xff] }
 0x91c   : > { %v5377_v31 = vpack.c.bf16 %v3568_v58, %v3567_v52 }
 0x91d   : > { %5746 = vrcp.f32 %v2934_v61 }
 0x927   : > { %v5747_v11 = vpop.eup %5746 }
 0x928   : > { %v2937_v43 = vmul.f32 %v5747_v11, %v2930_v37  ;;  %v5380_v11 = vpack.c.bf16 %v3570_v19, %v3569_v60 }
 0x92a   : > { %4825 = vmatmul.mubr.msk.f32.vlgmr.msra.gmra.mrb[12].mxu1 %vm2760_vm2, %v2937_v43  ;;  %v3571_v43 = vld [vmem:[%s7872_s1 + $0x30] sm:$0xff] }
 0x92b   : > { %5327 = vmatpush3.bf16.msra.mxu1 %v7492_v44  ;;  %4843 = vmatprep.mubr.msk.f32.mxu1 %vm6531_vm0, %v6530_v1 }
 0x92c   : > { %5328 = vmatprep.subr.bf16.mxu1 %v6538_v15 }
 0x92f   : > { %5330 = vmatpush3.bf16.msra.mxu1 %v7495_v53 }
 0x930   : > { %5331 = vmatprep.subr.bf16.mxu1 %v6538_v15 }
 0x933   : > { %5333 = vmatpush3.bf16.msra.mxu1 %v7499_v56  ;;  %v3290_v56 = vld [vmem:[%s7869_s15] sm:$0xff]  ;;  %s1556_s15 = sand.u32 1, %s6452_s16  }
 0x934   : > { %5334 = vmatprep.subr.bf16.mxu1 %v6538_v15  ;;  %s4366_s18 = sshll.u32 %s1556_s15, 3  ;;  %s3980_s5 = scalar_lea.sflag [#allocation4], %s1556_s15 }
 0x937   : > { %5336 = vmatpush3.bf16.msra.mxu1 %v7520_v13  ;;  %v3291_v13 = vld [vmem:[%s7870_s4 + $0x8] sm:$0xff] }
 0x938   : > { %5349 = vmatprep.subr.bf16.mxu1 %v6538_v15  ;;  %v5350_v34 = vpack.c.bf16 %v3291_v13, %v3290_v56  ;;  %v3564_v13 = vld [vmem:[%s7874_s2 + $0x18] sm:$0xff] }
 0x9fd   : > { %v3101_v44 = vpop.f32.mrb[12].mxu1 }
 0x9fe   : > { %v3102_v25 = vadd.f32 %v3101_v44, %v3028_v45  ;;  %v4826_v23 = vpop.f32.mrb[13].mxu1  ;;  %v3572_v44 = vld [vmem:[%s7872_s1 + $0x38] sm:$0xff] }
 0x9ff   : > { %v3562_v23 = vld [vmem:[%s7874_s2 + $0x8] sm:$0xff] }
 0xa00   : > { %v7595_v53 = vadd.f32 %v4394_v6, %v3102_v25  ;;  %v5383_v6 = vpack.c.bf16 %v3572_v44, %v3571_v43  ;;  %v3561_v25 = vld [vmem:[%s7873_s0] sm:$0xff]  ;;  %s1558_s0 = scalar_lea.vmem [#allocation35], %s4366_s18 }
 0xa01   : > { %v5386_v56 = vpack.c.bf16 %v3562_v23, %v3561_v25  ;;  %s3993_s1 = sshll.u32 %s1558_s0, 4  ;;  %s7690_s1 = int_to_ptr.vmem [resolvable:$true] %s3993_s1 }
 0xa02   : > { %v3186_v24 = vmul.f32 %v7595_v53, %v7595_v53  ;;  %4844 = vmatmul.mubr.msk.f32.vlgmr.msra.gmra.mrb[14].mxu1 %vm2760_vm2, %v7595_v53  ;;  %s6354_s6 = scalar_lea.vmem %s7690_s1, 128 }
 0xa03   : > { %4881 = vmatprep.mubr.msk.f32.mxu1 %vm6531_vm0, %v6530_v1  ;;  %5351 = vmatpush3.bf16.msra.mxu1 %v5350_v34  ;;  %p6355_p4 = scmp.ne.s32.totalorder %s7690_s1, %s6354_s6 }
 0xa04   : > { %4863 = vmatmul.mubr.msk.f32.vlgmr.msra.gmra.mrb[14].mxu0 %vm2760_vm2, %v3186_v24  ;;  %5352 = vmatprep.subr.bf16.mxu1 %v6538_v15  ;;  %v3563_v24 = vld [vmem:[%s7874_s2 + $0x10] sm:$0xff]  ;;  %s4417_s2 = sshll.u32 %s6781_s22, 7 }
 0xa05   : > { %4892 = vmatprep.mubr.msk.f32.mxu0 %vm6531_vm0, %v6530_v1  ;;  %5363 = vmatpush3.bf16.msra.mxu0 %v7618_v51  ;;  %v5389_v49 = vpack.c.bf16 %v3564_v13, %v3563_v24  ;;  %s7693_s4 = scalar_lea.hbm %s6758_s3, %s4417_s2  ;;  %p6356_p8 = pnand %p6355_p4, %p7876_p7 }
 0xa06   : > { %5364 = vmatprep.subr.bf16.mxu0 %v6538_v15 }
 0xa07   : > { %5354 = vmatpush3.bf16.msra.mxu1 %v5353_v46  ;;  %p6357_p11 = pneg %p6356_p8 }
 0xa08   : > { %5355 = vmatprep.subr.bf16.mxu1 %v6538_v15 }
 0xa09   : > { %5366 = vmatpush3.bf16.msra.mxu0 %v7629_v63 }
 0xa0a   : > { %5373 = vmatprep.subr.bf16.mxu0 %v6538_v15 }
 0xa0b   : > { %5357 = vmatpush3.bf16.msra.mxu1 %v5356_v35 }
 0xa0c   : > { %5358 = vmatprep.subr.bf16.mxu1 %v6538_v15 }
 0xa0f   : > { %5360 = vmatpush3.bf16.msra.mxu1 %v5359_v40 }
 0xa10   : > { %5367 = vmatprep.subr.bf16.mxu1 %v6538_v15 }
 0xad5   : > { %v3182_v47 = vpop.f32.mrb[14].mxu1 }
 0xad6   : > { %v3260_v48 = vmul.f32 %v3182_v47, %v3182_v47  ;;  %v4845_v50 = vpop.f32.mrb[15].mxu1  ;;  %v3263_v54 = vsub.f32 %v7595_v53, %v3182_v47  ;;  %v4404_v47 = vld [vmem:[#allocation31] ss:$0 sm:$0xff] }
 0xad7   : > { %v3256_v55 = vpop.f32.mrb[14].mxu0  ;;  %v4405_v50 = vld [vmem:[#allocation32] ss:$0 sm:$0xff] }
 0xad8   : > { %v3261_v20 = vsub.f32 %v3256_v55, %v3260_v48  ;;  %v4864_v57 = vpop.f32.mrb[15].mxu0 }
 0xada   : > { %v3262_v59 = vmax.f32 %v3261_v20, 0.0 }
 0xadc   : > { %v3264_v2 = vadd.f32 1e-05, %v3262_v59 }
 0xade   : > { %5748 = vrsqrt.f32 %v3264_v2 }
 0xae8   : > { %v5749_v4 = vpop.eup %5748 }
 0xae9   : > { %v3266_v8 = vmul.f32 %v5749_v4, %v3263_v54 }
 0xaeb   : > { %v3274_v14 = vmul.f32 %v4397_v5, %v3266_v8  ;;  %v4409_v8 = vld [vmem:[#allocation34] ss:$0 sm:$0xff] }
 0xaed   : > { %v3282_v17 = vadd.f32 %v4398_v10, %v3274_v14 }
 0xaef   : > { %v4399_v18 = vmul.f32 -1.442695, %v3282_v17 }
 0xaf1   : > { %5750 = vpow2.f32 %v4399_v18 }
 0xafb   : > { %v5751_v16 = vpop.eup %5750 }
 0xafc   : > { %v3286_v12 = vadd.f32 1.0, %v5751_v16  ;;  %v3902_v16 = vld [vmem:[%s6753_s27 + $0x8] sm:$0xff] }
 0xafe   : > { %5752 = vrcp.f32 %v3286_v12  ;;  %v3903_v12 = vld [vmem:[%s6753_s27 + $0x10] sm:$0xff] }
 0xb08   : > { %v5753_v26 = vpop.eup %5752 }
 0xb09   : > { %v3289_v28 = vmul.f32 %v5753_v26, %v3282_v17 }
 0xb0b   : > { %4882 = vmatmul.mubr.msk.f32.vlgmr.msra.gmra.mrb[16].mxu1 %vm2760_vm2, %v3289_v28  ;;  %v3904_v28 = vld [vmem:[%s6753_s27 + $0x18] sm:$0xff] }
 0xb0c   : > { %5369 = vmatpush3.bf16.msra.mxu1 %v7618_v51  ;;  %4903 = vmatprep.mubr.msk.f32.mxu1 %vm6531_vm0, %v6530_v1  ;;  %v5407_v29 = vpack.c.bf16 %v3904_v28, %v3903_v12 }
 0xb0d   : > { %5370 = vmatprep.subr.bf16.mxu1 %v6538_v15 }
 0xb10   : > { %5372 = vmatpush3.bf16.msra.mxu1 %v7629_v63 }
 0xb11   : > { %5385 = vmatprep.subr.bf16.mxu1 %v6538_v15 }
 0xbde   : > { %v3374_v21 = vpop.f32.mrb[16].mxu1 }
 0xbdf   : > { %v3375_v33 = vadd.f32 %v4400_v0, %v3374_v21  ;;  %v4883_v37 = vpop.f32.mrb[17].mxu1 }
 0xbe0   : > { %v4412_v37 = vld [vmem:[%s6743_s12] ss:$0 sm:$0xff] }
 0xbe1   : > { %v3378_v45 = vadd.f32 %v3375_v33, %v2469_v27 }
 0xbe3   : > { %v3457_v61 = vmul.f32 %v3378_v45, %v3378_v45  ;;  %4893 = vmatmul.mubr.msk.f32.vlgmr.msra.gmra.mrb[16].mxu0 %vm3383_vm3, %v3378_v45 }
 0xbe4   : > { %5375 = vmatpush3.bf16.msra.mxu0 %v5374_v39  ;;  %4922 = vmatprep.mubr.msk.f32.mxu0 %vm6531_vm0, %v6530_v1 }
 0xbe5   : > { %4904 = vmatmul.mubr.msk.f32.vlgmr.msra.gmra.mrb[18].mxu1 %vm3383_vm3, %v3457_v61  ;;  %5376 = vmatprep.subr.bf16.mxu0 %v6538_v15 }
 0xbe6   : > { %4933 = vmatprep.mubr.msk.f32.mxu1 %vm6531_vm0, %v6530_v1  ;;  %5387 = vmatpush3.bf16.msra.mxu1 %v5386_v56 }
 0xbe7   : > { %5388 = vmatprep.subr.bf16.mxu1 %v6538_v15 }
 0xbe8   : > { %5378 = vmatpush3.bf16.msra.mxu0 %v5377_v31 }
 0xbe9   : > { %5379 = vmatprep.subr.bf16.mxu0 %v6538_v15 }
 0xbea   : > { %5390 = vmatpush3.bf16.msra.mxu1 %v5389_v49 }
 0xbeb   : > { %5391 = vmatprep.subr.bf16.mxu1 %v6538_v15 }
 0xbec   : > { %5381 = vmatpush3.bf16.msra.mxu0 %v5380_v11 }
 0xbed   : > { %5382 = vmatprep.subr.bf16.mxu0 %v6538_v15 }
 0xbf0   : > { %5384 = vmatpush3.bf16.msra.mxu0 %v5383_v6 }
 0xbf1   : > { %5397 = vmatprep.subr.bf16.mxu0 %v6538_v15 }
 0xbf3   : > { %4923 = vmatmul.mubr.msk.f32.vlgmr.msra.gmra.mrb[18].mxu0 %vm2760_vm2, %v7595_v53 }
 0xbf4   : > { %5399 = vmatpush3.bf16.msra.mxu0 %v7618_v51  ;;  %4955 = vmatprep.mubr.msk.f32.mxu0 %vm6531_vm0, %v6530_v1 }
 0xbf5   : > { %5400 = vmatprep.subr.bf16.mxu0 %v6538_v15 }
 0xbf8   : > { %5402 = vmatpush3.bf16.msra.mxu0 %v7629_v63 }
 0xcb6   : > { %v3453_v53 = vpop.f32.mrb[16].mxu0 }
 0xcb7   : > { %v3531_v34 = vmul.f32 %v3453_v53, %v3453_v53  ;;  %v4894_v38 = vpop.f32.mrb[17].mxu0  ;;  %v3534_v41 = vsub.f32 %v3378_v45, %v3453_v53  ;;  %v4413_v45 = vld [vmem:[%s7875_s8] ss:$0 sm:$0xff]  ;;  %s6539_s8 = smov [#allocation35]  }
 0xcb8   : > { %v3527_v46 = vpop.f32.mrb[18].mxu1  ;;  %s6358_s18 = sshll.u32 %s6539_s8, 4  ;;  %s6359_s18 = int_to_ptr.vmem [resolvable:$false] %s6358_s18 }
 0xcb9   : > { %v3532_v30 = vsub.f32 %v3527_v46, %v3531_v34  ;;  %v4905_v32 = vpop.f32.mrb[19].mxu1  ;;  %s6360_s22 = scalar_lea.vmem %s6359_s18, 256  ;;  %p6361_p13 = scmp.lt.s32.totalorder %s7690_s1, %s6359_s18 }
 0xcba   : > { %p6362_p6 = scmp.lt.s32.totalorder %s6360_s22, %s6354_s6 }
 0xcbb   : > { %v3533_v35 = vmax.f32 %v3532_v30, 0.0 }
 0xcbc   : > { %p6363_p5 = por %p6362_p6, %p6361_p13 }
 0xcbd   : > { %v3535_v36 = vadd.f32 1e-05, %v3533_v35 }
 0xcbe   : > { %p6364_p0 = pnand %p6363_p5, %p6357_p11 }
 0xcbf   : > { %5754 = vrsqrt.f32 %v3535_v36 }
 0xcc6   : > { %v3639_v22 = vpop.f32.mrb[18].mxu0 }
 0xcc7   : > { %v4924_v40 = vpop.f32.mrb[19].mxu0 }
 0xcc9   : > { %v5755_v42 = vpop.eup %5754 }
 0xcca   : > { %v3537_v48 = vmul.f32 %v5755_v42, %v3534_v41 }
 0xccc   : > { %v3545_v55 = vmul.f32 %v4404_v47, %v3537_v48 }
 0xcce   : > { %v3553_v20 = vadd.f32 %v4405_v50, %v3545_v55 }
 0xcd0   : > { %v4406_v57 = vmul.f32 -1.442695, %v3553_v20 }
 0xcd2   : > { %5756 = vpow2.f32 %v4406_v57 }
 0xcdc   : > { %v5757_v59 = vpop.eup %5756 }
 0xcdd   : > { %v3557_v2 = vadd.f32 1.0, %v5757_v59 }
 0xcdf   : > { %5758 = vrcp.f32 %v3557_v2 }
 0xce9   : > { %v5759_v54 = vpop.eup %5758 }
 0xcea   : > { %v3560_v4 = vmul.f32 %v5759_v54, %v3553_v20 }
 0xcec   : > { %4934 = vmatmul.mubr.msk.f32.vlgmr.msra.gmra.mrb[20].mxu1 %vm3383_vm3, %v3560_v4 }
 0xced   : > { %5393 = vmatpush3.bf16.msra.mxu1 %v7618_v51  ;;  %4944 = vmatprep.mubr.msk.f32.mxu1 %vm6531_vm0, %v6530_v1  ;;  %v3901_v51 = vld [vmem:[%s6753_s27] sm:$0xff] }
 0xcee   : > { %5394 = vmatprep.subr.bf16.mxu1 %v6538_v15  ;;  %v5404_v26 = vpack.c.bf16 %v3902_v16, %v3901_v51 }
 0xcf1   : > { %5396 = vmatpush3.bf16.msra.mxu1 %v7629_v63 }
 0xcf2   : > { %5403 = vmatprep.subr.bf16.mxu1 %v6538_v15 }
 0xdbf   : > { %v3712_v5 = vpop.f32.mrb[20].mxu1 }
 0xdc0   : > { %v3713_v10 = vadd.f32 %v3712_v5, %v3639_v22  ;;  %v4935_v14 = vpop.f32.mrb[21].mxu1 }
 0xdc2   : > { %v3723_v17 = vadd.f32 %v4409_v8, %v3713_v10 }
 0xdc4   : > { %v3797_v18 = vmul.f32 %v3723_v17, %v3723_v17  ;;  %4945 = vmatmul.mubr.msk.f32.vlgmr.msra.gmra.mrb[22].mxu1 %vm3383_vm3, %v3723_v17 }
 0xdc5   : > { %4966 = vmatprep.mubr.msk.f32.mxu1 %vm6531_vm0, %v6530_v1  ;;  %5405 = vmatpush3.bf16.msra.mxu1 %v5404_v26 }
 0xdc6   : > { %4956 = vmatmul.mubr.msk.f32.vlgmr.msra.gmra.mrb[20].mxu0 %vm3383_vm3, %v3797_v18  ;;  %5406 = vmatprep.subr.bf16.mxu1 %v6538_v15 }
 0xdc9   : > { %5408 = vmatpush3.bf16.msra.mxu1 %v5407_v29 }
 0xe97   : > { %v3793_v62 = vpop.f32.mrb[22].mxu1 }
 0xe98   : > { %v3871_v63 = vmul.f32 %v3793_v62, %v3793_v62  ;;  %v4946_v3 = vpop.f32.mrb[23].mxu1  ;;  %v3874_v27 = vsub.f32 %v3723_v17, %v3793_v62 }
 0xe99   : > { %v3867_v0 = vpop.f32.mrb[20].mxu0 }
 0xe9a   : > { %v3872_v7 = vsub.f32 %v3867_v0, %v3871_v63  ;;  %v4957_v1 = vpop.f32.mrb[21].mxu0 }
 0xe9c   : > { %v3873_v9 = vmax.f32 %v3872_v7, 0.0 }
 0xe9e   : > { %v3875_v21 = vadd.f32 1e-05, %v3873_v9 }
 0xea0   : > { %5760 = vrsqrt.f32 %v3875_v21 }
 0xeaa   : > { %v5761_v33 = vpop.eup %5760 }
 0xeab   : > { %v3877_v39 = vmul.f32 %v5761_v33, %v3874_v27 }
 0xead   : > { %v3885_v52 = vmul.f32 %v4412_v37, %v3877_v39 }
 0xeaf   : > { %v3893_v15 = vadd.f32 %v4413_v45, %v3885_v52 }
 0xeb1   : > { %v4414_v58 = vmul.f32 -1.442695, %v3893_v15 }
 0xeb3   : > { %5762 = vpow2.f32 %v4414_v58 }
 0xebd   : > { %v5763_v61 = vpop.eup %5762 }
 0xebe   : > { %v3897_v31 = vadd.f32 1.0, %v5763_v61 }
 0xec0   : > { %5764 = vrcp.f32 %v3897_v31 }
 0xeca   : > { %v5765_v60 = vpop.eup %5764 }
 0xecb   : > { %v3900_v19 = vmul.f32 %v5765_v60, %v3893_v15 }
 0xecd   : > { %4967 = vmatmul.mubr.msk.f32.vlgmr.msra.gmra.mrb[24].mxu1 %vm3383_vm3, %v3900_v19 }
 0xfa0   : > { %v3974_v11 = vpop.f32.mrb[24].mxu1 }
 0xfa1   : > { %3978 = vst [vmem:[%s1558_s0] sm:$0xff] %v3974_v11  ;;  %v4968_v43 = vpop.f32.mrb[25].mxu1 }
 0xfa2   : > { %6367 = shalt.err (!%p6364_p0)
}
 0xfa3   : > { %s6368_s2 = scalar_lea.hbm %s7693_s4, 128  ;;  %s6372_s8 = scalar_lea.hbm %s6758_s3, 256 }
 0xfa4   : > { %p6369_p9 = scmp.ne.s32.totalorder %s7693_s4, %s6368_s2  ;;  %p6373_p1 = scmp.lt.u32.totalorder %s7693_s4, %s6758_s3 }
 0xfa5   : > { %p6374_p2 = scmp.lt.u32.totalorder %s6372_s8, %s6368_s2  ;;  %p6376_p4 = scmp.lt.u32.totalorder %s6368_s2, %s7693_s4 }
 0xfa6   : > { %p6370_p10 = pnand %p6369_p9, %p7876_p7 }
 0xfa7   : > { %p6375_p3 = por %p6374_p2, %p6373_p1 }
 0xfa8   : > { %p6371_p12 = pneg %p6370_p10 }
 0xfa9   : > { %p6377_p8 = por %p6376_p4, %p6375_p3 }
 0xfab   : > { %p6378_p11 = pnand %p6377_p8, %p6371_p12 }
 0xfad   : > { %6381 = shalt.err (!%p6378_p11)
}
 0xfae   : > { %5497 = dma.vmem_to_hbm [thread:$0]  (%p7876_p7), %s7690_s1, 128, %s7693_s4, %s3980_s5  }
 0xfaf PF: > { %s7877_s6 = sld [smem:[#allocation81_spill]]  ;;  %s7878_s15 = sld [smem:[#allocation79_spill]] }
 0xfb0   : > { %s7879_s0 = sld [smem:[#allocation84_spill]] }
 0xfb5   : > { %p5609_p13 = scmp.ge.s32.totalorder %s7877_s6, 2  ;;  %s4005_s18 = sand.u32 1, %s7878_s15  }
 0xfb6   : > { %p7880_p6 = scmp.ne.s32.totalorder %s7879_s0, 0  ;;  %s4006_s22 = scalar_lea.sflag [#allocation4], %s4005_s18 }
 0xfb8   : > { %p5564_p5 = pnand %p5609_p13, %p7880_p6 }
 0xfba   : > { %6443 = dma.done.wait (!%p5564_p5), %s4006_s22, 128  }
 0xfbb   : > { %6445 = vsyncadd (!%p5564_p5), %s4006_s22, 4294967168  ;;  %s7881_s0 = sld [smem:[#allocation82_spill]]  ;;  %s7882_s2 = sld [smem:[#allocation80_spill]] }
 0xfbc   : > { %s7883_s18 = sld [smem:[#allocation83_spill]]  ;;  %s7884_s15 = smov %s6452_s16 }
 0xfc1   : > { %p106_p0 = scmp.ge.s32.totalorder %s7881_s0, 4   ;;  %s7885_s16 = smov %s7882_s2 }
 0xfc3   :  { %108 = sbr.rel (!%p106_p0) target bundleno = 93 (0x5d), region = 356 }
 0xfca   :  { %4011 = vsyncpa [#allocation3], 1 }
 0xfcb   :  { %4013 = vsyncpa [#allocation3 + $0x1], 1 }
 0xfcc   :  { %4014 = vsyncpa [#allocation6], 1 }
 0xfcd   :  { %4015 = vsyncpa [#allocation9], 1 }
 0xfce   :  { %4016 = vsyncpa [#allocation12], 1 }
 0xfcf   :  { %4017 = vsyncpa [#allocation15], 1 }
 0xfd0   :  { %4018 = vsyncpa [#allocation18], 1 }
 0xfd1   :  { %4019 = vsyncpa [#allocation21], 1 }
 0xfd2   :  { %4020 = vsyncpa [#allocation24], 1 }
 0xfd3   :  { %4021 = vsyncpa [#allocation27], 1 }
 0xfd4   :  { %4022 = vsyncpa [#allocation30], 1 }
 0xfd5   :  { %4023 = vsyncpa [#allocation33], 1 }
 0xfd6   :  { %4024 = vsyncpa [#allocation4], 1 }
 0xfd7   :  { %4026 = vsyncpa [#allocation4 + $0x1], 1 }

</bundles_post_ra>
